<compile_context>
chip_gen: v7x
topology: tpu7x:2x2x1
jax: 0.10.0
libtpu: 0.0.40
codegen_flags: <defaults>
</compile_context>

<pallas_src>
import functools
import math

import jax
import jax.numpy as jnp
from jax.experimental import pallas as pl
from jax.experimental.pallas import tpu as pltpu

NEG = -1e9                        # large-but-safe additive mask value
VMEM_LIMIT = 48 * 1024 * 1024     # explicit scoped-VMEM request: fits v7x's 64 MiB,
                                  # lifts v5e's 16 MiB / v6e's 32 MiB defaults.


# --------------------------------------------------------------------------
# tiling helpers
# --------------------------------------------------------------------------
def _div_tile(dim, cap):
    """Largest multiple-of-8 divisor of dim that is <= cap (else dim itself)."""
    if dim <= cap:
        return dim
    for cand in range(cap - cap % 8, 7, -8):
        if dim % cand == 0:
            return cand
    return dim  # no multiple-of-8 divisor (odd dim): single block


def _choose_tile(dim, cap):
    """Return (tile, padded_dim) for a matmul axis.

    If dim <= cap the whole dim is one block.  Otherwise prefer the largest
    128-multiple divisor <= cap; if none exists, pad dim up to a multiple of a
    128-multiple tile so blocks never silently explode (e.g. vocab=50265).
    """
    if dim <= cap:
        return dim, dim
    for cand in range(cap, 127, -128):
        if dim % cand == 0:
            return cand, dim
    t = min(cap, 256)
    return t, ((dim + t - 1) // t) * t


# --------------------------------------------------------------------------
# Tiled linear: y = x @ w + b  (or x @ w.T + b), bias/activation fused epilogue.
# bf16 MXU operands, f32 accumulation directly into the resident output block.
# --------------------------------------------------------------------------
def _matmul_kernel(x_ref, w_ref, b_ref, o_ref, *, act, transpose_rhs):
    x = x_ref[...].astype(jnp.bfloat16)
    w = w_ref[...].astype(jnp.bfloat16)
    if transpose_rhs:  # w block is (tn, tk): contract dim 1 of both (A @ B^T)
        part = jax.lax.dot_general(x, w, (((1,), (1,)), ((), ())),
                                   preferred_element_type=jnp.float32)
    else:
        part = jnp.dot(x, w, preferred_element_type=jnp.float32)

    @pl.when(pl.program_id(2) == 0)
    def _init():
        o_ref[...] = part

    @pl.when(pl.program_id(2) > 0)
    def _acc():
        o_ref[...] += part

    @pl.when(pl.program_id(2) == pl.num_programs(2) - 1)
    def _finalize():
        y = o_ref[...] + b_ref[...].astype(jnp.float32)
        if act == "relu":
            y = jnp.maximum(y, 0.0)
        elif act == "gelu":
            # tanh-approx GELU (see TODO at top of file)
            y = 0.5 * y * (1.0 + jnp.tanh(0.7978845608028654 *
                                          (y + 0.044715 * y * y * y)))
        o_ref[...] = y


def linear(x, w, b, act="none", transpose_rhs=False):
    """y = x @ w + b (or x @ w.T + b if transpose_rhs, without materializing w.T)."""
    M, K = x.shape
    N = w.shape[0] if transpose_rhs else w.shape[1]
    tm, Mp = _choose_tile(M, 256)
    tn, Np = _choose_tile(N, 256)
    tk, Kp = _choose_tile(K, 512)

    xp = x if (Mp, Kp) == (M, K) else jnp.pad(x, ((0, Mp - M), (0, Kp - K)))
    if transpose_rhs:
        wp = w if (Np, Kp) == (N, K) else jnp.pad(w, ((0, Np - N), (0, Kp - K)))
        w_spec = pl.BlockSpec((tn, tk), lambda i, j, k: (j, k))
    else:
        wp = w if (Kp, Np) == (K, N) else jnp.pad(w, ((0, Kp - K), (0, Np - N)))
        w_spec = pl.BlockSpec((tk, tn), lambda i, j, k: (k, j))
    bp = b if Np == N else jnp.pad(b, (0, Np - N))

    out = pl.pallas_call(
        functools.partial(_matmul_kernel, act=act, transpose_rhs=transpose_rhs),
        out_shape=jax.ShapeDtypeStruct((Mp, Np), jnp.float32),
        grid=(Mp // tm, Np // tn, Kp // tk),
        in_specs=[pl.BlockSpec((tm, tk), lambda i, j, k: (i, k)),
                  w_spec,
                  pl.BlockSpec((1, tn), lambda i, j, k: (0, j))],
        out_specs=pl.BlockSpec((tm, tn), lambda i, j, k: (i, j)),
        compiler_params=pltpu.CompilerParams(
            dimension_semantics=("parallel", "parallel", "arbitrary"),
            vmem_limit_bytes=VMEM_LIMIT),
    )(xp, wp, bp.reshape(1, Np))
    if (Mp, Np) != (M, N):
        out = out[:M, :N]
    return out


# --------------------------------------------------------------------------
# LayerNorm (row-tiled) and fused residual-add + LayerNorm
# --------------------------------------------------------------------------
def _ln_kernel(x_ref, g_ref, b_ref, o_ref):
    x = x_ref[...].astype(jnp.float32)
    mu = jnp.mean(x, axis=-1, keepdims=True)
    var = jnp.mean(jnp.square(x - mu), axis=-1, keepdims=True)
    y = (x - mu) * jax.lax.rsqrt(var + 1e-5)
    o_ref[...] = (y * g_ref[...] + b_ref[...]).astype(o_ref.dtype)


def _add_ln_kernel(x_ref, r_ref, g_ref, b_ref, o_ref):
    x = x_ref[...].astype(jnp.float32) + r_ref[...].astype(jnp.float32)
    mu = jnp.mean(x, axis=-1, keepdims=True)
    var = jnp.mean(jnp.square(x - mu), axis=-1, keepdims=True)
    y = (x - mu) * jax.lax.rsqrt(var + 1e-5)
    o_ref[...] = (y * g_ref[...] + b_ref[...]).astype(o_ref.dtype)


def layer_norm(x3d, g, b):
    B, T, D = x3d.shape
    M = B * T
    tm = _div_tile(M, 512)
    out = pl.pallas_call(
        _ln_kernel,
        out_shape=jax.ShapeDtypeStruct((M, D), jnp.float32),
        grid=(M // tm,),
        in_specs=[pl.BlockSpec((tm, D), lambda i: (i, 0)),
                  pl.BlockSpec((1, D), lambda i: (0, 0)),
                  pl.BlockSpec((1, D), lambda i: (0, 0))],
        out_specs=pl.BlockSpec((tm, D), lambda i: (i, 0)),
        compiler_params=pltpu.CompilerParams(
            dimension_semantics=("parallel",), vmem_limit_bytes=VMEM_LIMIT),
    )(x3d.reshape(M, D), g.reshape(1, D), b.reshape(1, D))
    return out.reshape(B, T, D)


def add_layer_norm(x3d, res3d, g, b):
    """LayerNorm(x + residual) with the residual add fused into the kernel."""
    B, T, D = x3d.shape
    M = B * T
    tm = _div_tile(M, 512)
    out = pl.pallas_call(
        _add_ln_kernel,
        out_shape=jax.ShapeDtypeStruct((M, D), jnp.float32),
        grid=(M // tm,),
        in_specs=[pl.BlockSpec((tm, D), lambda i: (i, 0)),
                  pl.BlockSpec((tm, D), lambda i: (i, 0)),
                  pl.BlockSpec((1, D), lambda i: (0, 0)),
                  pl.BlockSpec((1, D), lambda i: (0, 0))],
        out_specs=pl.BlockSpec((tm, D), lambda i: (i, 0)),
        compiler_params=pltpu.CompilerParams(
            dimension_semantics=("parallel",), vmem_limit_bytes=VMEM_LIMIT),
    )(x3d.reshape(M, D), res3d.reshape(M, D), g.reshape(1, D), b.reshape(1, D))
    return out.reshape(B, T, D)


# --------------------------------------------------------------------------
# Multi-head attention: one grid step per (batch, Tq tile), all heads in-kernel,
# per-head results concatenated -> a single full-lane-width (tq, D) output store.
# Used for both self- and cross-attention (q-scaling folded into w_q at init).
# --------------------------------------------------------------------------
def _attn_kernel(q_ref, kv_ref, m_ref, o_ref, *, heads):
    q = q_ref[0].astype(jnp.float32)            # (tq, D)
    kv = kv_ref[0].astype(jnp.float32)          # (Tk, 2D) = [k | v]
    m = m_ref[0].astype(jnp.float32)            # (1 or tq, Tk) additive
    D = q.shape[-1]
    Dh = D // heads
    k = kv[:, :D]
    v = kv[:, D:]
    outs = []
    for h in range(heads):                      # static slices -> static lane offsets
        sl = slice(h * Dh, (h + 1) * Dh)
        s = jax.lax.dot_general(q[:, sl].astype(jnp.bfloat16),
                                k[:, sl].astype(jnp.bfloat16),
                                (((1,), (1,)), ((), ())),
                                preferred_element_type=jnp.float32)
        s = s + m
        s = s - jnp.max(s, axis=-1, keepdims=True)
        p = jnp.exp(s)
        p = p * pl.reciprocal(jnp.sum(p, axis=-1, keepdims=True), approx=True)
        outs.append(jnp.dot(p.astype(jnp.bfloat16), v[:, sl].astype(jnp.bfloat16),
                            preferred_element_type=jnp.float32))
    o_ref[0] = jnp.concatenate(outs, axis=-1).astype(o_ref.dtype)  # one dense store


def _mask_spec(mask, tq):
    Bm, Mq, Mk = mask.shape
    if Mq == 1:      # padding mask (B, 1, Tk): same row for every q tile
        idx = (lambda b, qi: (b, 0, 0)) if Bm > 1 else (lambda b, qi: (0, 0, 0))
        return pl.BlockSpec((1, 1, Mk), idx)
    # causal / full-rank mask (1 or B, Tq, Tk): pick the current q tile's rows
    idx = (lambda b, qi: (b, qi, 0)) if Bm > 1 else (lambda b, qi: (0, qi, 0))
    return pl.BlockSpec((1, tq, Mk), idx)


def attention(h_q, h_kv, mask_add, p, heads):
    B, Tq, D = h_q.shape
    Tk = h_kv.shape[1]
    q = linear(h_q.reshape(B * Tq, D), p["w_q"], p["b_q"]).reshape(B, Tq, D)
    kv = linear(h_kv.reshape(B * Tk, D), p["w_kv"], p["b_kv"]).reshape(B, Tk, 2 * D)
    tq = _div_tile(Tq, 256)
    ctx = pl.pallas_call(
        functools.partial(_attn_kernel, heads=heads),
        out_shape=jax.ShapeDtypeStruct((B, Tq, D), jnp.float32),
        grid=(B, Tq // tq),
        in_specs=[pl.BlockSpec((1, tq, D), lambda b, qi: (b, qi, 0)),
                  pl.BlockSpec((1, Tk, 2 * D), lambda b, qi: (b, 0, 0)),
                  _mask_spec(mask_add, tq)],
        out_specs=pl.BlockSpec((1, tq, D), lambda b, qi: (b, qi, 0)),
        compiler_params=pltpu.CompilerParams(
            dimension_semantics=("parallel", "parallel"),
            vmem_limit_bytes=VMEM_LIMIT),
    )(q, kv, mask_add)
    return linear(ctx.reshape(B * Tq, D), p["wo"], p["bo"]).reshape(B, Tq, D)


# --------------------------------------------------------------------------
# Cross-entropy from integer labels, 2-D (row-tile, V-tile) grid with online
# max / log-sum-exp accumulation (never needs a full (rows, V) block in VMEM).
# --------------------------------------------------------------------------
def _ce_kernel(logits_ref, labels_ref, o_ref, m_scr, s_scr, t_scr, *, n_rows, n_cols):
    r = pl.program_id(0)
    j = pl.program_id(1)
    nr = pl.num_programs(0)
    nv = pl.num_programs(1)

    @pl.when((r == 0) & (j == 0))
    def _init_out():
        o_ref[...] = jnp.zeros_like(o_ref)

    @pl.when(j == 0)
    def _init_row():
        m_scr[...] = jnp.full_like(m_scr, -1e30)
        s_scr[...] = jnp.zeros_like(s_scr)
        t_scr[...] = jnp.zeros_like(t_scr)

    z = logits_ref[...].astype(jnp.float32)            # (bm, tv)
    lbl = labels_ref[...]                              # (bm, 1) int32
    tv = z.shape[1]
    cols = jax.lax.broadcasted_iota(jnp.int32, z.shape, 1) + j * tv
    z = jnp.where(cols < n_cols, z, NEG)               # mask V tail of the last tile

    blk_max = jnp.max(z, axis=-1, keepdims=True)
    m_new = jnp.maximum(m_scr[...], blk_max)
    s_scr[...] = (s_scr[...] * jnp.exp(m_scr[...] - m_new) +
                  jnp.sum(jnp.exp(z - m_new), axis=-1, keepdims=True))
    m_scr[...] = m_new
    t_scr[...] += jnp.sum(jnp.where(cols == lbl, z, 0.0), axis=-1, keepdims=True)

    @pl.when(j == nv - 1)
    def _row_finalize():
        lse = jnp.log(s_scr[...]) + m_scr[...]
        o_ref[...] += jnp.sum(lse - t_scr[...], axis=0, keepdims=True)

    @pl.when((r == nr - 1) & (j == nv - 1))
    def _finalize():
        o_ref[...] = o_ref[...] * (1.0 / n_rows)


def cross_entropy(logits2d, labels1d):
    # CrossEntropyLoss(mean); no ignore_index entries in this synthetic test.
    N, V = logits2d.shape
    bm = _div_tile(N, 256)
    tv = V if V <= 2048 else 1024          # 128-multiple V tiles for realistic vocab
    labels2d = labels1d.reshape(N, 1).astype(jnp.int32)
    loss = pl.pallas_call(
        functools.partial(_ce_kernel, n_rows=N, n_cols=V),
        out_shape=jax.ShapeDtypeStruct((1, 1), jnp.float32),
        grid=(N // bm, pl.cdiv(V, tv)),
        in_specs=[pl.BlockSpec((bm, tv), lambda r, j: (r, j)),
                  pl.BlockSpec((bm, 1), lambda r, j: (r, 0))],
        out_specs=pl.BlockSpec((1, 1), lambda r, j: (0, 0)),
        scratch_shapes=[pltpu.VMEM((bm, 1), jnp.float32),
                        pltpu.VMEM((bm, 1), jnp.float32),
                        pltpu.VMEM((bm, 1), jnp.float32)],
        compiler_params=pltpu.CompilerParams(
            dimension_semantics=("arbitrary", "arbitrary"),
            vmem_limit_bytes=VMEM_LIMIT),
    )(logits2d, labels2d)
    return loss[0, 0]


# --------------------------------------------------------------------------
# BART building blocks
# --------------------------------------------------------------------------
def ffn(h, p):
    B, T, D = h.shape
    y = linear(h.reshape(B * T, D), p["fc1_w"], p["fc1_b"], act="gelu")
    y = linear(y, p["fc2_w"], p["fc2_b"])
    return y.reshape(B, T, D)


def encoder_layer(h, self_mask, p, heads):
    attn_out = attention(h, h, self_mask, p["self_attn"], heads)
    h = add_layer_norm(attn_out, h, p["sa_ln_g"], p["sa_ln_b"])
    h = add_layer_norm(ffn(h, p), h, p["final_ln_g"], p["final_ln_b"])
    return h


def decoder_layer(h, enc_h, causal_mask, cross_mask, p, heads):
    sa = attention(h, h, causal_mask, p["self_attn"], heads)
    h = add_layer_norm(sa, h, p["sa_ln_g"], p["sa_ln_b"])
    ca = attention(h, enc_h, cross_mask, p["cross_attn"], heads)
    h = add_layer_norm(ca, h, p["ca_ln_g"], p["ca_ln_b"])
    h = add_layer_norm(ffn(h, p), h, p["final_ln_g"], p["final_ln_b"])
    return h


def expand_mask(mask):  # (B, Tk) of 1/0 -> additive (B, 1, Tk); broadcast in-kernel
    m = mask.astype(jnp.float32)[:, None, :]
    return (1.0 - m) * NEG


def bartaac_forward(params, cfg, audio_features, cond_tokens, attention_mask,
                    decoder_input_ids, labels):
    B, S, A = audio_features.shape
    D, H, V = cfg["d_model"], cfg["heads"], cfg["vocab"]
    Td = decoder_input_ids.shape[1]
    embed_scale = math.sqrt(D)   # scale_embedding=True

    # ---- audio adapter: Linear -> ReLU -> Linear (n_adapt_layers = 2) ----
    h = linear(audio_features.reshape(B * S, A), params["adapt_w1"],
               params["adapt_b1"], act="relu")
    audio_embs = linear(h, params["adapt_w2"], params["adapt_b2"]).reshape(B, S, D)

    # ---- token conditioning ----
    cond_emb = jnp.take(params["shared"], cond_tokens, axis=0) * embed_scale
    lm_embs = audio_embs + cond_emb

    # ---- BART encoder ----
    pos = jnp.take(params["enc_pos"], jnp.arange(S) + 2, axis=0)   # learned pos, offset 2
    eh = layer_norm(lm_embs + pos[None], params["enc_ln_emb_g"], params["enc_ln_emb_b"])
    enc_mask = expand_mask(attention_mask)                          # (B, 1, S)
    for lp in params["enc_layers"]:
        eh = encoder_layer(eh, enc_mask, lp, H)

    # ---- BART decoder ----
    demb = jnp.take(params["shared"], decoder_input_ids, axis=0) * embed_scale
    dpos = jnp.take(params["dec_pos"], jnp.arange(Td) + 2, axis=0)
    dh = layer_norm(demb + dpos[None], params["dec_ln_emb_g"], params["dec_ln_emb_b"])
    causal = jnp.where(jnp.arange(Td)[:, None] >= jnp.arange(Td)[None, :],
                       0.0, NEG)[None]                              # (1, Td, Td)
    for lp in params["dec_layers"]:
        dh = decoder_layer(dh, eh, causal, enc_mask, lp, H)

    # ---- LM head tied to shared embedding: contract against (V, D) directly ----
    logits = linear(dh.reshape(B * Td, D), params["shared"],
                    params["final_logits_bias"], transpose_rhs=True).reshape(B, Td, V)
    loss = cross_entropy(logits.reshape(B * Td, V), labels.reshape(-1))
    return loss, logits


# --------------------------------------------------------------------------
# Deterministic parameter init (q / [k|v] split projections, BART q-scaling
# folded into w_q / b_q at init)
# --------------------------------------------------------------------------
class KeyGen:
    def __init__(self, key):
        self.key = key

    def __call__(self):
        self.key, sub = jax.random.split(self.key)
        return sub


def init_params(kg, cfg):
    D, F, V, A, H = (cfg["d_model"], cfg["ffn"], cfg["vocab"],
                     cfg["audio_emb"], cfg["heads"])
    maxp, std = cfg["max_pos"], 0.02
    scaling = (D // H) ** -0.5

    def lin(i, o):
        return (std * jax.random.normal(kg(), (i, o), jnp.float32),
                jnp.zeros((o,), jnp.float32))

    def attn_p():
        wq, bq = lin(D, D); wk, bk = lin(D, D); wv, bv = lin(D, D); wo, bo = lin(D, D)
        return dict(w_q=wq * scaling, b_q=bq * scaling,
                    w_kv=jnp.concatenate([wk, wv], axis=1),
                    b_kv=jnp.concatenate([bk, bv], axis=0),
                    wo=wo, bo=bo)

    def enc_layer_p():
        fc1_w, fc1_b = lin(D, F); fc2_w, fc2_b = lin(F, D)
        return dict(self_attn=attn_p(),
                    sa_ln_g=jnp.ones((D,), jnp.float32), sa_ln_b=jnp.zeros((D,), jnp.float32),
                    fc1_w=fc1_w, fc1_b=fc1_b, fc2_w=fc2_w, fc2_b=fc2_b,
                    final_ln_g=jnp.ones((D,), jnp.float32),
                    final_ln_b=jnp.zeros((D,), jnp.float32))

    def dec_layer_p():
        p = enc_layer_p()
        p["cross_attn"] = attn_p()
        p["ca_ln_g"] = jnp.ones((D,), jnp.float32)
        p["ca_ln_b"] = jnp.zeros((D,), jnp.float32)
        return p

    w1, b1 = lin(A, D)
    w2, b2 = lin(D, D)
    return dict(
        adapt_w1=w1, adapt_b1=b1, adapt_w2=w2, adapt_b2=b2,
        shared=std * jax.random.normal(kg(), (V, D), jnp.float32),
        enc_pos=std * jax.random.normal(kg(), (maxp + 2, D), jnp.float32),
        dec_pos=std * jax.random.normal(kg(), (maxp + 2, D), jnp.float32),
        enc_ln_emb_g=jnp.ones((D,), jnp.float32), enc_ln_emb_b=jnp.zeros((D,), jnp.float32),
        dec_ln_emb_g=jnp.ones((D,), jnp.float32), dec_ln_emb_b=jnp.zeros((D,), jnp.float32),
        final_logits_bias=jnp.zeros((V,), jnp.float32),
        enc_layers=[enc_layer_p() for _ in range(cfg["enc_layers"])],
        dec_layers=[dec_layer_p() for _ in range(cfg["dec_layers"])],
    )


# --------------------------------------------------------------------------
if __name__ == "__main__":
    cfg = dict(d_model=32, heads=4, ffn=64, vocab=96, enc_layers=2, dec_layers=2,
               audio_emb=48, max_pos=64)
    B, S, Td = 2, 8, 8

    root = jax.random.PRNGKey(0)
    k_param, k_audio, k_cond, k_dec, k_lab = jax.random.split(root, 5)

    params = init_params(KeyGen(k_param), cfg)

    audio_features = jax.random.normal(k_audio, (B, S, cfg["audio_emb"]), jnp.float32)
    cond_tokens = jax.random.randint(k_cond, (B, S), 0, cfg["vocab"])
    attention_mask = jnp.ones((B, S), jnp.int32)
    decoder_input_ids = jax.random.randint(k_dec, (B, Td), 0, cfg["vocab"])
    labels = jax.random.randint(k_lab, (B, Td), 0, cfg["vocab"])

    fwd = jax.jit(lambda p, a, c, m, d, l: bartaac_forward(p, cfg, a, c, m, d, l))
    loss, logits = fwd(params, audio_features, cond_tokens, attention_mask,
                       decoder_input_ids, labels)
    jax.block_until_ready((loss, logits))
    assert logits.shape == (B, Td, cfg["vocab"])
    assert loss.shape == ()
    assert bool(jnp.isfinite(loss))
    print("KERNEL_OK")
</pallas_src>

<mosaic_0001>
module attributes {stable_mosaic.version = 11 : i64} {
  func.func @_matmul_kernel(%arg0: i32, %arg1: i32, %arg2: i32, %arg3: memref<16x32xf32, #tpu.memory_space<vmem>>, %arg4: memref<32x32xf32, #tpu.memory_space<vmem>>, %arg5: memref<1x32xf32, #tpu.memory_space<vmem>>, %arg6: memref<16x32xf32, #tpu.memory_space<vmem>>) attributes {dimension_semantics = [#tpu.dimension_semantics<parallel>, #tpu.dimension_semantics<parallel>, #tpu.dimension_semantics<arbitrary>], iteration_bounds = array<i64: 1, 1, 1>, scalar_prefetch = 0 : i64, scratch_operands = 0 : i64, tpu.core_type = #tpu.core_type<tc>, window_params = [{transform_indices = @transform_0, window_bounds = array<i64: 16, 32>}, {transform_indices = @transform_1, window_bounds = array<i64: 32, 32>}, {transform_indices = @transform_2, window_bounds = array<i64: 1, 32>}, {transform_indices = @transform_3, window_bounds = array<i64: 16, 32>}]} {
    %c0 = arith.constant 0 : index
    %c0_0 = arith.constant 0 : index
    %0 = vector.load %arg3[%c0, %c0_0] : memref<16x32xf32, #tpu.memory_space<vmem>>, vector<16x32xf32>
    %1 = arith.truncf %0 : vector<16x32xf32> to vector<16x32xbf16>
    %c0_1 = arith.constant 0 : index
    %c0_2 = arith.constant 0 : index
    %2 = vector.load %arg4[%c0_1, %c0_2] : memref<32x32xf32, #tpu.memory_space<vmem>>, vector<32x32xf32>
    %3 = arith.truncf %2 : vector<32x32xf32> to vector<32x32xbf16>
    %cst = arith.constant dense<0.000000e+00> : vector<16x32xf32>
    %4 = tpu.matmul %1, %3, %cst {dimension_numbers = #tpu.dot_dimension_numbers<[1], [0], [0], [1], [0, 0, 1, 1], [], []>} : vector<16x32xbf16>, vector<32x32xbf16>, vector<16x32xf32> -> vector<16x32xf32>
    %c0_i32 = arith.constant 0 : i32
    %5 = arith.cmpi eq, %arg2, %c0_i32 : i32
    %6 = arith.extui %5 : i1 to i32
    %c0_i32_3 = arith.constant 0 : i32
    %7 = arith.cmpi ne, %6, %c0_i32_3 : i32
    scf.if %7 {
      %c0_8 = arith.constant 0 : index
      %c0_9 = arith.constant 0 : index
      %14 = vector.load %arg6[%c0_8, %c0_9] : memref<16x32xf32, #tpu.memory_space<vmem>>, vector<16x32xf32>
      tpu.vector_store %arg6[%c0_8, %c0_9], %4 {strides = array<i32>} : memref<16x32xf32, #tpu.memory_space<vmem>>, vector<16x32xf32>,
    } else {
    }
    %c0_i32_4 = arith.constant 0 : i32
    %8 = arith.cmpi sgt, %arg2, %c0_i32_4 : i32
    %9 = arith.extui %8 : i1 to i32
    %c0_i32_5 = arith.constant 0 : i32
    %10 = arith.cmpi ne, %9, %c0_i32_5 : i32
    scf.if %10 {
      %c0_8 = arith.constant 0 : index
      %c0_9 = arith.constant 0 : index
      %14 = vector.load %arg6[%c0_8, %c0_9] : memref<16x32xf32, #tpu.memory_space<vmem>>, vector<16x32xf32>
      %15 = arith.addf %14, %4 : vector<16x32xf32>
      %c0_10 = arith.constant 0 : index
      %c0_11 = arith.constant 0 : index
      %16 = vector.load %arg6[%c0_10, %c0_11] : memref<16x32xf32, #tpu.memory_space<vmem>>, vector<16x32xf32>
      tpu.vector_store %arg6[%c0_10, %c0_11], %15 {strides = array<i32>} : memref<16x32xf32, #tpu.memory_space<vmem>>, vector<16x32xf32>,
    } else {
    }
    %c0_i32_6 = arith.constant 0 : i32
    %11 = arith.cmpi eq, %arg2, %c0_i32_6 : i32
    %12 = arith.extui %11 : i1 to i32
    %c0_i32_7 = arith.constant 0 : i32
    %13 = arith.cmpi ne, %12, %c0_i32_7 : i32
    scf.if %13 {
      %c0_8 = arith.constant 0 : index
      %c0_9 = arith.constant 0 : index
      %14 = vector.load %arg6[%c0_8, %c0_9] : memref<16x32xf32, #tpu.memory_space<vmem>>, vector<16x32xf32>
      %c0_10 = arith.constant 0 : index
      %c0_11 = arith.constant 0 : index
      %15 = vector.load %arg5[%c0_10, %c0_11] : memref<1x32xf32, #tpu.memory_space<vmem>>, vector<1x32xf32>
      %16 = vector.broadcast %15 : vector<1x32xf32> to vector<16x32xf32>
      %17 = arith.addf %14, %16 : vector<16x32xf32>
      %c0_12 = arith.constant 0 : index
      %c0_13 = arith.constant 0 : index
      %18 = vector.load %arg6[%c0_12, %c0_13] : memref<16x32xf32, #tpu.memory_space<vmem>>, vector<16x32xf32>
      tpu.vector_store %arg6[%c0_12, %c0_13], %17 {strides = array<i32>} : memref<16x32xf32, #tpu.memory_space<vmem>>, vector<16x32xf32>,
    } else {
    }
    return
  }
  func.func @transform_0(%arg0: i32, %arg1: i32, %arg2: i32) -> (i32, i32) {
    %c0_i32 = arith.constant 0 : i32
    return %arg0, %arg2 : i32, i32
  }
  func.func @transform_1(%arg0: i32, %arg1: i32, %arg2: i32) -> (i32, i32) {
    %c0_i32 = arith.constant 0 : i32
    return %arg2, %arg1 : i32, i32
  }
  func.func @transform_2(%arg0: i32, %arg1: i32, %arg2: i32) -> (i32, i32) {
    %c0_i32 = arith.constant 0 : i32
    %c0_i32_0 = arith.constant 0 : i32
    return %c0_i32, %arg1 : i32, i32
  }
  func.func @transform_3(%arg0: i32, %arg1: i32, %arg2: i32) -> (i32, i32) {
    %c0_i32 = arith.constant 0 : i32
    return %arg0, %arg1 : i32, i32
  }
}

module attributes {stable_mosaic.version = 11 : i64} {
  func.func @_matmul_kernel(%arg0: i32, %arg1: i32, %arg2: i32, %arg3: memref<16x48xf32, #tpu.memory_space<vmem>>, %arg4: memref<48x32xf32, #tpu.memory_space<vmem>>, %arg5: memref<1x32xf32, #tpu.memory_space<vmem>>, %arg6: memref<16x32xf32, #tpu.memory_space<vmem>>) attributes {dimension_semantics = [#tpu.dimension_semantics<parallel>, #tpu.dimension_semantics<parallel>, #tpu.dimension_semantics<arbitrary>], iteration_bounds = array<i64: 1, 1, 1>, scalar_prefetch = 0 : i64, scratch_operands = 0 : i64, tpu.core_type = #tpu.core_type<tc>, window_params = [{transform_indices = @transform_0, window_bounds = array<i64: 16, 48>}, {transform_indices = @transform_1, window_bounds = array<i64: 48, 32>}, {transform_indices = @transform_2, window_bounds = array<i64: 1, 32>}, {transform_indices = @transform_3, window_bounds = array<i64: 16, 32>}]} {
    %c0 = arith.constant 0 : index
    %c0_0 = arith.constant 0 : index
    %0 = vector.load %arg3[%c0, %c0_0] : memref<16x48xf32, #tpu.memory_space<vmem>>, vector<16x48xf32>
    %1 = arith.truncf %0 : vector<16x48xf32> to vector<16x48xbf16>
    %c0_1 = arith.constant 0 : index
    %c0_2 = arith.constant 0 : index
    %2 = vector.load %arg4[%c0_1, %c0_2] : memref<48x32xf32, #tpu.memory_space<vmem>>, vector<48x32xf32>
    %3 = arith.truncf %2 : vector<48x32xf32> to vector<48x32xbf16>
    %cst = arith.constant dense<0.000000e+00> : vector<16x32xf32>
    %4 = tpu.matmul %1, %3, %cst {dimension_numbers = #tpu.dot_dimension_numbers<[1], [0], [0], [1], [0, 0, 1, 1], [], []>} : vector<16x48xbf16>, vector<48x32xbf16>, vector<16x32xf32> -> vector<16x32xf32>
    %c0_i32 = arith.constant 0 : i32
    %5 = arith.cmpi eq, %arg2, %c0_i32 : i32
    %6 = arith.extui %5 : i1 to i32
    %c0_i32_3 = arith.constant 0 : i32
    %7 = arith.cmpi ne, %6, %c0_i32_3 : i32
    scf.if %7 {
      %c0_8 = arith.constant 0 : index
      %c0_9 = arith.constant 0 : index
      %14 = vector.load %arg6[%c0_8, %c0_9] : memref<16x32xf32, #tpu.memory_space<vmem>>, vector<16x32xf32>
      tpu.vector_store %arg6[%c0_8, %c0_9], %4 {strides = array<i32>} : memref<16x32xf32, #tpu.memory_space<vmem>>, vector<16x32xf32>,
    } else {
    }
    %c0_i32_4 = arith.constant 0 : i32
    %8 = arith.cmpi sgt, %arg2, %c0_i32_4 : i32
    %9 = arith.extui %8 : i1 to i32
    %c0_i32_5 = arith.constant 0 : i32
    %10 = arith.cmpi ne, %9, %c0_i32_5 : i32
    scf.if %10 {
      %c0_8 = arith.constant 0 : index
      %c0_9 = arith.constant 0 : index
      %14 = vector.load %arg6[%c0_8, %c0_9] : memref<16x32xf32, #tpu.memory_space<vmem>>, vector<16x32xf32>
      %15 = arith.addf %14, %4 : vector<16x32xf32>
      %c0_10 = arith.constant 0 : index
      %c0_11 = arith.constant 0 : index
      %16 = vector.load %arg6[%c0_10, %c0_11] : memref<16x32xf32, #tpu.memory_space<vmem>>, vector<16x32xf32>
      tpu.vector_store %arg6[%c0_10, %c0_11], %15 {strides = array<i32>} : memref<16x32xf32, #tpu.memory_space<vmem>>, vector<16x32xf32>,
    } else {
    }
    %c0_i32_6 = arith.constant 0 : i32
    %11 = arith.cmpi eq, %arg2, %c0_i32_6 : i32
    %12 = arith.extui %11 : i1 to i32
    %c0_i32_7 = arith.constant 0 : i32
    %13 = arith.cmpi ne, %12, %c0_i32_7 : i32
    scf.if %13 {
      %c0_8 = arith.constant 0 : index
      %c0_9 = arith.constant 0 : index
      %14 = vector.load %arg6[%c0_8, %c0_9] : memref<16x32xf32, #tpu.memory_space<vmem>>, vector<16x32xf32>
      %c0_10 = arith.constant 0 : index
      %c0_11 = arith.constant 0 : index
      %15 = vector.load %arg5[%c0_10, %c0_11] : memref<1x32xf32, #tpu.memory_space<vmem>>, vector<1x32xf32>
      %16 = vector.broadcast %15 : vector<1x32xf32> to vector<16x32xf32>
      %17 = arith.addf %14, %16 : vector<16x32xf32>
      %cst_12 = arith.constant 0.000000e+00 : f32
      %18 = vector.broadcast %cst_12 : f32 to vector<16x32xf32>
      %19 = arith.maximumf %17, %18 : vector<16x32xf32>
      %c0_13 = arith.constant 0 : index
      %c0_14 = arith.constant 0 : index
      %20 = vector.load %arg6[%c0_13, %c0_14] : memref<16x32xf32, #tpu.memory_space<vmem>>, vector<16x32xf32>
      tpu.vector_store %arg6[%c0_13, %c0_14], %19 {strides = array<i32>} : memref<16x32xf32, #tpu.memory_space<vmem>>, vector<16x32xf32>,
    } else {
    }
    return
  }
  func.func @transform_0(%arg0: i32, %arg1: i32, %arg2: i32) -> (i32, i32) {
    %c0_i32 = arith.constant 0 : i32
    return %arg0, %arg2 : i32, i32
  }
  func.func @transform_1(%arg0: i32, %arg1: i32, %arg2: i32) -> (i32, i32) {
    %c0_i32 = arith.constant 0 : i32
    return %arg2, %arg1 : i32, i32
  }
  func.func @transform_2(%arg0: i32, %arg1: i32, %arg2: i32) -> (i32, i32) {
    %c0_i32 = arith.constant 0 : i32
    %c0_i32_0 = arith.constant 0 : i32
    return %c0_i32, %arg1 : i32, i32
  }
  func.func @transform_3(%arg0: i32, %arg1: i32, %arg2: i32) -> (i32, i32) {
    %c0_i32 = arith.constant 0 : i32
    return %arg0, %arg1 : i32, i32
  }
}

module attributes {stable_mosaic.version = 11 : i64} {
  func.func @_matmul_kernel(%arg0: i32, %arg1: i32, %arg2: i32, %arg3: memref<16x32xf32, #tpu.memory_space<vmem>>, %arg4: memref<32x64xf32, #tpu.memory_space<vmem>>, %arg5: memref<1x64xf32, #tpu.memory_space<vmem>>, %arg6: memref<16x64xf32, #tpu.memory_space<vmem>>) attributes {dimension_semantics = [#tpu.dimension_semantics<parallel>, #tpu.dimension_semantics<parallel>, #tpu.dimension_semantics<arbitrary>], iteration_bounds = array<i64: 1, 1, 1>, scalar_prefetch = 0 : i64, scratch_operands = 0 : i64, tpu.core_type = #tpu.core_type<tc>, window_params = [{transform_indices = @transform_0, window_bounds = array<i64: 16, 32>}, {transform_indices = @transform_1, window_bounds = array<i64: 32, 64>}, {transform_indices = @transform_2, window_bounds = array<i64: 1, 64>}, {transform_indices = @transform_3, window_bounds = array<i64: 16, 64>}]} {
    %c0 = arith.constant 0 : index
    %c0_0 = arith.constant 0 : index
    %0 = vector.load %arg3[%c0, %c0_0] : memref<16x32xf32, #tpu.memory_space<vmem>>, vector<16x32xf32>
    %1 = arith.truncf %0 : vector<16x32xf32> to vector<16x32xbf16>
    %c0_1 = arith.constant 0 : index
    %c0_2 = arith.constant 0 : index
    %2 = vector.load %arg4[%c0_1, %c0_2] : memref<32x64xf32, #tpu.memory_space<vmem>>, vector<32x64xf32>
    %3 = arith.truncf %2 : vector<32x64xf32> to vector<32x64xbf16>
    %cst = arith.constant dense<0.000000e+00> : vector<16x64xf32>
    %4 = tpu.matmul %1, %3, %cst {dimension_numbers = #tpu.dot_dimension_numbers<[1], [0], [0], [1], [0, 0, 1, 1], [], []>} : vector<16x32xbf16>, vector<32x64xbf16>, vector<16x64xf32> -> vector<16x64xf32>
    %c0_i32 = arith.constant 0 : i32
    %5 = arith.cmpi eq, %arg2, %c0_i32 : i32
    %6 = arith.extui %5 : i1 to i32
    %c0_i32_3 = arith.constant 0 : i32
    %7 = arith.cmpi ne, %6, %c0_i32_3 : i32
    scf.if %7 {
      %c0_8 = arith.constant 0 : index
      %c0_9 = arith.constant 0 : index
      %14 = vector.load %arg6[%c0_8, %c0_9] : memref<16x64xf32, #tpu.memory_space<vmem>>, vector<16x64xf32>
      tpu.vector_store %arg6[%c0_8, %c0_9], %4 {strides = array<i32>} : memref<16x64xf32, #tpu.memory_space<vmem>>, vector<16x64xf32>,
    } else {
    }
    %c0_i32_4 = arith.constant 0 : i32
    %8 = arith.cmpi sgt, %arg2, %c0_i32_4 : i32
    %9 = arith.extui %8 : i1 to i32
    %c0_i32_5 = arith.constant 0 : i32
    %10 = arith.cmpi ne, %9, %c0_i32_5 : i32
    scf.if %10 {
      %c0_8 = arith.constant 0 : index
      %c0_9 = arith.constant 0 : index
      %14 = vector.load %arg6[%c0_8, %c0_9] : memref<16x64xf32, #tpu.memory_space<vmem>>, vector<16x64xf32>
      %15 = arith.addf %14, %4 : vector<16x64xf32>
      %c0_10 = arith.constant 0 : index
      %c0_11 = arith.constant 0 : index
      %16 = vector.load %arg6[%c0_10, %c0_11] : memref<16x64xf32, #tpu.memory_space<vmem>>, vector<16x64xf32>
      tpu.vector_store %arg6[%c0_10, %c0_11], %15 {strides = array<i32>} : memref<16x64xf32, #tpu.memory_space<vmem>>, vector<16x64xf32>,
    } else {
    }
    %c0_i32_6 = arith.constant 0 : i32
    %11 = arith.cmpi eq, %arg2, %c0_i32_6 : i32
    %12 = arith.extui %11 : i1 to i32
    %c0_i32_7 = arith.constant 0 : i32
    %13 = arith.cmpi ne, %12, %c0_i32_7 : i32
    scf.if %13 {
      %c0_8 = arith.constant 0 : index
      %c0_9 = arith.constant 0 : index
      %14 = vector.load %arg6[%c0_8, %c0_9] : memref<16x64xf32, #tpu.memory_space<vmem>>, vector<16x64xf32>
      %c0_10 = arith.constant 0 : index
      %c0_11 = arith.constant 0 : index
      %15 = vector.load %arg5[%c0_10, %c0_11] : memref<1x64xf32, #tpu.memory_space<vmem>>, vector<1x64xf32>
      %16 = vector.broadcast %15 : vector<1x64xf32> to vector<16x64xf32>
      %17 = arith.addf %14, %16 : vector<16x64xf32>
      %c0_12 = arith.constant 0 : index
      %c0_13 = arith.constant 0 : index
      %18 = vector.load %arg6[%c0_12, %c0_13] : memref<16x64xf32, #tpu.memory_space<vmem>>, vector<16x64xf32>
      tpu.vector_store %arg6[%c0_12, %c0_13], %17 {strides = array<i32>} : memref<16x64xf32, #tpu.memory_space<vmem>>, vector<16x64xf32>,
    } else {
    }
    return
  }
  func.func @transform_0(%arg0: i32, %arg1: i32, %arg2: i32) -> (i32, i32) {
    %c0_i32 = arith.constant 0 : i32
    return %arg0, %arg2 : i32, i32
  }
  func.func @transform_1(%arg0: i32, %arg1: i32, %arg2: i32) -> (i32, i32) {
    %c0_i32 = arith.constant 0 : i32
    return %arg2, %arg1 : i32, i32
  }
  func.func @transform_2(%arg0: i32, %arg1: i32, %arg2: i32) -> (i32, i32) {
    %c0_i32 = arith.constant 0 : i32
    %c0_i32_0 = arith.constant 0 : i32
    return %c0_i32, %arg1 : i32, i32
  }
  func.func @transform_3(%arg0: i32, %arg1: i32, %arg2: i32) -> (i32, i32) {
    %c0_i32 = arith.constant 0 : i32
    return %arg0, %arg1 : i32, i32
  }
}

module attributes {stable_mosaic.version = 11 : i64} {
  func.func @_ln_kernel(%arg0: i32, %arg1: memref<16x32xf32, #tpu.memory_space<vmem>>, %arg2: memref<1x32xf32, #tpu.memory_space<vmem>>, %arg3: memref<1x32xf32, #tpu.memory_space<vmem>>, %arg4: memref<16x32xf32, #tpu.memory_space<vmem>>) attributes {dimension_semantics = [#tpu.dimension_semantics<parallel>], iteration_bounds = array<i64: 1>, scalar_prefetch = 0 : i64, scratch_operands = 0 : i64, tpu.core_type = #tpu.core_type<tc>, window_params = [{transform_indices = @transform_0, window_bounds = array<i64: 16, 32>}, {pipeline_mode = #tpu.pipeline_mode<synchronous>, transform_indices = @transform_1, window_bounds = array<i64: 1, 32>}, {pipeline_mode = #tpu.pipeline_mode<synchronous>, transform_indices = @transform_2, window_bounds = array<i64: 1, 32>}, {transform_indices = @transform_3, window_bounds = array<i64: 16, 32>}]} {
    %c0 = arith.constant 0 : index
    %c0_0 = arith.constant 0 : index
    %0 = vector.load %arg1[%c0, %c0_0] : memref<16x32xf32, #tpu.memory_space<vmem>>, vector<16x32xf32>
    %cst = arith.constant dense<0.000000e+00> : vector<16xf32>
    %1 = vector.multi_reduction <add>, %0, %cst [1] : vector<16x32xf32> to vector<16xf32>
    %2 = vector.shape_cast %1 : vector<16xf32> to vector<16x1xf32>
    %cst_1 = arith.constant 3.200000e+01 : f32
    %3 = vector.broadcast %cst_1 : f32 to vector<16x1xf32>
    %4 = arith.divf %2, %3 : vector<16x1xf32>
    %5 = vector.broadcast %4 : vector<16x1xf32> to vector<16x32xf32>
    %6 = arith.subf %0, %5 : vector<16x32xf32>
    %7 = arith.mulf %6, %6 : vector<16x32xf32>
    %cst_2 = arith.constant dense<0.000000e+00> : vector<16xf32>
    %8 = vector.multi_reduction <add>, %7, %cst_2 [1] : vector<16x32xf32> to vector<16xf32>
    %9 = vector.shape_cast %8 : vector<16xf32> to vector<16x1xf32>
    %cst_3 = arith.constant 3.200000e+01 : f32
    %10 = vector.broadcast %cst_3 : f32 to vector<16x1xf32>
    %11 = arith.divf %9, %10 : vector<16x1xf32>
    %12 = vector.broadcast %4 : vector<16x1xf32> to vector<16x32xf32>
    %13 = arith.subf %0, %12 : vector<16x32xf32>
    %cst_4 = arith.constant 9.99999974E-6 : f32
    %14 = vector.broadcast %cst_4 : f32 to vector<16x1xf32>
    %15 = arith.addf %11, %14 : vector<16x1xf32>
    %16 = math.rsqrt %15 : vector<16x1xf32>
    %17 = vector.broadcast %16 : vector<16x1xf32> to vector<16x32xf32>
    %18 = arith.mulf %13, %17 : vector<16x32xf32>
    %c0_5 = arith.constant 0 : index
    %c0_6 = arith.constant 0 : index
    %19 = vector.load %arg2[%c0_5, %c0_6] : memref<1x32xf32, #tpu.memory_space<vmem>>, vector<1x32xf32>
    %20 = vector.broadcast %19 : vector<1x32xf32> to vector<16x32xf32>
    %21 = arith.mulf %18, %20 : vector<16x32xf32>
    %c0_7 = arith.constant 0 : index
    %c0_8 = arith.constant 0 : index
    %22 = vector.load %arg3[%c0_7, %c0_8] : memref<1x32xf32, #tpu.memory_space<vmem>>, vector<1x32xf32>
    %23 = vector.broadcast %22 : vector<1x32xf32> to vector<16x32xf32>
    %24 = arith.addf %21, %23 : vector<16x32xf32>
    %c0_9 = arith.constant 0 : index
    %c0_10 = arith.constant 0 : index
    %25 = vector.load %arg4[%c0_9, %c0_10] : memref<16x32xf32, #tpu.memory_space<vmem>>, vector<16x32xf32>
    tpu.vector_store %arg4[%c0_9, %c0_10], %24 {strides = array<i32>} : memref<16x32xf32, #tpu.memory_space<vmem>>, vector<16x32xf32>,
    return
  }
  func.func @transform_0(%arg0: i32) -> (i32, i32) {
    %c0_i32 = arith.constant 0 : i32
    %c0_i32_0 = arith.constant 0 : i32
    return %arg0, %c0_i32 : i32, i32
  }
  func.func @transform_1(%arg0: i32) -> (i32, i32) {
    %c0_i32 = arith.constant 0 : i32
    %c0_i32_0 = arith.constant 0 : i32
    %c0_i32_1 = arith.constant 0 : i32
    return %c0_i32, %c0_i32_0 : i32, i32
  }
  func.func @transform_2(%arg0: i32) -> (i32, i32) {
    %c0_i32 = arith.constant 0 : i32
    %c0_i32_0 = arith.constant 0 : i32
    %c0_i32_1 = arith.constant 0 : i32
    return %c0_i32, %c0_i32_0 : i32, i32
  }
  func.func @transform_3(%arg0: i32) -> (i32, i32) {
    %c0_i32 = arith.constant 0 : i32
    %c0_i32_0 = arith.constant 0 : i32
    return %arg0, %c0_i32 : i32, i32
  }
}

module attributes {stable_mosaic.version = 11 : i64} {
  func.func @_add_ln_kernel(%arg0: i32, %arg1: memref<16x32xf32, #tpu.memory_space<vmem>>, %arg2: memref<16x32xf32, #tpu.memory_space<vmem>>, %arg3: memref<1x32xf32, #tpu.memory_space<vmem>>, %arg4: memref<1x32xf32, #tpu.memory_space<vmem>>, %arg5: memref<16x32xf32, #tpu.memory_space<vmem>>) attributes {dimension_semantics = [#tpu.dimension_semantics<parallel>], iteration_bounds = array<i64: 1>, scalar_prefetch = 0 : i64, scratch_operands = 0 : i64, tpu.core_type = #tpu.core_type<tc>, window_params = [{transform_indices = @transform_0, window_bounds = array<i64: 16, 32>}, {transform_indices = @transform_1, window_bounds = array<i64: 16, 32>}, {pipeline_mode = #tpu.pipeline_mode<synchronous>, transform_indices = @transform_2, window_bounds = array<i64: 1, 32>}, {pipeline_mode = #tpu.pipeline_mode<synchronous>, transform_indices = @transform_3, window_bounds = array<i64: 1, 32>}, {transform_indices = @transform_4, window_bounds = array<i64: 16, 32>}]} {
    %c0 = arith.constant 0 : index
    %c0_0 = arith.constant 0 : index
    %0 = vector.load %arg1[%c0, %c0_0] : memref<16x32xf32, #tpu.memory_space<vmem>>, vector<16x32xf32>
    %c0_1 = arith.constant 0 : index
    %c0_2 = arith.constant 0 : index
    %1 = vector.load %arg2[%c0_1, %c0_2] : memref<16x32xf32, #tpu.memory_space<vmem>>, vector<16x32xf32>
    %2 = arith.addf %0, %1 : vector<16x32xf32>
    %cst = arith.constant dense<0.000000e+00> : vector<16xf32>
    %3 = vector.multi_reduction <add>, %2, %cst [1] : vector<16x32xf32> to vector<16xf32>
    %4 = vector.shape_cast %3 : vector<16xf32> to vector<16x1xf32>
    %cst_3 = arith.constant 3.200000e+01 : f32
    %5 = vector.broadcast %cst_3 : f32 to vector<16x1xf32>
    %6 = arith.divf %4, %5 : vector<16x1xf32>
    %7 = vector.broadcast %6 : vector<16x1xf32> to vector<16x32xf32>
    %8 = arith.subf %2, %7 : vector<16x32xf32>
    %9 = arith.mulf %8, %8 : vector<16x32xf32>
    %cst_4 = arith.constant dense<0.000000e+00> : vector<16xf32>
    %10 = vector.multi_reduction <add>, %9, %cst_4 [1] : vector<16x32xf32> to vector<16xf32>
    %11 = vector.shape_cast %10 : vector<16xf32> to vector<16x1xf32>
    %cst_5 = arith.constant 3.200000e+01 : f32
    %12 = vector.broadcast %cst_5 : f32 to vector<16x1xf32>
    %13 = arith.divf %11, %12 : vector<16x1xf32>
    %14 = vector.broadcast %6 : vector<16x1xf32> to vector<16x32xf32>
    %15 = arith.subf %2, %14 : vector<16x32xf32>
    %cst_6 = arith.constant 9.99999974E-6 : f32
    %16 = vector.broadcast %cst_6 : f32 to vector<16x1xf32>
    %17 = arith.addf %13, %16 : vector<16x1xf32>
    %18 = math.rsqrt %17 : vector<16x1xf32>
    %19 = vector.broadcast %18 : vector<16x1xf32> to vector<16x32xf32>
    %20 = arith.mulf %15, %19 : vector<16x32xf32>
    %c0_7 = arith.constant 0 : index
    %c0_8 = arith.constant 0 : index
    %21 = vector.load %arg3[%c0_7, %c0_8] : memref<1x32xf32, #tpu.memory_space<vmem>>, vector<1x32xf32>
    %22 = vector.broadcast %21 : vector<1x32xf32> to vector<16x32xf32>
    %23 = arith.mulf %20, %22 : vector<16x32xf32>
    %c0_9 = arith.constant 0 : index
    %c0_10 = arith.constant 0 : index
    %24 = vector.load %arg4[%c0_9, %c0_10] : memref<1x32xf32, #tpu.memory_space<vmem>>, vector<1x32xf32>
    %25 = vector.broadcast %24 : vector<1x32xf32> to vector<16x32xf32>
    %26 = arith.addf %23, %25 : vector<16x32xf32>
    %c0_11 = arith.constant 0 : index
    %c0_12 = arith.constant 0 : index
    %27 = vector.load %arg5[%c0_11, %c0_12] : memref<16x32xf32, #tpu.memory_space<vmem>>, vector<16x32xf32>
    tpu.vector_store %arg5[%c0_11, %c0_12], %26 {strides = array<i32>} : memref<16x32xf32, #tpu.memory_space<vmem>>, vector<16x32xf32>,
    return
  }
  func.func @transform_0(%arg0: i32) -> (i32, i32) {
    %c0_i32 = arith.constant 0 : i32
    %c0_i32_0 = arith.constant 0 : i32
    return %arg0, %c0_i32 : i32, i32
  }
  func.func @transform_1(%arg0: i32) -> (i32, i32) {
    %c0_i32 = arith.constant 0 : i32
    %c0_i32_0 = arith.constant 0 : i32
    return %arg0, %c0_i32 : i32, i32
  }
  func.func @transform_2(%arg0: i32) -> (i32, i32) {
    %c0_i32 = arith.constant 0 : i32
    %c0_i32_0 = arith.constant 0 : i32
    %c0_i32_1 = arith.constant 0 : i32
    return %c0_i32, %c0_i32_0 : i32, i32
  }
  func.func @transform_3(%arg0: i32) -> (i32, i32) {
    %c0_i32 = arith.constant 0 : i32
    %c0_i32_0 = arith.constant 0 : i32
    %c0_i32_1 = arith.constant 0 : i32
    return %c0_i32, %c0_i32_0 : i32, i32
  }
  func.func @transform_4(%arg0: i32) -> (i32, i32) {
    %c0_i32 = arith.constant 0 : i32
    %c0_i32_0 = arith.constant 0 : i32
    return %arg0, %c0_i32 : i32, i32
  }
}

module attributes {stable_mosaic.version = 11 : i64} {
  func.func @_matmul_kernel(%arg0: i32, %arg1: i32, %arg2: i32, %arg3: memref<16x32xf32, #tpu.memory_space<vmem>>, %arg4: memref<32x64xf32, #tpu.memory_space<vmem>>, %arg5: memref<1x64xf32, #tpu.memory_space<vmem>>, %arg6: memref<16x64xf32, #tpu.memory_space<vmem>>) attributes {dimension_semantics = [#tpu.dimension_semantics<parallel>, #tpu.dimension_semantics<parallel>, #tpu.dimension_semantics<arbitrary>], iteration_bounds = array<i64: 1, 1, 1>, scalar_prefetch = 0 : i64, scratch_operands = 0 : i64, tpu.core_type = #tpu.core_type<tc>, window_params = [{transform_indices = @transform_0, window_bounds = array<i64: 16, 32>}, {transform_indices = @transform_1, window_bounds = array<i64: 32, 64>}, {transform_indices = @transform_2, window_bounds = array<i64: 1, 64>}, {transform_indices = @transform_3, window_bounds = array<i64: 16, 64>}]} {
    %c0 = arith.constant 0 : index
    %c0_0 = arith.constant 0 : index
    %0 = vector.load %arg3[%c0, %c0_0] : memref<16x32xf32, #tpu.memory_space<vmem>>, vector<16x32xf32>
    %1 = arith.truncf %0 : vector<16x32xf32> to vector<16x32xbf16>
    %c0_1 = arith.constant 0 : index
    %c0_2 = arith.constant 0 : index
    %2 = vector.load %arg4[%c0_1, %c0_2] : memref<32x64xf32, #tpu.memory_space<vmem>>, vector<32x64xf32>
    %3 = arith.truncf %2 : vector<32x64xf32> to vector<32x64xbf16>
    %cst = arith.constant dense<0.000000e+00> : vector<16x64xf32>
    %4 = tpu.matmul %1, %3, %cst {dimension_numbers = #tpu.dot_dimension_numbers<[1], [0], [0], [1], [0, 0, 1, 1], [], []>} : vector<16x32xbf16>, vector<32x64xbf16>, vector<16x64xf32> -> vector<16x64xf32>
    %c0_i32 = arith.constant 0 : i32
    %5 = arith.cmpi eq, %arg2, %c0_i32 : i32
    %6 = arith.extui %5 : i1 to i32
    %c0_i32_3 = arith.constant 0 : i32
    %7 = arith.cmpi ne, %6, %c0_i32_3 : i32
    scf.if %7 {
      %c0_8 = arith.constant 0 : index
      %c0_9 = arith.constant 0 : index
      %14 = vector.load %arg6[%c0_8, %c0_9] : memref<16x64xf32, #tpu.memory_space<vmem>>, vector<16x64xf32>
      tpu.vector_store %arg6[%c0_8, %c0_9], %4 {strides = array<i32>} : memref<16x64xf32, #tpu.memory_space<vmem>>, vector<16x64xf32>,
    } else {
    }
    %c0_i32_4 = arith.constant 0 : i32
    %8 = arith.cmpi sgt, %arg2, %c0_i32_4 : i32
    %9 = arith.extui %8 : i1 to i32
    %c0_i32_5 = arith.constant 0 : i32
    %10 = arith.cmpi ne, %9, %c0_i32_5 : i32
    scf.if %10 {
      %c0_8 = arith.constant 0 : index
      %c0_9 = arith.constant 0 : index
      %14 = vector.load %arg6[%c0_8, %c0_9] : memref<16x64xf32, #tpu.memory_space<vmem>>, vector<16x64xf32>
      %15 = arith.addf %14, %4 : vector<16x64xf32>
      %c0_10 = arith.constant 0 : index
      %c0_11 = arith.constant 0 : index
      %16 = vector.load %arg6[%c0_10, %c0_11] : memref<16x64xf32, #tpu.memory_space<vmem>>, vector<16x64xf32>
      tpu.vector_store %arg6[%c0_10, %c0_11], %15 {strides = array<i32>} : memref<16x64xf32, #tpu.memory_space<vmem>>, vector<16x64xf32>,
    } else {
    }
    %c0_i32_6 = arith.constant 0 : i32
    %11 = arith.cmpi eq, %arg2, %c0_i32_6 : i32
    %12 = arith.extui %11 : i1 to i32
    %c0_i32_7 = arith.constant 0 : i32
    %13 = arith.cmpi ne, %12, %c0_i32_7 : i32
    scf.if %13 {
      %c0_8 = arith.constant 0 : index
      %c0_9 = arith.constant 0 : index
      %14 = vector.load %arg6[%c0_8, %c0_9] : memref<16x64xf32, #tpu.memory_space<vmem>>, vector<16x64xf32>
      %c0_10 = arith.constant 0 : index
      %c0_11 = arith.constant 0 : index
      %15 = vector.load %arg5[%c0_10, %c0_11] : memref<1x64xf32, #tpu.memory_space<vmem>>, vector<1x64xf32>
      %16 = vector.broadcast %15 : vector<1x64xf32> to vector<16x64xf32>
      %17 = arith.addf %14, %16 : vector<16x64xf32>
      %cst_12 = arith.constant 5.000000e-01 : f32
      %18 = vector.broadcast %cst_12 : f32 to vector<16x64xf32>
      %19 = arith.mulf %18, %17 : vector<16x64xf32>
      %cst_13 = arith.constant 4.471500e-02 : f32
      %20 = vector.broadcast %cst_13 : f32 to vector<16x64xf32>
      %21 = arith.mulf %20, %17 : vector<16x64xf32>
      %22 = arith.mulf %21, %17 : vector<16x64xf32>
      %23 = arith.mulf %22, %17 : vector<16x64xf32>
      %24 = arith.addf %17, %23 : vector<16x64xf32>
      %cst_14 = arith.constant 0.797884583 : f32
      %25 = vector.broadcast %cst_14 : f32 to vector<16x64xf32>
      %26 = arith.mulf %25, %24 : vector<16x64xf32>
      %27 = math.tanh %26 : vector<16x64xf32>
      %cst_15 = arith.constant 1.000000e+00 : f32
      %28 = vector.broadcast %cst_15 : f32 to vector<16x64xf32>
      %29 = arith.addf %28, %27 : vector<16x64xf32>
      %30 = arith.mulf %19, %29 : vector<16x64xf32>
      %c0_16 = arith.constant 0 : index
      %c0_17 = arith.constant 0 : index
      %31 = vector.load %arg6[%c0_16, %c0_17] : memref<16x64xf32, #tpu.memory_space<vmem>>, vector<16x64xf32>
      tpu.vector_store %arg6[%c0_16, %c0_17], %30 {strides = array<i32>} : memref<16x64xf32, #tpu.memory_space<vmem>>, vector<16x64xf32>,
    } else {
    }
    return
  }
  func.func @transform_0(%arg0: i32, %arg1: i32, %arg2: i32) -> (i32, i32) {
    %c0_i32 = arith.constant 0 : i32
    return %arg0, %arg2 : i32, i32
  }
  func.func @transform_1(%arg0: i32, %arg1: i32, %arg2: i32) -> (i32, i32) {
    %c0_i32 = arith.constant 0 : i32
    return %arg2, %arg1 : i32, i32
  }
  func.func @transform_2(%arg0: i32, %arg1: i32, %arg2: i32) -> (i32, i32) {
    %c0_i32 = arith.constant 0 : i32
    %c0_i32_0 = arith.constant 0 : i32
    return %c0_i32, %arg1 : i32, i32
  }
  func.func @transform_3(%arg0: i32, %arg1: i32, %arg2: i32) -> (i32, i32) {
    %c0_i32 = arith.constant 0 : i32
    return %arg0, %arg1 : i32, i32
  }
}

module attributes {stable_mosaic.version = 11 : i64} {
  func.func @_attn_kernel(%arg0: i32, %arg1: i32, %arg2: memref<1x8x32xf32, #tpu.memory_space<vmem>>, %arg3: memref<1x8x64xf32, #tpu.memory_space<vmem>>, %arg4: memref<1x1x8xf32, #tpu.memory_space<vmem>>, %arg5: memref<1x8x32xf32, #tpu.memory_space<vmem>>) attributes {dimension_semantics = [#tpu.dimension_semantics<parallel>, #tpu.dimension_semantics<parallel>], iteration_bounds = array<i64: 2, 1>, scalar_prefetch = 0 : i64, scratch_operands = 0 : i64, tpu.core_type = #tpu.core_type<tc>, window_params = [{transform_indices = @transform_0, window_bounds = array<i64: 1, 8, 32>}, {transform_indices = @transform_1, window_bounds = array<i64: 1, 8, 64>}, {transform_indices = @transform_2, window_bounds = array<i64: 1, 1, 8>}, {transform_indices = @transform_3, window_bounds = array<i64: 1, 8, 32>}]} {
    %c0 = arith.constant 0 : index
    %c0_0 = arith.constant 0 : index
    %c0_1 = arith.constant 0 : index
    %0 = vector.load %arg2[%c0, %c0_0, %c0_1] : memref<1x8x32xf32, #tpu.memory_space<vmem>>, vector<1x8x32xf32>
    %1 = vector.shape_cast %0 : vector<1x8x32xf32> to vector<8x32xf32>
    %c0_2 = arith.constant 0 : index
    %c0_3 = arith.constant 0 : index
    %c0_4 = arith.constant 0 : index
    %2 = vector.load %arg3[%c0_2, %c0_3, %c0_4] : memref<1x8x64xf32, #tpu.memory_space<vmem>>, vector<1x8x64xf32>
    %3 = vector.shape_cast %2 : vector<1x8x64xf32> to vector<8x64xf32>
    %c0_5 = arith.constant 0 : index
    %c0_6 = arith.constant 0 : index
    %c0_7 = arith.constant 0 : index
    %4 = vector.load %arg4[%c0_5, %c0_6, %c0_7] : memref<1x1x8xf32, #tpu.memory_space<vmem>>, vector<1x1x8xf32>
    %5 = vector.shape_cast %4 : vector<1x1x8xf32> to vector<1x8xf32>
    %6 = vector.extract_strided_slice %3 {offsets = [0, 0], sizes = [8, 32], strides = [1, 1]} : vector<8x64xf32> to vector<8x32xf32>
    %7 = vector.extract_strided_slice %3 {offsets = [0, 32], sizes = [8, 32], strides = [1, 1]} : vector<8x64xf32> to vector<8x32xf32>
    %8 = vector.extract_strided_slice %1 {offsets = [0, 0], sizes = [8, 8], strides = [1, 1]} : vector<8x32xf32> to vector<8x8xf32>
    %9 = arith.truncf %8 : vector<8x8xf32> to vector<8x8xbf16>
    %10 = vector.extract_strided_slice %6 {offsets = [0, 0], sizes = [8, 8], strides = [1, 1]} : vector<8x32xf32> to vector<8x8xf32>
    %11 = arith.truncf %10 : vector<8x8xf32> to vector<8x8xbf16>
    %cst = arith.constant dense<0.000000e+00> : vector<8x8xf32>
    %12 = tpu.matmul %9, %11, %cst {dimension_numbers = #tpu.dot_dimension_numbers<[1], [1], [0], [0], [0, 0, 1, 0], [], []>} : vector<8x8xbf16>, vector<8x8xbf16>, vector<8x8xf32> -> vector<8x8xf32>
    %13 = vector.broadcast %5 : vector<1x8xf32> to vector<8x8xf32>
    %14 = arith.addf %12, %13 : vector<8x8xf32>
    %cst_8 = arith.constant dense<0xFF800000> : vector<8xf32>
    %15 = vector.multi_reduction <maximumf>, %14, %cst_8 [1] : vector<8x8xf32> to vector<8xf32>
    %16 = vector.shape_cast %15 : vector<8xf32> to vector<8x1xf32>
    %17 = vector.broadcast %16 : vector<8x1xf32> to vector<8x8xf32>
    %18 = arith.subf %14, %17 : vector<8x8xf32>
    %19 = math.exp %18 : vector<8x8xf32>
    %cst_9 = arith.constant dense<0.000000e+00> : vector<8xf32>
    %20 = vector.multi_reduction <add>, %19, %cst_9 [1] : vector<8x8xf32> to vector<8xf32>
    %21 = vector.shape_cast %20 : vector<8xf32> to vector<8x1xf32>
    %22 = tpu.reciprocal %21 {approx = true} : vector<8x1xf32> -> vector<8x1xf32>
    %23 = vector.broadcast %22 : vector<8x1xf32> to vector<8x8xf32>
    %24 = arith.mulf %19, %23 : vector<8x8xf32>
    %25 = arith.truncf %24 : vector<8x8xf32> to vector<8x8xbf16>
    %26 = vector.extract_strided_slice %7 {offsets = [0, 0], sizes = [8, 8], strides = [1, 1]} : vector<8x32xf32> to vector<8x8xf32>
    %27 = arith.truncf %26 : vector<8x8xf32> to vector<8x8xbf16>
    %cst_10 = arith.constant dense<0.000000e+00> : vector<8x8xf32>
    %28 = tpu.matmul %25, %27, %cst_10 {dimension_numbers = #tpu.dot_dimension_numbers<[1], [0], [0], [1], [0, 0, 1, 1], [], []>} : vector<8x8xbf16>, vector<8x8xbf16>, vector<8x8xf32> -> vector<8x8xf32>
    %29 = vector.extract_strided_slice %1 {offsets = [0, 8], sizes = [8, 8], strides = [1, 1]} : vector<8x32xf32> to vector<8x8xf32>
    %30 = arith.truncf %29 : vector<8x8xf32> to vector<8x8xbf16>
    %31 = vector.extract_strided_slice %6 {offsets = [0, 8], sizes = [8, 8], strides = [1, 1]} : vector<8x32xf32> to vector<8x8xf32>
    %32 = arith.truncf %31 : vector<8x8xf32> to vector<8x8xbf16>
    %cst_11 = arith.constant dense<0.000000e+00> : vector<8x8xf32>
    %33 = tpu.matmul %30, %32, %cst_11 {dimension_numbers = #tpu.dot_dimension_numbers<[1], [1], [0], [0], [0, 0, 1, 0], [], []>} : vector<8x8xbf16>, vector<8x8xbf16>, vector<8x8xf32> -> vector<8x8xf32>
    %34 = vector.broadcast %5 : vector<1x8xf32> to vector<8x8xf32>
    %35 = arith.addf %33, %34 : vector<8x8xf32>
    %cst_12 = arith.constant dense<0xFF800000> : vector<8xf32>
    %36 = vector.multi_reduction <maximumf>, %35, %cst_12 [1] : vector<8x8xf32> to vector<8xf32>
    %37 = vector.shape_cast %36 : vector<8xf32> to vector<8x1xf32>
    %38 = vector.broadcast %37 : vector<8x1xf32> to vector<8x8xf32>
    %39 = arith.subf %35, %38 : vector<8x8xf32>
    %40 = math.exp %39 : vector<8x8xf32>
    %cst_13 = arith.constant dense<0.000000e+00> : vector<8xf32>
    %41 = vector.multi_reduction <add>, %40, %cst_13 [1] : vector<8x8xf32> to vector<8xf32>
    %42 = vector.shape_cast %41 : vector<8xf32> to vector<8x1xf32>
    %43 = tpu.reciprocal %42 {approx = true} : vector<8x1xf32> -> vector<8x1xf32>
    %44 = vector.broadcast %43 : vector<8x1xf32> to vector<8x8xf32>
    %45 = arith.mulf %40, %44 : vector<8x8xf32>
    %46 = arith.truncf %45 : vector<8x8xf32> to vector<8x8xbf16>
    %47 = vector.extract_strided_slice %7 {offsets = [0, 8], sizes = [8, 8], strides = [1, 1]} : vector<8x32xf32> to vector<8x8xf32>
    %48 = arith.truncf %47 : vector<8x8xf32> to vector<8x8xbf16>
    %cst_14 = arith.constant dense<0.000000e+00> : vector<8x8xf32>
    %49 = tpu.matmul %46, %48, %cst_14 {dimension_numbers = #tpu.dot_dimension_numbers<[1], [0], [0], [1], [0, 0, 1, 1], [], []>} : vector<8x8xbf16>, vector<8x8xbf16>, vector<8x8xf32> -> vector<8x8xf32>
    %50 = vector.extract_strided_slice %1 {offsets = [0, 16], sizes = [8, 8], strides = [1, 1]} : vector<8x32xf32> to vector<8x8xf32>
    %51 = arith.truncf %50 : vector<8x8xf32> to vector<8x8xbf16>
    %52 = vector.extract_strided_slice %6 {offsets = [0, 16], sizes = [8, 8], strides = [1, 1]} : vector<8x32xf32> to vector<8x8xf32>
    %53 = arith.truncf %52 : vector<8x8xf32> to vector<8x8xbf16>
    %cst_15 = arith.constant dense<0.000000e+00> : vector<8x8xf32>
    %54 = tpu.matmul %51, %53, %cst_15 {dimension_numbers = #tpu.dot_dimension_numbers<[1], [1], [0], [0], [0, 0, 1, 0], [], []>} : vector<8x8xbf16>, vector<8x8xbf16>, vector<8x8xf32> -> vector<8x8xf32>
    %55 = vector.broadcast %5 : vector<1x8xf32> to vector<8x8xf32>
    %56 = arith.addf %54, %55 : vector<8x8xf32>
    %cst_16 = arith.constant dense<0xFF800000> : vector<8xf32>
    %57 = vector.multi_reduction <maximumf>, %56, %cst_16 [1] : vector<8x8xf32> to vector<8xf32>
    %58 = vector.shape_cast %57 : vector<8xf32> to vector<8x1xf32>
    %59 = vector.broadcast %58 : vector<8x1xf32> to vector<8x8xf32>
    %60 = arith.subf %56, %59 : vector<8x8xf32>
    %61 = math.exp %60 : vector<8x8xf32>
    %cst_17 = arith.constant dense<0.000000e+00> : vector<8xf32>
    %62 = vector.multi_reduction <add>, %61, %cst_17 [1] : vector<8x8xf32> to vector<8xf32>
    %63 = vector.shape_cast %62 : vector<8xf32> to vector<8x1xf32>
    %64 = tpu.reciprocal %63 {approx = true} : vector<8x1xf32> -> vector<8x1xf32>
    %65 = vector.broadcast %64 : vector<8x1xf32> to vector<8x8xf32>
    %66 = arith.mulf %61, %65 : vector<8x8xf32>
    %67 = arith.truncf %66 : vector<8x8xf32> to vector<8x8xbf16>
    %68 = vector.extract_strided_slice %7 {offsets = [0, 16], sizes = [8, 8], strides = [1, 1]} : vector<8x32xf32> to vector<8x8xf32>
    %69 = arith.truncf %68 : vector<8x8xf32> to vector<8x8xbf16>
    %cst_18 = arith.constant dense<0.000000e+00> : vector<8x8xf32>
    %70 = tpu.matmul %67, %69, %cst_18 {dimension_numbers = #tpu.dot_dimension_numbers<[1], [0], [0], [1], [0, 0, 1, 1], [], []>} : vector<8x8xbf16>, vector<8x8xbf16>, vector<8x8xf32> -> vector<8x8xf32>
    %71 = vector.extract_strided_slice %1 {offsets = [0, 24], sizes = [8, 8], strides = [1, 1]} : vector<8x32xf32> to vector<8x8xf32>
    %72 = arith.truncf %71 : vector<8x8xf32> to vector<8x8xbf16>
    %73 = vector.extract_strided_slice %6 {offsets = [0, 24], sizes = [8, 8], strides = [1, 1]} : vector<8x32xf32> to vector<8x8xf32>
    %74 = arith.truncf %73 : vector<8x8xf32> to vector<8x8xbf16>
    %cst_19 = arith.constant dense<0.000000e+00> : vector<8x8xf32>
    %75 = tpu.matmul %72, %74, %cst_19 {dimension_numbers = #tpu.dot_dimension_numbers<[1], [1], [0], [0], [0, 0, 1, 0], [], []>} : vector<8x8xbf16>, vector<8x8xbf16>, vector<8x8xf32> -> vector<8x8xf32>
    %76 = vector.broadcast %5 : vector<1x8xf32> to vector<8x8xf32>
    %77 = arith.addf %75, %76 : vector<8x8xf32>
    %cst_20 = arith.constant dense<0xFF800000> : vector<8xf32>
    %78 = vector.multi_reduction <maximumf>, %77, %cst_20 [1] : vector<8x8xf32> to vector<8xf32>
    %79 = vector.shape_cast %78 : vector<8xf32> to vector<8x1xf32>
    %80 = vector.broadcast %79 : vector<8x1xf32> to vector<8x8xf32>
    %81 = arith.subf %77, %80 : vector<8x8xf32>
    %82 = math.exp %81 : vector<8x8xf32>
    %cst_21 = arith.constant dense<0.000000e+00> : vector<8xf32>
    %83 = vector.multi_reduction <add>, %82, %cst_21 [1] : vector<8x8xf32> to vector<8xf32>
    %84 = vector.shape_cast %83 : vector<8xf32> to vector<8x1xf32>
    %85 = tpu.reciprocal %84 {approx = true} : vector<8x1xf32> -> vector<8x1xf32>
    %86 = vector.broadcast %85 : vector<8x1xf32> to vector<8x8xf32>
    %87 = arith.mulf %82, %86 : vector<8x8xf32>
    %88 = arith.truncf %87 : vector<8x8xf32> to vector<8x8xbf16>
    %89 = vector.extract_strided_slice %7 {offsets = [0, 24], sizes = [8, 8], strides = [1, 1]} : vector<8x32xf32> to vector<8x8xf32>
    %90 = arith.truncf %89 : vector<8x8xf32> to vector<8x8xbf16>
    %cst_22 = arith.constant dense<0.000000e+00> : vector<8x8xf32>
    %91 = tpu.matmul %88, %90, %cst_22 {dimension_numbers = #tpu.dot_dimension_numbers<[1], [0], [0], [1], [0, 0, 1, 1], [], []>} : vector<8x8xbf16>, vector<8x8xbf16>, vector<8x8xf32> -> vector<8x8xf32>
    %92 = tpu.concatenate %28, %49, %70, %91 in 1 : vector<8x8xf32>, vector<8x8xf32>, vector<8x8xf32>, vector<8x8xf32> -> vector<8x32xf32>
    %c0_23 = arith.constant 0 : index
    %c0_24 = arith.constant 0 : index
    %c0_25 = arith.constant 0 : index
    %93 = vector.load %arg5[%c0_23, %c0_24, %c0_25] : memref<1x8x32xf32, #tpu.memory_space<vmem>>, vector<1x8x32xf32>
    %94 = vector.shape_cast %93 : vector<1x8x32xf32> to vector<8x32xf32>
    %95 = vector.shape_cast %92 : vector<8x32xf32> to vector<1x8x32xf32>
    tpu.vector_store %arg5[%c0_23, %c0_24, %c0_25], %95 {strides = array<i32>} : memref<1x8x32xf32, #tpu.memory_space<vmem>>, vector<1x8x32xf32>,
    return
  }
  func.func @transform_0(%arg0: i32, %arg1: i32) -> (i32, i32, i32) {
    %c0_i32 = arith.constant 0 : i32
    %c0_i32_0 = arith.constant 0 : i32
    return %arg0, %arg1, %c0_i32 : i32, i32, i32
  }
  func.func @transform_1(%arg0: i32, %arg1: i32) -> (i32, i32, i32) {
    %c0_i32 = arith.constant 0 : i32
    %c0_i32_0 = arith.constant 0 : i32
    %c0_i32_1 = arith.constant 0 : i32
    return %arg0, %c0_i32, %c0_i32_0 : i32, i32, i32
  }
  func.func @transform_2(%arg0: i32, %arg1: i32) -> (i32, i32, i32) {
    %c0_i32 = arith.constant 0 : i32
    %c0_i32_0 = arith.constant 0 : i32
    %c0_i32_1 = arith.constant 0 : i32
    return %arg0, %c0_i32, %c0_i32_0 : i32, i32, i32
  }
  func.func @transform_3(%arg0: i32, %arg1: i32) -> (i32, i32, i32) {
    %c0_i32 = arith.constant 0 : i32
    %c0_i32_0 = arith.constant 0 : i32
    return %arg0, %arg1, %c0_i32 : i32, i32, i32
  }
}

module attributes {stable_mosaic.version = 11 : i64} {
  func.func @_matmul_kernel(%arg0: i32, %arg1: i32, %arg2: i32, %arg3: memref<16x64xf32, #tpu.memory_space<vmem>>, %arg4: memref<64x32xf32, #tpu.memory_space<vmem>>, %arg5: memref<1x32xf32, #tpu.memory_space<vmem>>, %arg6: memref<16x32xf32, #tpu.memory_space<vmem>>) attributes {dimension_semantics = [#tpu.dimension_semantics<parallel>, #tpu.dimension_semantics<parallel>, #tpu.dimension_semantics<arbitrary>], iteration_bounds = array<i64: 1, 1, 1>, scalar_prefetch = 0 : i64, scratch_operands = 0 : i64, tpu.core_type = #tpu.core_type<tc>, window_params = [{transform_indices = @transform_0, window_bounds = array<i64: 16, 64>}, {transform_indices = @transform_1, window_bounds = array<i64: 64, 32>}, {transform_indices = @transform_2, window_bounds = array<i64: 1, 32>}, {transform_indices = @transform_3, window_bounds = array<i64: 16, 32>}]} {
    %c0 = arith.constant 0 : index
    %c0_0 = arith.constant 0 : index
    %0 = vector.load %arg3[%c0, %c0_0] : memref<16x64xf32, #tpu.memory_space<vmem>>, vector<16x64xf32>
    %1 = arith.truncf %0 : vector<16x64xf32> to vector<16x64xbf16>
    %c0_1 = arith.constant 0 : index
    %c0_2 = arith.constant 0 : index
    %2 = vector.load %arg4[%c0_1, %c0_2] : memref<64x32xf32, #tpu.memory_space<vmem>>, vector<64x32xf32>
    %3 = arith.truncf %2 : vector<64x32xf32> to vector<64x32xbf16>
    %cst = arith.constant dense<0.000000e+00> : vector<16x32xf32>
    %4 = tpu.matmul %1, %3, %cst {dimension_numbers = #tpu.dot_dimension_numbers<[1], [0], [0], [1], [0, 0, 1, 1], [], []>} : vector<16x64xbf16>, vector<64x32xbf16>, vector<16x32xf32> -> vector<16x32xf32>
    %c0_i32 = arith.constant 0 : i32
    %5 = arith.cmpi eq, %arg2, %c0_i32 : i32
    %6 = arith.extui %5 : i1 to i32
    %c0_i32_3 = arith.constant 0 : i32
    %7 = arith.cmpi ne, %6, %c0_i32_3 : i32
    scf.if %7 {
      %c0_8 = arith.constant 0 : index
      %c0_9 = arith.constant 0 : index
      %14 = vector.load %arg6[%c0_8, %c0_9] : memref<16x32xf32, #tpu.memory_space<vmem>>, vector<16x32xf32>
      tpu.vector_store %arg6[%c0_8, %c0_9], %4 {strides = array<i32>} : memref<16x32xf32, #tpu.memory_space<vmem>>, vector<16x32xf32>,
    } else {
    }
    %c0_i32_4 = arith.constant 0 : i32
    %8 = arith.cmpi sgt, %arg2, %c0_i32_4 : i32
    %9 = arith.extui %8 : i1 to i32
    %c0_i32_5 = arith.constant 0 : i32
    %10 = arith.cmpi ne, %9, %c0_i32_5 : i32
    scf.if %10 {
      %c0_8 = arith.constant 0 : index
      %c0_9 = arith.constant 0 : index
      %14 = vector.load %arg6[%c0_8, %c0_9] : memref<16x32xf32, #tpu.memory_space<vmem>>, vector<16x32xf32>
      %15 = arith.addf %14, %4 : vector<16x32xf32>
      %c0_10 = arith.constant 0 : index
      %c0_11 = arith.constant 0 : index
      %16 = vector.load %arg6[%c0_10, %c0_11] : memref<16x32xf32, #tpu.memory_space<vmem>>, vector<16x32xf32>
      tpu.vector_store %arg6[%c0_10, %c0_11], %15 {strides = array<i32>} : memref<16x32xf32, #tpu.memory_space<vmem>>, vector<16x32xf32>,
    } else {
    }
    %c0_i32_6 = arith.constant 0 : i32
    %11 = arith.cmpi eq, %arg2, %c0_i32_6 : i32
    %12 = arith.extui %11 : i1 to i32
    %c0_i32_7 = arith.constant 0 : i32
    %13 = arith.cmpi ne, %12, %c0_i32_7 : i32
    scf.if %13 {
      %c0_8 = arith.constant 0 : index
      %c0_9 = arith.constant 0 : index
      %14 = vector.load %arg6[%c0_8, %c0_9] : memref<16x32xf32, #tpu.memory_space<vmem>>, vector<16x32xf32>
      %c0_10 = arith.constant 0 : index
      %c0_11 = arith.constant 0 : index
      %15 = vector.load %arg5[%c0_10, %c0_11] : memref<1x32xf32, #tpu.memory_space<vmem>>, vector<1x32xf32>
      %16 = vector.broadcast %15 : vector<1x32xf32> to vector<16x32xf32>
      %17 = arith.addf %14, %16 : vector<16x32xf32>
      %c0_12 = arith.constant 0 : index
      %c0_13 = arith.constant 0 : index
      %18 = vector.load %arg6[%c0_12, %c0_13] : memref<16x32xf32, #tpu.memory_space<vmem>>, vector<16x32xf32>
      tpu.vector_store %arg6[%c0_12, %c0_13], %17 {strides = array<i32>} : memref<16x32xf32, #tpu.memory_space<vmem>>, vector<16x32xf32>,
    } else {
    }
    return
  }
  func.func @transform_0(%arg0: i32, %arg1: i32, %arg2: i32) -> (i32, i32) {
    %c0_i32 = arith.constant 0 : i32
    return %arg0, %arg2 : i32, i32
  }
  func.func @transform_1(%arg0: i32, %arg1: i32, %arg2: i32) -> (i32, i32) {
    %c0_i32 = arith.constant 0 : i32
    return %arg2, %arg1 : i32, i32
  }
  func.func @transform_2(%arg0: i32, %arg1: i32, %arg2: i32) -> (i32, i32) {
    %c0_i32 = arith.constant 0 : i32
    %c0_i32_0 = arith.constant 0 : i32
    return %c0_i32, %arg1 : i32, i32
  }
  func.func @transform_3(%arg0: i32, %arg1: i32, %arg2: i32) -> (i32, i32) {
    %c0_i32 = arith.constant 0 : i32
    return %arg0, %arg1 : i32, i32
  }
}

module attributes {stable_mosaic.version = 11 : i64} {
  func.func @_attn_kernel(%arg0: i32, %arg1: i32, %arg2: memref<1x8x32xf32, #tpu.memory_space<vmem>>, %arg3: memref<1x8x64xf32, #tpu.memory_space<vmem>>, %arg4: memref<1x8x8xf32, #tpu.memory_space<vmem>>, %arg5: memref<1x8x32xf32, #tpu.memory_space<vmem>>) attributes {dimension_semantics = [#tpu.dimension_semantics<parallel>, #tpu.dimension_semantics<parallel>], iteration_bounds = array<i64: 2, 1>, scalar_prefetch = 0 : i64, scratch_operands = 0 : i64, tpu.core_type = #tpu.core_type<tc>, window_params = [{transform_indices = @transform_0, window_bounds = array<i64: 1, 8, 32>}, {transform_indices = @transform_1, window_bounds = array<i64: 1, 8, 64>}, {transform_indices = @transform_2, window_bounds = array<i64: 1, 8, 8>}, {transform_indices = @transform_3, window_bounds = array<i64: 1, 8, 32>}]} {
    %c0 = arith.constant 0 : index
    %c0_0 = arith.constant 0 : index
    %c0_1 = arith.constant 0 : index
    %0 = vector.load %arg2[%c0, %c0_0, %c0_1] : memref<1x8x32xf32, #tpu.memory_space<vmem>>, vector<1x8x32xf32>
    %1 = vector.shape_cast %0 : vector<1x8x32xf32> to vector<8x32xf32>
    %c0_2 = arith.constant 0 : index
    %c0_3 = arith.constant 0 : index
    %c0_4 = arith.constant 0 : index
    %2 = vector.load %arg3[%c0_2, %c0_3, %c0_4] : memref<1x8x64xf32, #tpu.memory_space<vmem>>, vector<1x8x64xf32>
    %3 = vector.shape_cast %2 : vector<1x8x64xf32> to vector<8x64xf32>
    %c0_5 = arith.constant 0 : index
    %c0_6 = arith.constant 0 : index
    %c0_7 = arith.constant 0 : index
    %4 = vector.load %arg4[%c0_5, %c0_6, %c0_7] : memref<1x8x8xf32, #tpu.memory_space<vmem>>, vector<1x8x8xf32>
    %5 = vector.shape_cast %4 : vector<1x8x8xf32> to vector<8x8xf32>
    %6 = vector.extract_strided_slice %3 {offsets = [0, 0], sizes = [8, 32], strides = [1, 1]} : vector<8x64xf32> to vector<8x32xf32>
    %7 = vector.extract_strided_slice %3 {offsets = [0, 32], sizes = [8, 32], strides = [1, 1]} : vector<8x64xf32> to vector<8x32xf32>
    %8 = vector.extract_strided_slice %1 {offsets = [0, 0], sizes = [8, 8], strides = [1, 1]} : vector<8x32xf32> to vector<8x8xf32>
    %9 = arith.truncf %8 : vector<8x8xf32> to vector<8x8xbf16>
    %10 = vector.extract_strided_slice %6 {offsets = [0, 0], sizes = [8, 8], strides = [1, 1]} : vector<8x32xf32> to vector<8x8xf32>
    %11 = arith.truncf %10 : vector<8x8xf32> to vector<8x8xbf16>
    %cst = arith.constant dense<0.000000e+00> : vector<8x8xf32>
    %12 = tpu.matmul %9, %11, %cst {dimension_numbers = #tpu.dot_dimension_numbers<[1], [1], [0], [0], [0, 0, 1, 0], [], []>} : vector<8x8xbf16>, vector<8x8xbf16>, vector<8x8xf32> -> vector<8x8xf32>
    %13 = arith.addf %12, %5 : vector<8x8xf32>
    %cst_8 = arith.constant dense<0xFF800000> : vector<8xf32>
    %14 = vector.multi_reduction <maximumf>, %13, %cst_8 [1] : vector<8x8xf32> to vector<8xf32>
    %15 = vector.shape_cast %14 : vector<8xf32> to vector<8x1xf32>
    %16 = vector.broadcast %15 : vector<8x1xf32> to vector<8x8xf32>
    %17 = arith.subf %13, %16 : vector<8x8xf32>
    %18 = math.exp %17 : vector<8x8xf32>
    %cst_9 = arith.constant dense<0.000000e+00> : vector<8xf32>
    %19 = vector.multi_reduction <add>, %18, %cst_9 [1] : vector<8x8xf32> to vector<8xf32>
    %20 = vector.shape_cast %19 : vector<8xf32> to vector<8x1xf32>
    %21 = tpu.reciprocal %20 {approx = true} : vector<8x1xf32> -> vector<8x1xf32>
    %22 = vector.broadcast %21 : vector<8x1xf32> to vector<8x8xf32>
    %23 = arith.mulf %18, %22 : vector<8x8xf32>
    %24 = arith.truncf %23 : vector<8x8xf32> to vector<8x8xbf16>
    %25 = vector.extract_strided_slice %7 {offsets = [0, 0], sizes = [8, 8], strides = [1, 1]} : vector<8x32xf32> to vector<8x8xf32>
    %26 = arith.truncf %25 : vector<8x8xf32> to vector<8x8xbf16>
    %cst_10 = arith.constant dense<0.000000e+00> : vector<8x8xf32>
    %27 = tpu.matmul %24, %26, %cst_10 {dimension_numbers = #tpu.dot_dimension_numbers<[1], [0], [0], [1], [0, 0, 1, 1], [], []>} : vector<8x8xbf16>, vector<8x8xbf16>, vector<8x8xf32> -> vector<8x8xf32>
    %28 = vector.extract_strided_slice %1 {offsets = [0, 8], sizes = [8, 8], strides = [1, 1]} : vector<8x32xf32> to vector<8x8xf32>
    %29 = arith.truncf %28 : vector<8x8xf32> to vector<8x8xbf16>
    %30 = vector.extract_strided_slice %6 {offsets = [0, 8], sizes = [8, 8], strides = [1, 1]} : vector<8x32xf32> to vector<8x8xf32>
    %31 = arith.truncf %30 : vector<8x8xf32> to vector<8x8xbf16>
    %cst_11 = arith.constant dense<0.000000e+00> : vector<8x8xf32>
    %32 = tpu.matmul %29, %31, %cst_11 {dimension_numbers = #tpu.dot_dimension_numbers<[1], [1], [0], [0], [0, 0, 1, 0], [], []>} : vector<8x8xbf16>, vector<8x8xbf16>, vector<8x8xf32> -> vector<8x8xf32>
    %33 = arith.addf %32, %5 : vector<8x8xf32>
    %cst_12 = arith.constant dense<0xFF800000> : vector<8xf32>
    %34 = vector.multi_reduction <maximumf>, %33, %cst_12 [1] : vector<8x8xf32> to vector<8xf32>
    %35 = vector.shape_cast %34 : vector<8xf32> to vector<8x1xf32>
    %36 = vector.broadcast %35 : vector<8x1xf32> to vector<8x8xf32>
    %37 = arith.subf %33, %36 : vector<8x8xf32>
    %38 = math.exp %37 : vector<8x8xf32>
    %cst_13 = arith.constant dense<0.000000e+00> : vector<8xf32>
    %39 = vector.multi_reduction <add>, %38, %cst_13 [1] : vector<8x8xf32> to vector<8xf32>
    %40 = vector.shape_cast %39 : vector<8xf32> to vector<8x1xf32>
    %41 = tpu.reciprocal %40 {approx = true} : vector<8x1xf32> -> vector<8x1xf32>
    %42 = vector.broadcast %41 : vector<8x1xf32> to vector<8x8xf32>
    %43 = arith.mulf %38, %42 : vector<8x8xf32>
    %44 = arith.truncf %43 : vector<8x8xf32> to vector<8x8xbf16>
    %45 = vector.extract_strided_slice %7 {offsets = [0, 8], sizes = [8, 8], strides = [1, 1]} : vector<8x32xf32> to vector<8x8xf32>
    %46 = arith.truncf %45 : vector<8x8xf32> to vector<8x8xbf16>
    %cst_14 = arith.constant dense<0.000000e+00> : vector<8x8xf32>
    %47 = tpu.matmul %44, %46, %cst_14 {dimension_numbers = #tpu.dot_dimension_numbers<[1], [0], [0], [1], [0, 0, 1, 1], [], []>} : vector<8x8xbf16>, vector<8x8xbf16>, vector<8x8xf32> -> vector<8x8xf32>
    %48 = vector.extract_strided_slice %1 {offsets = [0, 16], sizes = [8, 8], strides = [1, 1]} : vector<8x32xf32> to vector<8x8xf32>
    %49 = arith.truncf %48 : vector<8x8xf32> to vector<8x8xbf16>
    %50 = vector.extract_strided_slice %6 {offsets = [0, 16], sizes = [8, 8], strides = [1, 1]} : vector<8x32xf32> to vector<8x8xf32>
    %51 = arith.truncf %50 : vector<8x8xf32> to vector<8x8xbf16>
    %cst_15 = arith.constant dense<0.000000e+00> : vector<8x8xf32>
    %52 = tpu.matmul %49, %51, %cst_15 {dimension_numbers = #tpu.dot_dimension_numbers<[1], [1], [0], [0], [0, 0, 1, 0], [], []>} : vector<8x8xbf16>, vector<8x8xbf16>, vector<8x8xf32> -> vector<8x8xf32>
    %53 = arith.addf %52, %5 : vector<8x8xf32>
    %cst_16 = arith.constant dense<0xFF800000> : vector<8xf32>
    %54 = vector.multi_reduction <maximumf>, %53, %cst_16 [1] : vector<8x8xf32> to vector<8xf32>
    %55 = vector.shape_cast %54 : vector<8xf32> to vector<8x1xf32>
    %56 = vector.broadcast %55 : vector<8x1xf32> to vector<8x8xf32>
    %57 = arith.subf %53, %56 : vector<8x8xf32>
    %58 = math.exp %57 : vector<8x8xf32>
    %cst_17 = arith.constant dense<0.000000e+00> : vector<8xf32>
    %59 = vector.multi_reduction <add>, %58, %cst_17 [1] : vector<8x8xf32> to vector<8xf32>
    %60 = vector.shape_cast %59 : vector<8xf32> to vector<8x1xf32>
    %61 = tpu.reciprocal %60 {approx = true} : vector<8x1xf32> -> vector<8x1xf32>
    %62 = vector.broadcast %61 : vector<8x1xf32> to vector<8x8xf32>
    %63 = arith.mulf %58, %62 : vector<8x8xf32>
    %64 = arith.truncf %63 : vector<8x8xf32> to vector<8x8xbf16>
    %65 = vector.extract_strided_slice %7 {offsets = [0, 16], sizes = [8, 8], strides = [1, 1]} : vector<8x32xf32> to vector<8x8xf32>
    %66 = arith.truncf %65 : vector<8x8xf32> to vector<8x8xbf16>
    %cst_18 = arith.constant dense<0.000000e+00> : vector<8x8xf32>
    %67 = tpu.matmul %64, %66, %cst_18 {dimension_numbers = #tpu.dot_dimension_numbers<[1], [0], [0], [1], [0, 0, 1, 1], [], []>} : vector<8x8xbf16>, vector<8x8xbf16>, vector<8x8xf32> -> vector<8x8xf32>
    %68 = vector.extract_strided_slice %1 {offsets = [0, 24], sizes = [8, 8], strides = [1, 1]} : vector<8x32xf32> to vector<8x8xf32>
    %69 = arith.truncf %68 : vector<8x8xf32> to vector<8x8xbf16>
    %70 = vector.extract_strided_slice %6 {offsets = [0, 24], sizes = [8, 8], strides = [1, 1]} : vector<8x32xf32> to vector<8x8xf32>
    %71 = arith.truncf %70 : vector<8x8xf32> to vector<8x8xbf16>
    %cst_19 = arith.constant dense<0.000000e+00> : vector<8x8xf32>
    %72 = tpu.matmul %69, %71, %cst_19 {dimension_numbers = #tpu.dot_dimension_numbers<[1], [1], [0], [0], [0, 0, 1, 0], [], []>} : vector<8x8xbf16>, vector<8x8xbf16>, vector<8x8xf32> -> vector<8x8xf32>
    %73 = arith.addf %72, %5 : vector<8x8xf32>
    %cst_20 = arith.constant dense<0xFF800000> : vector<8xf32>
    %74 = vector.multi_reduction <maximumf>, %73, %cst_20 [1] : vector<8x8xf32> to vector<8xf32>
    %75 = vector.shape_cast %74 : vector<8xf32> to vector<8x1xf32>
    %76 = vector.broadcast %75 : vector<8x1xf32> to vector<8x8xf32>
    %77 = arith.subf %73, %76 : vector<8x8xf32>
    %78 = math.exp %77 : vector<8x8xf32>
    %cst_21 = arith.constant dense<0.000000e+00> : vector<8xf32>
    %79 = vector.multi_reduction <add>, %78, %cst_21 [1] : vector<8x8xf32> to vector<8xf32>
    %80 = vector.shape_cast %79 : vector<8xf32> to vector<8x1xf32>
    %81 = tpu.reciprocal %80 {approx = true} : vector<8x1xf32> -> vector<8x1xf32>
    %82 = vector.broadcast %81 : vector<8x1xf32> to vector<8x8xf32>
    %83 = arith.mulf %78, %82 : vector<8x8xf32>
    %84 = arith.truncf %83 : vector<8x8xf32> to vector<8x8xbf16>
    %85 = vector.extract_strided_slice %7 {offsets = [0, 24], sizes = [8, 8], strides = [1, 1]} : vector<8x32xf32> to vector<8x8xf32>
    %86 = arith.truncf %85 : vector<8x8xf32> to vector<8x8xbf16>
    %cst_22 = arith.constant dense<0.000000e+00> : vector<8x8xf32>
    %87 = tpu.matmul %84, %86, %cst_22 {dimension_numbers = #tpu.dot_dimension_numbers<[1], [0], [0], [1], [0, 0, 1, 1], [], []>} : vector<8x8xbf16>, vector<8x8xbf16>, vector<8x8xf32> -> vector<8x8xf32>
    %88 = tpu.concatenate %27, %47, %67, %87 in 1 : vector<8x8xf32>, vector<8x8xf32>, vector<8x8xf32>, vector<8x8xf32> -> vector<8x32xf32>
    %c0_23 = arith.constant 0 : index
    %c0_24 = arith.constant 0 : index
    %c0_25 = arith.constant 0 : index
    %89 = vector.load %arg5[%c0_23, %c0_24, %c0_25] : memref<1x8x32xf32, #tpu.memory_space<vmem>>, vector<1x8x32xf32>
    %90 = vector.shape_cast %89 : vector<1x8x32xf32> to vector<8x32xf32>
    %91 = vector.shape_cast %88 : vector<8x32xf32> to vector<1x8x32xf32>
    tpu.vector_store %arg5[%c0_23, %c0_24, %c0_25], %91 {strides = array<i32>} : memref<1x8x32xf32, #tpu.memory_space<vmem>>, vector<1x8x32xf32>,
    return
  }
  func.func @transform_0(%arg0: i32, %arg1: i32) -> (i32, i32, i32) {
    %c0_i32 = arith.constant 0 : i32
    %c0_i32_0 = arith.constant 0 : i32
    return %arg0, %arg1, %c0_i32 : i32, i32, i32
  }
  func.func @transform_1(%arg0: i32, %arg1: i32) -> (i32, i32, i32) {
    %c0_i32 = arith.constant 0 : i32
    %c0_i32_0 = arith.constant 0 : i32
    %c0_i32_1 = arith.constant 0 : i32
    return %arg0, %c0_i32, %c0_i32_0 : i32, i32, i32
  }
  func.func @transform_2(%arg0: i32, %arg1: i32) -> (i32, i32, i32) {
    %c0_i32 = arith.constant 0 : i32
    %c0_i32_0 = arith.constant 0 : i32
    %c0_i32_1 = arith.constant 0 : i32
    return %c0_i32, %arg1, %c0_i32_0 : i32, i32, i32
  }
  func.func @transform_3(%arg0: i32, %arg1: i32) -> (i32, i32, i32) {
    %c0_i32 = arith.constant 0 : i32
    %c0_i32_0 = arith.constant 0 : i32
    return %arg0, %arg1, %c0_i32 : i32, i32, i32
  }
}

module attributes {stable_mosaic.version = 11 : i64} {
  func.func @_ce_kernel(%arg0: i32, %arg1: i32, %arg2: memref<16x96xf32, #tpu.memory_space<vmem>>, %arg3: memref<16x1xi32, #tpu.memory_space<vmem>>, %arg4: memref<1x1xf32, #tpu.memory_space<vmem>>, %arg5: memref<16x1xf32, #tpu.memory_space<vmem>>, %arg6: memref<16x1xf32, #tpu.memory_space<vmem>>, %arg7: memref<16x1xf32, #tpu.memory_space<vmem>>) attributes {dimension_semantics = [#tpu.dimension_semantics<arbitrary>, #tpu.dimension_semantics<arbitrary>], iteration_bounds = array<i64: 1, 1>, scalar_prefetch = 0 : i64, scratch_operands = 3 : i64, tpu.core_type = #tpu.core_type<tc>, window_params = [{transform_indices = @transform_0, window_bounds = array<i64: 16, 96>}, {transform_indices = @transform_1, window_bounds = array<i64: 16, 1>}, {pipeline_mode = #tpu.pipeline_mode<synchronous>, transform_indices = @transform_2, window_bounds = array<i64: 1, 1>}]} {
    %c0_i32 = arith.constant 0 : i32
    %0 = arith.cmpi eq, %arg0, %c0_i32 : i32
    %c0_i32_0 = arith.constant 0 : i32
    %1 = arith.cmpi eq, %arg1, %c0_i32_0 : i32
    %2 = arith.andi %0, %1 : i1
    %3 = arith.extui %2 : i1 to i32
    %c0_i32_1 = arith.constant 0 : i32
    %4 = arith.cmpi ne, %3, %c0_i32_1 : i32
    scf.if %4 {
      %cst_31 = arith.constant 0.000000e+00 : f32
      %52 = vector.broadcast %cst_31 : f32 to vector<1x1xf32>
      %c0_32 = arith.constant 0 : index
      %c0_33 = arith.constant 0 : index
      %53 = vector.load %arg4[%c0_32, %c0_33] : memref<1x1xf32, #tpu.memory_space<vmem>>, vector<1x1xf32>
      tpu.vector_store %arg4[%c0_32, %c0_33], %52 {strides = array<i32>} : memref<1x1xf32, #tpu.memory_space<vmem>>, vector<1x1xf32>,
    } else {
    }
    %c0_i32_2 = arith.constant 0 : i32
    %5 = arith.cmpi eq, %arg1, %c0_i32_2 : i32
    %6 = arith.extui %5 : i1 to i32
    %c0_i32_3 = arith.constant 0 : i32
    %7 = arith.cmpi ne, %6, %c0_i32_3 : i32
    scf.if %7 {
      %cst_31 = arith.constant -1.000000e+30 : f32
      %52 = vector.broadcast %cst_31 : f32 to vector<16x1xf32>
      %c0_32 = arith.constant 0 : index
      %c0_33 = arith.constant 0 : index
      %53 = vector.load %arg5[%c0_32, %c0_33] : memref<16x1xf32, #tpu.memory_space<vmem>>, vector<16x1xf32>
      tpu.vector_store %arg5[%c0_32, %c0_33], %52 {strides = array<i32>} : memref<16x1xf32, #tpu.memory_space<vmem>>, vector<16x1xf32>,
      %cst_34 = arith.constant 0.000000e+00 : f32
      %54 = vector.broadcast %cst_34 : f32 to vector<16x1xf32>
      %c0_35 = arith.constant 0 : index
      %c0_36 = arith.constant 0 : index
      %55 = vector.load %arg6[%c0_35, %c0_36] : memref<16x1xf32, #tpu.memory_space<vmem>>, vector<16x1xf32>
      tpu.vector_store %arg6[%c0_35, %c0_36], %54 {strides = array<i32>} : memref<16x1xf32, #tpu.memory_space<vmem>>, vector<16x1xf32>,
      %cst_37 = arith.constant 0.000000e+00 : f32
      %56 = vector.broadcast %cst_37 : f32 to vector<16x1xf32>
      %c0_38 = arith.constant 0 : index
      %c0_39 = arith.constant 0 : index
      %57 = vector.load %arg7[%c0_38, %c0_39] : memref<16x1xf32, #tpu.memory_space<vmem>>, vector<16x1xf32>
      tpu.vector_store %arg7[%c0_38, %c0_39], %56 {strides = array<i32>} : memref<16x1xf32, #tpu.memory_space<vmem>>, vector<16x1xf32>,
    } else {
    }
    %c0 = arith.constant 0 : index
    %c0_4 = arith.constant 0 : index
    %8 = vector.load %arg2[%c0, %c0_4] : memref<16x96xf32, #tpu.memory_space<vmem>>, vector<16x96xf32>
    %c0_5 = arith.constant 0 : index
    %c0_6 = arith.constant 0 : index
    %9 = vector.load %arg3[%c0_5, %c0_6] : memref<16x1xi32, #tpu.memory_space<vmem>>, vector<16x1xi32>
    %10 = tpu.iota {dimensions = array<i32: 1>} : vector<16x96xi32>
    %c96_i32 = arith.constant 96 : i32
    %11 = arith.muli %arg1, %c96_i32 : i32
    %12 = vector.broadcast %11 : i32 to vector<16x96xi32>
    %13 = arith.addi %10, %12 : vector<16x96xi32>
    %c96_i32_7 = arith.constant 96 : i32
    %14 = vector.broadcast %c96_i32_7 : i32 to vector<16x96xi32>
    %15 = arith.cmpi slt, %13, %14 : vector<16x96xi32>
    %cst = arith.constant -1.000000e+09 : f32
    %16 = vector.broadcast %cst : f32 to vector<16x96xf32>
    %17 = arith.select %15, %8, %16 : vector<16x96xi1>, vector<16x96xf32>
    %cst_8 = arith.constant dense<0xFF800000> : vector<16xf32>
    %18 = vector.multi_reduction <maximumf>, %17, %cst_8 [1] : vector<16x96xf32> to vector<16xf32>
    %19 = vector.shape_cast %18 : vector<16xf32> to vector<16x1xf32>
    %c0_9 = arith.constant 0 : index
    %c0_10 = arith.constant 0 : index
    %20 = vector.load %arg5[%c0_9, %c0_10] : memref<16x1xf32, #tpu.memory_space<vmem>>, vector<16x1xf32>
    %21 = arith.maximumf %20, %19 : vector<16x1xf32>
    %c0_11 = arith.constant 0 : index
    %c0_12 = arith.constant 0 : index
    %22 = vector.load %arg6[%c0_11, %c0_12] : memref<16x1xf32, #tpu.memory_space<vmem>>, vector<16x1xf32>
    %c0_13 = arith.constant 0 : index
    %c0_14 = arith.constant 0 : index
    %23 = vector.load %arg5[%c0_13, %c0_14] : memref<16x1xf32, #tpu.memory_space<vmem>>, vector<16x1xf32>
    %24 = arith.subf %23, %21 : vector<16x1xf32>
    %25 = math.exp %24 : vector<16x1xf32>
    %26 = arith.mulf %22, %25 : vector<16x1xf32>
    %27 = vector.broadcast %21 : vector<16x1xf32> to vector<16x96xf32>
    %28 = arith.subf %17, %27 : vector<16x96xf32>
    %29 = math.exp %28 : vector<16x96xf32>
    %cst_15 = arith.constant dense<0.000000e+00> : vector<16xf32>
    %30 = vector.multi_reduction <add>, %29, %cst_15 [1] : vector<16x96xf32> to vector<16xf32>
    %31 = vector.shape_cast %30 : vector<16xf32> to vector<16x1xf32>
    %32 = arith.addf %26, %31 : vector<16x1xf32>
    %c0_16 = arith.constant 0 : index
    %c0_17 = arith.constant 0 : index
    %33 = vector.load %arg6[%c0_16, %c0_17] : memref<16x1xf32, #tpu.memory_space<vmem>>, vector<16x1xf32>
    tpu.vector_store %arg6[%c0_16, %c0_17], %32 {strides = array<i32>} : memref<16x1xf32, #tpu.memory_space<vmem>>, vector<16x1xf32>,
    %c0_18 = arith.constant 0 : index
    %c0_19 = arith.constant 0 : index
    %34 = vector.load %arg5[%c0_18, %c0_19] : memref<16x1xf32, #tpu.memory_space<vmem>>, vector<16x1xf32>
    tpu.vector_store %arg5[%c0_18, %c0_19], %21 {strides = array<i32>} : memref<16x1xf32, #tpu.memory_space<vmem>>, vector<16x1xf32>,
    %c0_20 = arith.constant 0 : index
    %c0_21 = arith.constant 0 : index
    %35 = vector.load %arg7[%c0_20, %c0_21] : memref<16x1xf32, #tpu.memory_space<vmem>>, vector<16x1xf32>
    %36 = vector.broadcast %9 : vector<16x1xi32> to vector<16x96xi32>
    %37 = arith.cmpi eq, %13, %36 : vector<16x96xi32>
    %cst_22 = arith.constant 0.000000e+00 : f32
    %38 = vector.broadcast %cst_22 : f32 to vector<16x96xf32>
    %39 = arith.select %37, %17, %38 : vector<16x96xi1>, vector<16x96xf32>
    %cst_23 = arith.constant dense<0.000000e+00> : vector<16xf32>
    %40 = vector.multi_reduction <add>, %39, %cst_23 [1] : vector<16x96xf32> to vector<16xf32>
    %41 = vector.shape_cast %40 : vector<16xf32> to vector<16x1xf32>
    %42 = arith.addf %35, %41 : vector<16x1xf32>
    %c0_24 = arith.constant 0 : index
    %c0_25 = arith.constant 0 : index
    %43 = vector.load %arg7[%c0_24, %c0_25] : memref<16x1xf32, #tpu.memory_space<vmem>>, vector<16x1xf32>
    tpu.vector_store %arg7[%c0_24, %c0_25], %42 {strides = array<i32>} : memref<16x1xf32, #tpu.memory_space<vmem>>, vector<16x1xf32>,
    %c0_i32_26 = arith.constant 0 : i32
    %44 = arith.cmpi eq, %arg1, %c0_i32_26 : i32
    %45 = arith.extui %44 : i1 to i32
    %c0_i32_27 = arith.constant 0 : i32
    %46 = arith.cmpi ne, %45, %c0_i32_27 : i32
    scf.if %46 {
      %c0_31 = arith.constant 0 : index
      %c0_32 = arith.constant 0 : index
      %52 = vector.load %arg6[%c0_31, %c0_32] : memref<16x1xf32, #tpu.memory_space<vmem>>, vector<16x1xf32>
      %53 = math.log %52 : vector<16x1xf32>
      %c0_33 = arith.constant 0 : index
      %c0_34 = arith.constant 0 : index
      %54 = vector.load %arg5[%c0_33, %c0_34] : memref<16x1xf32, #tpu.memory_space<vmem>>, vector<16x1xf32>
      %55 = arith.addf %53, %54 : vector<16x1xf32>
      %c0_35 = arith.constant 0 : index
      %c0_36 = arith.constant 0 : index
      %56 = vector.load %arg4[%c0_35, %c0_36] : memref<1x1xf32, #tpu.memory_space<vmem>>, vector<1x1xf32>
      %c0_37 = arith.constant 0 : index
      %c0_38 = arith.constant 0 : index
      %57 = vector.load %arg7[%c0_37, %c0_38] : memref<16x1xf32, #tpu.memory_space<vmem>>, vector<16x1xf32>
      %58 = arith.subf %55, %57 : vector<16x1xf32>
      %cst_39 = arith.constant dense<0.000000e+00> : vector<1xf32>
      %59 = vector.multi_reduction <add>, %58, %cst_39 [0] : vector<16x1xf32> to vector<1xf32>
      %60 = vector.shape_cast %59 : vector<1xf32> to vector<1x1xf32>
      %61 = arith.addf %56, %60 : vector<1x1xf32>
      %c0_40 = arith.constant 0 : index
      %c0_41 = arith.constant 0 : index
      %62 = vector.load %arg4[%c0_40, %c0_41] : memref<1x1xf32, #tpu.memory_space<vmem>>, vector<1x1xf32>
      tpu.vector_store %arg4[%c0_40, %c0_41], %61 {strides = array<i32>} : memref<1x1xf32, #tpu.memory_space<vmem>>, vector<1x1xf32>,
    } else {
    }
    %c0_i32_28 = arith.constant 0 : i32
    %47 = arith.cmpi eq, %arg0, %c0_i32_28 : i32
    %c0_i32_29 = arith.constant 0 : i32
    %48 = arith.cmpi eq, %arg1, %c0_i32_29 : i32
    %49 = arith.andi %47, %48 : i1
    %50 = arith.extui %49 : i1 to i32
    %c0_i32_30 = arith.constant 0 : i32
    %51 = arith.cmpi ne, %50, %c0_i32_30 : i32
    scf.if %51 {
      %c0_31 = arith.constant 0 : index
      %c0_32 = arith.constant 0 : index
      %52 = vector.load %arg4[%c0_31, %c0_32] : memref<1x1xf32, #tpu.memory_space<vmem>>, vector<1x1xf32>
      %cst_33 = arith.constant 6.250000e-02 : f32
      %53 = vector.broadcast %cst_33 : f32 to vector<1x1xf32>
      %54 = arith.mulf %52, %53 : vector<1x1xf32>
      %c0_34 = arith.constant 0 : index
      %c0_35 = arith.constant 0 : index
      %55 = vector.load %arg4[%c0_34, %c0_35] : memref<1x1xf32, #tpu.memory_space<vmem>>, vector<1x1xf32>
      tpu.vector_store %arg4[%c0_34, %c0_35], %54 {strides = array<i32>} : memref<1x1xf32, #tpu.memory_space<vmem>>, vector<1x1xf32>,
    } else {
    }
    return
  }
  func.func @transform_0(%arg0: i32, %arg1: i32) -> (i32, i32) {
    %c0_i32 = arith.constant 0 : i32
    return %arg0, %arg1 : i32, i32
  }
  func.func @transform_1(%arg0: i32, %arg1: i32) -> (i32, i32) {
    %c0_i32 = arith.constant 0 : i32
    %c0_i32_0 = arith.constant 0 : i32
    return %arg0, %c0_i32 : i32, i32
  }
  func.func @transform_2(%arg0: i32, %arg1: i32) -> (i32, i32) {
    %c0_i32 = arith.constant 0 : i32
    %c0_i32_0 = arith.constant 0 : i32
    %c0_i32_1 = arith.constant 0 : i32
    return %c0_i32, %c0_i32_0 : i32, i32
  }
}

module attributes {stable_mosaic.version = 11 : i64} {
  func.func @_matmul_kernel(%arg0: i32, %arg1: i32, %arg2: i32, %arg3: memref<16x32xf32, #tpu.memory_space<vmem>>, %arg4: memref<96x32xf32, #tpu.memory_space<vmem>>, %arg5: memref<1x96xf32, #tpu.memory_space<vmem>>, %arg6: memref<16x96xf32, #tpu.memory_space<vmem>>) attributes {dimension_semantics = [#tpu.dimension_semantics<parallel>, #tpu.dimension_semantics<parallel>, #tpu.dimension_semantics<arbitrary>], iteration_bounds = array<i64: 1, 1, 1>, scalar_prefetch = 0 : i64, scratch_operands = 0 : i64, tpu.core_type = #tpu.core_type<tc>, window_params = [{transform_indices = @transform_0, window_bounds = array<i64: 16, 32>}, {transform_indices = @transform_1, window_bounds = array<i64: 96, 32>}, {transform_indices = @transform_2, window_bounds = array<i64: 1, 96>}, {transform_indices = @transform_3, window_bounds = array<i64: 16, 96>}]} {
    %c0 = arith.constant 0 : index
    %c0_0 = arith.constant 0 : index
    %0 = vector.load %arg3[%c0, %c0_0] : memref<16x32xf32, #tpu.memory_space<vmem>>, vector<16x32xf32>
    %1 = arith.truncf %0 : vector<16x32xf32> to vector<16x32xbf16>
    %c0_1 = arith.constant 0 : index
    %c0_2 = arith.constant 0 : index
    %2 = vector.load %arg4[%c0_1, %c0_2] : memref<96x32xf32, #tpu.memory_space<vmem>>, vector<96x32xf32>
    %3 = arith.truncf %2 : vector<96x32xf32> to vector<96x32xbf16>
    %cst = arith.constant dense<0.000000e+00> : vector<16x96xf32>
    %4 = tpu.matmul %1, %3, %cst {dimension_numbers = #tpu.dot_dimension_numbers<[1], [1], [0], [0], [0, 0, 1, 0], [], []>} : vector<16x32xbf16>, vector<96x32xbf16>, vector<16x96xf32> -> vector<16x96xf32>
    %c0_i32 = arith.constant 0 : i32
    %5 = arith.cmpi eq, %arg2, %c0_i32 : i32
    %6 = arith.extui %5 : i1 to i32
    %c0_i32_3 = arith.constant 0 : i32
    %7 = arith.cmpi ne, %6, %c0_i32_3 : i32
    scf.if %7 {
      %c0_8 = arith.constant 0 : index
      %c0_9 = arith.constant 0 : index
      %14 = vector.load %arg6[%c0_8, %c0_9] : memref<16x96xf32, #tpu.memory_space<vmem>>, vector<16x96xf32>
      tpu.vector_store %arg6[%c0_8, %c0_9], %4 {strides = array<i32>} : memref<16x96xf32, #tpu.memory_space<vmem>>, vector<16x96xf32>,
    } else {
    }
    %c0_i32_4 = arith.constant 0 : i32
    %8 = arith.cmpi sgt, %arg2, %c0_i32_4 : i32
    %9 = arith.extui %8 : i1 to i32
    %c0_i32_5 = arith.constant 0 : i32
    %10 = arith.cmpi ne, %9, %c0_i32_5 : i32
    scf.if %10 {
      %c0_8 = arith.constant 0 : index
      %c0_9 = arith.constant 0 : index
      %14 = vector.load %arg6[%c0_8, %c0_9] : memref<16x96xf32, #tpu.memory_space<vmem>>, vector<16x96xf32>
      %15 = arith.addf %14, %4 : vector<16x96xf32>
      %c0_10 = arith.constant 0 : index
      %c0_11 = arith.constant 0 : index
      %16 = vector.load %arg6[%c0_10, %c0_11] : memref<16x96xf32, #tpu.memory_space<vmem>>, vector<16x96xf32>
      tpu.vector_store %arg6[%c0_10, %c0_11], %15 {strides = array<i32>} : memref<16x96xf32, #tpu.memory_space<vmem>>, vector<16x96xf32>,
    } else {
    }
    %c0_i32_6 = arith.constant 0 : i32
    %11 = arith.cmpi eq, %arg2, %c0_i32_6 : i32
    %12 = arith.extui %11 : i1 to i32
    %c0_i32_7 = arith.constant 0 : i32
    %13 = arith.cmpi ne, %12, %c0_i32_7 : i32
    scf.if %13 {
      %c0_8 = arith.constant 0 : index
      %c0_9 = arith.constant 0 : index
      %14 = vector.load %arg6[%c0_8, %c0_9] : memref<16x96xf32, #tpu.memory_space<vmem>>, vector<16x96xf32>
      %c0_10 = arith.constant 0 : index
      %c0_11 = arith.constant 0 : index
      %15 = vector.load %arg5[%c0_10, %c0_11] : memref<1x96xf32, #tpu.memory_space<vmem>>, vector<1x96xf32>
      %16 = vector.broadcast %15 : vector<1x96xf32> to vector<16x96xf32>
      %17 = arith.addf %14, %16 : vector<16x96xf32>
      %c0_12 = arith.constant 0 : index
      %c0_13 = arith.constant 0 : index
      %18 = vector.load %arg6[%c0_12, %c0_13] : memref<16x96xf32, #tpu.memory_space<vmem>>, vector<16x96xf32>
      tpu.vector_store %arg6[%c0_12, %c0_13], %17 {strides = array<i32>} : memref<16x96xf32, #tpu.memory_space<vmem>>, vector<16x96xf32>,
    } else {
    }
    return
  }
  func.func @transform_0(%arg0: i32, %arg1: i32, %arg2: i32) -> (i32, i32) {
    %c0_i32 = arith.constant 0 : i32
    return %arg0, %arg2 : i32, i32
  }
  func.func @transform_1(%arg0: i32, %arg1: i32, %arg2: i32) -> (i32, i32) {
    %c0_i32 = arith.constant 0 : i32
    return %arg1, %arg2 : i32, i32
  }
  func.func @transform_2(%arg0: i32, %arg1: i32, %arg2: i32) -> (i32, i32) {
    %c0_i32 = arith.constant 0 : i32
    %c0_i32_0 = arith.constant 0 : i32
    return %c0_i32, %arg1 : i32, i32
  }
  func.func @transform_3(%arg0: i32, %arg1: i32, %arg2: i32) -> (i32, i32) {
    %c0_i32 = arith.constant 0 : i32
    return %arg0, %arg1 : i32, i32
  }
}

</mosaic_0001>

<bundles_post_ra>
// kernel: _lambda_.48
= control target key start
LH: loop header
LB: loop body
LE: loop exit
PB: predicated region body
PF: predicated region fallthrough
CT: control target
= control target key end

     0   :  { %v131_v0 = vmov 0.0   ;;  %vm132_vm0 = vmmov 0   ;;  %vm27_vm1 = vcmask 392192   ;;  %vm76_vm2 = vcmask 261120   ;;  %s202_s1 = inlined_call_operand.vmem [shape: f32[48,32], index: 1, kind: input, shape index: {}]   ;;  %s203_s0 = inlined_call_operand.vmem [shape: f32[16,48], index: 0, kind: input, shape index: {}]   ;;  %s204_s3 = inlined_call_operand.vmem [shape: f32[16,32], index: 3, kind: output, shape index: {}]   ;;  %s205_s2 = inlined_call_operand.vmem [shape: f32[1,32], index: 2, kind: input, shape index: {}]  }
   0x1   :  { %119 = vmatprep.subr.bf16.mxu0 %v131_v0  ;;  %v18_v1 = vld [vmem:[%s202_s1] sm:$0xff]  ;;  %v19_v2 = vld [vmem:[%s202_s1 + $0x8] sm:$0xff]  ;;  %v20_v3 = vld [vmem:[%s202_s1 + $0x10] sm:$0xff]  ;;  %125 = vmatprep.mubr.msk.bf16.mxu0 %vm132_vm0, %v131_v0 }
   0x2   :  { %v24_v4 = vpack.c.bf16 %v19_v2, %v18_v1  ;;  %v21_v5 = vld [vmem:[%s202_s1 + $0x18] sm:$0xff]  ;;  %v22_v7 = vld [vmem:[%s202_s1 + $0x20] sm:$0xff]  ;;  %v23_v8 = vld [vmem:[%s202_s1 + $0x28] sm:$0xff] }
   0x3   :  { %v25_v6 = vpack.c.bf16 %v21_v5, %v20_v3  ;;  %v26_v9 = vpack.c.bf16 %v23_v8, %v22_v7  ;;  %v15_v10 = vld [vmem:[%s203_s0] sm:$0xff]  ;;  %v16_v11 = vld [vmem:[%s203_s0 + $0x8] sm:$0xff] }
   0x4   :  { %120 = vmatpush3.bf16.msra.mxu0 %v24_v4  ;;  %v17_v12 = vpack.c.bf16 %v16_v11, %v15_v10  ;;  %v114_v17 = vld [vmem:[%s205_s2] ss:$0 sm:$0xff] }
   0x5   :  { %121 = vmatprep.subr.bf16.mxu0 %v131_v0 }
   0x8   :  { %122 = vmatpush3.bf16.msra.mxu0 %v25_v6 }
   0x9   :  { %123 = vmatprep.subr.bf16.mxu0 %v131_v0 }
   0xc   :  { %124 = vmatpush3.bf16.msra.mxu0 %v26_v9 }
   0xf   :  { %126 = vmatmul.mubr.msk.bf16.vlgmr.msra.gmra.mrb[0].mxu0 %vm27_vm1, %v17_v12 }
  0xe2   :  { %v65_v13 = vpop.f32.mrb[0].mxu0 }
  0xe3   :  { %77 = vst.msk [vmem:[%s204_s3] sm:$0xff] %vm76_vm2, %v65_v13  ;;  %v127_v14 = vpop.f32.mrb[1].mxu0 }
  0xe4   :  { %v68_v15 = vpop.f32.mrb[2].mxu0 }
  0xe5   :  { %78 = vst.msk [vmem:[%s204_s3 + $0x8] sm:$0xff] %vm76_vm2, %v68_v15  ;;  %v128_v16 = vpop.f32.mrb[3].mxu0 }
  0xea   :  { %v93_v18 = vld [vmem:[%s204_s3] sm:$0xff] }
  0xeb   :  { %v102_v19 = vadd.f32 %v114_v17, %v93_v18 }
  0xec   :  { %v94_v20 = vld [vmem:[%s204_s3 + $0x8] sm:$0xff] }
  0xed   :  { %v104_v21 = vmax.f32 %v102_v19, 0.0  ;;  %v103_v22 = vadd.f32 %v114_v17, %v94_v20 }
  0xef   :  { %107 = vst.msk [vmem:[%s204_s3] sm:$0xff] %vm76_vm2, %v104_v21  ;;  %v105_v23 = vmax.f32 %v103_v22, 0.0 }
  0xf1   :  { %108 = vst.msk [vmem:[%s204_s3 + $0x8] sm:$0xff] %vm76_vm2, %v105_v23 }

// kernel: _lambda_.49
= control target key start
LH: loop header
LB: loop body
LE: loop exit
PB: predicated region body
PF: predicated region fallthrough
CT: control target
= control target key end

     0   :  { %v120_v0 = vmov 0.0   ;;  %vm121_vm0 = vmmov 0   ;;  %vm24_vm1 = vcmask 261120   ;;  %s186_s1 = inlined_call_operand.vmem [shape: f32[32,32], index: 1, kind: input, shape index: {}]   ;;  %s187_s0 = inlined_call_operand.vmem [shape: f32[16,32], index: 0, kind: input, shape index: {}]   ;;  %s188_s3 = inlined_call_operand.vmem [shape: f32[16,32], index: 3, kind: output, shape index: {}]   ;;  %s189_s2 = inlined_call_operand.vmem [shape: f32[1,32], index: 2, kind: input, shape index: {}]  }
   0x1   :  { %110 = vmatprep.subr.bf16.mxu0 %v120_v0  ;;  %v18_v1 = vld [vmem:[%s186_s1] sm:$0xff]  ;;  %v19_v2 = vld [vmem:[%s186_s1 + $0x8] sm:$0xff]  ;;  %v20_v3 = vld [vmem:[%s186_s1 + $0x10] sm:$0xff]  ;;  %114 = vmatprep.mubr.msk.bf16.mxu0 %vm121_vm0, %v120_v0 }
   0x2   :  { %v22_v4 = vpack.c.bf16 %v19_v2, %v18_v1  ;;  %v21_v5 = vld [vmem:[%s186_s1 + $0x18] sm:$0xff]  ;;  %v15_v7 = vld [vmem:[%s187_s0] sm:$0xff]  ;;  %v16_v8 = vld [vmem:[%s187_s0 + $0x8] sm:$0xff] }
   0x3   :  { %v23_v6 = vpack.c.bf16 %v21_v5, %v20_v3  ;;  %v17_v9 = vpack.c.bf16 %v16_v8, %v15_v7  ;;  %v106_v14 = vld [vmem:[%s189_s2] ss:$0 sm:$0xff] }
   0x4   :  { %111 = vmatpush3.bf16.msra.mxu0 %v22_v4 }
   0x5   :  { %112 = vmatprep.subr.bf16.mxu0 %v120_v0 }
   0x8   :  { %113 = vmatpush3.bf16.msra.mxu0 %v23_v6 }
   0xb   :  { %115 = vmatmul.mubr.msk.bf16.vlgmr.msra.gmra.mrb[0].mxu0 %vm24_vm1, %v17_v9 }
  0xde   :  { %v62_v10 = vpop.f32.mrb[0].mxu0 }
  0xdf   :  { %73 = vst.msk [vmem:[%s188_s3] sm:$0xff] %vm24_vm1, %v62_v10  ;;  %v116_v11 = vpop.f32.mrb[1].mxu0 }
  0xe0   :  { %v65_v12 = vpop.f32.mrb[2].mxu0 }
  0xe1   :  { %74 = vst.msk [vmem:[%s188_s3 + $0x8] sm:$0xff] %vm24_vm1, %v65_v12  ;;  %v117_v13 = vpop.f32.mrb[3].mxu0 }
  0xe6   :  { %v88_v15 = vld [vmem:[%s188_s3] sm:$0xff] }
  0xe7   :  { %v97_v16 = vadd.f32 %v106_v14, %v88_v15 }
  0xe8   :  { %v89_v17 = vld [vmem:[%s188_s3 + $0x8] sm:$0xff] }
  0xe9   :  { %99 = vst.msk [vmem:[%s188_s3] sm:$0xff] %vm24_vm1, %v97_v16  ;;  %v98_v18 = vadd.f32 %v106_v14, %v89_v17 }
  0xeb   :  { %100 = vst.msk [vmem:[%s188_s3 + $0x8] sm:$0xff] %vm24_vm1, %v98_v18 }

// kernel: _lambda_.52
= control target key start
LH: loop header
LB: loop body
LE: loop exit
PB: predicated region body
PF: predicated region fallthrough
CT: control target
= control target key end

     0   :  { %v123_v0 = vmov 0.0   ;;  %vm124_vm0 = vmmov 0   ;;  %vm24_vm1 = vcmask 261120   ;;  %vm73_vm2 = vcmask 523264   ;;  %s184_s1 = inlined_call_operand.vmem [shape: f32[32,64], index: 1, kind: input, shape index: {}]   ;;  %s185_s0 = inlined_call_operand.vmem [shape: f32[16,32], index: 0, kind: input, shape index: {}]   ;;  %s186_s3 = inlined_call_operand.vmem [shape: f32[16,64], index: 3, kind: output, shape index: {}]   ;;  %s187_s2 = inlined_call_operand.vmem [shape: f32[1,64], index: 2, kind: input, shape index: {}]  }
   0x1   :  { %113 = vmatprep.subr.bf16.mxu0 %v123_v0  ;;  %v18_v1 = vld [vmem:[%s184_s1] sm:$0xff]  ;;  %v19_v2 = vld [vmem:[%s184_s1 + $0x8] sm:$0xff]  ;;  %v20_v3 = vld [vmem:[%s184_s1 + $0x10] sm:$0xff]  ;;  %117 = vmatprep.mubr.msk.bf16.mxu0 %vm124_vm0, %v123_v0 }
   0x2   :  { %v22_v4 = vpack.c.bf16 %v19_v2, %v18_v1  ;;  %v21_v5 = vld [vmem:[%s184_s1 + $0x18] sm:$0xff]  ;;  %v15_v7 = vld [vmem:[%s185_s0] sm:$0xff]  ;;  %v16_v8 = vld [vmem:[%s185_s0 + $0x8] sm:$0xff] }
   0x3   :  { %v23_v6 = vpack.c.bf16 %v21_v5, %v20_v3  ;;  %v17_v9 = vpack.c.bf16 %v16_v8, %v15_v7  ;;  %v109_v14 = vld [vmem:[%s187_s2] ss:$0 sm:$0xff] }
   0x4   :  { %114 = vmatpush3.bf16.msra.mxu0 %v22_v4 }
   0x5   :  { %115 = vmatprep.subr.bf16.mxu0 %v123_v0 }
   0x8   :  { %116 = vmatpush3.bf16.msra.mxu0 %v23_v6 }
   0xb   :  { %118 = vmatmul.mubr.msk.bf16.vlgmr.msra.gmra.mrb[0].mxu0 %vm24_vm1, %v17_v9 }
  0xde   :  { %v62_v10 = vpop.f32.mrb[0].mxu0 }
  0xdf   :  { %74 = vst.msk [vmem:[%s186_s3] sm:$0xff] %vm73_vm2, %v62_v10  ;;  %v119_v11 = vpop.f32.mrb[1].mxu0 }
  0xe0   :  { %v65_v12 = vpop.f32.mrb[2].mxu0 }
  0xe1   :  { %75 = vst.msk [vmem:[%s186_s3 + $0x8] sm:$0xff] %vm73_vm2, %v65_v12  ;;  %v120_v13 = vpop.f32.mrb[3].mxu0 }
  0xe6   :  { %v90_v15 = vld [vmem:[%s186_s3] sm:$0xff] }
  0xe7   :  { %v99_v16 = vadd.f32 %v109_v14, %v90_v15 }
  0xe8   :  { %v91_v17 = vld [vmem:[%s186_s3 + $0x8] sm:$0xff] }
  0xe9   :  { %102 = vst.msk [vmem:[%s186_s3] sm:$0xff] %vm73_vm2, %v99_v16  ;;  %v100_v18 = vadd.f32 %v109_v14, %v91_v17 }
  0xeb   :  { %103 = vst.msk [vmem:[%s186_s3 + $0x8] sm:$0xff] %vm73_vm2, %v100_v18 }

// kernel: _lambda_.50
= control target key start
LH: loop header
LB: loop body
LE: loop exit
PB: predicated region body
PF: predicated region fallthrough
CT: control target
= control target key end

     0   :  { %vm16_vm0 = vcmask 261120   ;;  %s118_s0 = inlined_call_operand.vmem [shape: f32[16,32], index: 0, kind: input, shape index: {}]   ;;  %s119_s1 = inlined_call_operand.vmem [shape: f32[1,32], index: 1, kind: input, shape index: {}]   ;;  %s120_s2 = inlined_call_operand.vmem [shape: f32[1,32], index: 2, kind: input, shape index: {}]   ;;  %s121_s3 = inlined_call_operand.vmem [shape: f32[16,32], index: 3, kind: output, shape index: {}]  }
   0x1   :  { %v14_v0 = vld [vmem:[%s118_s0] sm:$0xff]  ;;  %v15_v1 = vld [vmem:[%s118_s0 + $0x8] sm:$0xff] }
   0x2   :  { %v17_v2 = vsel %vm16_vm0, %v14_v0, 0.0  ;;  %v20_v3 = vsel %vm16_vm0, %v15_v1, 0.0  ;;  %v68_v21 = vld [vmem:[%s119_s1] ss:$0 sm:$0xff] }
   0x3   :  { %18 = vadd.xlane.f32.xlu0 %v17_v2  ;;  %v69_v23 = vld [vmem:[%s120_s2] ss:$0 sm:$0xff] }
   0x7   :  { %21 = vadd.xlane.f32.xlu0 %v20_v3 }
  0x90   :  { %v19_v4 = vpop.xlane.xlu0 %18 }
  0x91   :  { %v24_v5 = vmul.f32 0.03125, %v19_v4 }
  0x93   :  { %v26_v6 = vsub.f32 %v14_v0, %v24_v5 }
  0x94   :  { %v22_v7 = vpop.xlane.xlu0 %21 }
  0x95   :  { %v25_v8 = vmul.f32 0.03125, %v22_v7  ;;  %v28_v9 = vmul.f32 %v26_v6, %v26_v6 }
  0x97   :  { %v27_v10 = vsub.f32 %v15_v1, %v25_v8  ;;  %v30_v11 = vsel %vm16_vm0, %v28_v9, 0.0 }
  0x98   :  { %31 = vadd.xlane.f32.xlu1 %v30_v11 }
  0x99   :  { %v29_v12 = vmul.f32 %v27_v10, %v27_v10 }
  0x9b   :  { %v33_v13 = vsel %vm16_vm0, %v29_v12, 0.0 }
  0x9c   :  { %34 = vadd.xlane.f32.xlu1 %v33_v13 }
 0x125   :  { %v32_v14 = vpop.xlane.xlu1 %31 }
 0x126   :  { %v36_v15 = vmul.f32 0.03125, %v32_v14 }
 0x128   :  { %v38_v16 = vadd.f32 1e-05, %v36_v15 }
 0x129   :  { %v35_v17 = vpop.xlane.xlu1 %34 }
 0x12a   :  { %70 = vrsqrt.f32 %v38_v16  ;;  %v37_v18 = vmul.f32 0.03125, %v35_v17 }
 0x12c   :  { %v39_v19 = vadd.f32 1e-05, %v37_v18 }
 0x12e   :  { %72 = vrsqrt.f32 %v39_v19 }
 0x134   :  { %v71_v20 = vpop.eup %70 }
 0x135   :  { %v42_v22 = vmul.f32 %v71_v20, %v26_v6 }
 0x137   :  { %v51_v24 = vmul.f32 %v68_v21, %v42_v22 }
 0x138   :  { %v73_v25 = vpop.eup %72 }
 0x139   :  { %v60_v26 = vadd.f32 %v69_v23, %v51_v24  ;;  %v43_v27 = vmul.f32 %v73_v25, %v27_v10 }
 0x13b   :  { %62 = vst.msk [vmem:[%s121_s3] sm:$0xff] %vm16_vm0, %v60_v26  ;;  %v52_v28 = vmul.f32 %v68_v21, %v43_v27 }
 0x13d   :  { %v61_v29 = vadd.f32 %v69_v23, %v52_v28 }
 0x13f   :  { %63 = vst.msk [vmem:[%s121_s3 + $0x8] sm:$0xff] %vm16_vm0, %v61_v29 }

// kernel: _lambda_.55
= control target key start
LH: loop header
LB: loop body
LE: loop exit
PB: predicated region body
PF: predicated region fallthrough
CT: control target
= control target key end

     0   :  { %vm23_vm0 = vcmask 261120   ;;  %s136_s0 = inlined_call_operand.vmem [shape: f32[16,32], index: 0, kind: input, shape index: {}]   ;;  %s137_s1 = inlined_call_operand.vmem [shape: f32[16,32], index: 1, kind: input, shape index: {}]   ;;  %s138_s2 = inlined_call_operand.vmem [shape: f32[1,32], index: 2, kind: input, shape index: {}]   ;;  %s139_s3 = inlined_call_operand.vmem [shape: f32[1,32], index: 3, kind: input, shape index: {}]   ;;  %s140_s4 = inlined_call_operand.vmem [shape: f32[16,32], index: 4, kind: output, shape index: {}]  }
   0x1   :  { %v17_v0 = vld [vmem:[%s136_s0] sm:$0xff]  ;;  %v18_v2 = vld [vmem:[%s136_s0 + $0x8] sm:$0xff] }
   0x2   :  { %v19_v1 = vld [vmem:[%s137_s1] sm:$0xff]  ;;  %v20_v4 = vld [vmem:[%s137_s1 + $0x8] sm:$0xff] }
   0x3   :  { %v21_v3 = vadd.f32 %v19_v1, %v17_v0  ;;  %v22_v5 = vadd.f32 %v20_v4, %v18_v2  ;;  %v75_v25 = vld [vmem:[%s138_s2] ss:$0 sm:$0xff] }
   0x4   :  { %v76_v27 = vld [vmem:[%s139_s3] ss:$0 sm:$0xff] }
   0x5   :  { %v24_v6 = vsel %vm23_vm0, %v21_v3, 0.0  ;;  %v27_v7 = vsel %vm23_vm0, %v22_v5, 0.0 }
   0x6   :  { %25 = vadd.xlane.f32.xlu0 %v24_v6 }
   0xa   :  { %28 = vadd.xlane.f32.xlu0 %v27_v7 }
  0x93   :  { %v26_v8 = vpop.xlane.xlu0 %25 }
  0x94   :  { %v31_v9 = vmul.f32 0.03125, %v26_v8 }
  0x96   :  { %v33_v10 = vsub.f32 %v21_v3, %v31_v9 }
  0x97   :  { %v29_v11 = vpop.xlane.xlu0 %28 }
  0x98   :  { %v32_v12 = vmul.f32 0.03125, %v29_v11  ;;  %v35_v13 = vmul.f32 %v33_v10, %v33_v10 }
  0x9a   :  { %v34_v14 = vsub.f32 %v22_v5, %v32_v12  ;;  %v37_v15 = vsel %vm23_vm0, %v35_v13, 0.0 }
  0x9b   :  { %38 = vadd.xlane.f32.xlu1 %v37_v15 }
  0x9c   :  { %v36_v16 = vmul.f32 %v34_v14, %v34_v14 }
  0x9e   :  { %v40_v17 = vsel %vm23_vm0, %v36_v16, 0.0 }
  0x9f   :  { %41 = vadd.xlane.f32.xlu1 %v40_v17 }
 0x128   :  { %v39_v18 = vpop.xlane.xlu1 %38 }
 0x129   :  { %v43_v19 = vmul.f32 0.03125, %v39_v18 }
 0x12b   :  { %v45_v20 = vadd.f32 1e-05, %v43_v19 }
 0x12c   :  { %v42_v21 = vpop.xlane.xlu1 %41 }
 0x12d   :  { %77 = vrsqrt.f32 %v45_v20  ;;  %v44_v22 = vmul.f32 0.03125, %v42_v21 }
 0x12f   :  { %v46_v23 = vadd.f32 1e-05, %v44_v22 }
 0x131   :  { %79 = vrsqrt.f32 %v46_v23 }
 0x137   :  { %v78_v24 = vpop.eup %77 }
 0x138   :  { %v49_v26 = vmul.f32 %v78_v24, %v33_v10 }
 0x13a   :  { %v58_v28 = vmul.f32 %v75_v25, %v49_v26 }
 0x13b   :  { %v80_v29 = vpop.eup %79 }
 0x13c   :  { %v67_v30 = vadd.f32 %v76_v27, %v58_v28  ;;  %v50_v31 = vmul.f32 %v80_v29, %v34_v14 }
 0x13e   :  { %69 = vst.msk [vmem:[%s140_s4] sm:$0xff] %vm23_vm0, %v67_v30  ;;  %v59_v32 = vmul.f32 %v75_v25, %v50_v31 }
 0x140   :  { %v68_v33 = vadd.f32 %v76_v27, %v59_v32 }
 0x142   :  { %70 = vst.msk [vmem:[%s140_s4 + $0x8] sm:$0xff] %vm23_vm0, %v68_v33 }

// kernel: _lambda_.56
= control target key start
LH: loop header
LB: loop body
LE: loop exit
PB: predicated region body
PF: predicated region fallthrough
CT: control target
= control target key end

     0   :  { %v145_v0 = vmov 0.0   ;;  %vm146_vm0 = vmmov 0   ;;  %vm24_vm1 = vcmask 261120   ;;  %vm73_vm2 = vcmask 523264   ;;  %s210_s1 = inlined_call_operand.vmem [shape: f32[32,64], index: 1, kind: input, shape index: {}]   ;;  %s211_s0 = inlined_call_operand.vmem [shape: f32[16,32], index: 0, kind: input, shape index: {}]   ;;  %s212_s3 = inlined_call_operand.vmem [shape: f32[16,64], index: 3, kind: output, shape index: {}]   ;;  %s213_s2 = inlined_call_operand.vmem [shape: f32[1,64], index: 2, kind: input, shape index: {}]  }
   0x1   :  { %131 = vmatprep.subr.bf16.mxu0 %v145_v0  ;;  %v18_v1 = vld [vmem:[%s210_s1] sm:$0xff]  ;;  %v19_v2 = vld [vmem:[%s210_s1 + $0x8] sm:$0xff]  ;;  %v20_v3 = vld [vmem:[%s210_s1 + $0x10] sm:$0xff]  ;;  %135 = vmatprep.mubr.msk.bf16.mxu0 %vm146_vm0, %v145_v0 }
   0x2   :  { %v22_v4 = vpack.c.bf16 %v19_v2, %v18_v1  ;;  %v21_v5 = vld [vmem:[%s210_s1 + $0x18] sm:$0xff]  ;;  %v15_v7 = vld [vmem:[%s211_s0] sm:$0xff]  ;;  %v16_v8 = vld [vmem:[%s211_s0 + $0x8] sm:$0xff] }
   0x3   :  { %v23_v6 = vpack.c.bf16 %v21_v5, %v20_v3  ;;  %v17_v9 = vpack.c.bf16 %v16_v8, %v15_v7  ;;  %v127_v14 = vld [vmem:[%s213_s2] ss:$0 sm:$0xff] }
   0x4   :  { %132 = vmatpush3.bf16.msra.mxu0 %v22_v4 }
   0x5   :  { %133 = vmatprep.subr.bf16.mxu0 %v145_v0 }
   0x8   :  { %134 = vmatpush3.bf16.msra.mxu0 %v23_v6 }
   0xb   :  { %136 = vmatmul.mubr.msk.bf16.vlgmr.msra.gmra.mrb[0].mxu0 %vm24_vm1, %v17_v9 }
  0xde   :  { %v62_v10 = vpop.f32.mrb[0].mxu0 }
  0xdf   :  { %74 = vst.msk [vmem:[%s212_s3] sm:$0xff] %vm73_vm2, %v62_v10  ;;  %v137_v11 = vpop.f32.mrb[1].mxu0 }
  0xe0   :  { %v65_v12 = vpop.f32.mrb[2].mxu0 }
  0xe1   :  { %75 = vst.msk [vmem:[%s212_s3 + $0x8] sm:$0xff] %vm73_vm2, %v65_v12  ;;  %v138_v13 = vpop.f32.mrb[3].mxu0 }
  0xe6   :  { %v90_v15 = vld [vmem:[%s212_s3] sm:$0xff] }
  0xe7   :  { %v99_v16 = vadd.f32 %v127_v14, %v90_v15 }
  0xe8   :  { %v91_v17 = vld [vmem:[%s212_s3 + $0x8] sm:$0xff] }
  0xe9   :  { %v103_v18 = vmul.f32 0.044715, %v99_v16  ;;  %v100_v19 = vadd.f32 %v127_v14, %v91_v17  ;;  %v101_v30 = vmul.f32 0.5, %v99_v16 }
  0xeb   :  { %v105_v20 = vmul.f32 %v103_v18, %v99_v16  ;;  %v104_v21 = vmul.f32 0.044715, %v100_v19  ;;  %v102_v34 = vmul.f32 0.5, %v100_v19 }
  0xed   :  { %v107_v22 = vmul.f32 %v105_v20, %v99_v16  ;;  %v106_v23 = vmul.f32 %v104_v21, %v100_v19 }
  0xef   :  { %v109_v24 = vadd.f32 %v107_v22, %v99_v16  ;;  %v108_v25 = vmul.f32 %v106_v23, %v100_v19 }
  0xf1   :  { %v111_v26 = vmul.f32 0.7978846, %v109_v24  ;;  %v110_v27 = vadd.f32 %v108_v25, %v100_v19 }
  0xf3   :  { %141 = vtanh.f32 %v111_v26  ;;  %v112_v28 = vmul.f32 0.7978846, %v110_v27 }
  0xf5   :  { %143 = vtanh.f32 %v112_v28 }
  0xfd   :  { %v142_v29 = vpop.eup %141 }
  0xfe   :  { %v115_v31 = vadd.f32 1.0, %v142_v29 }
  0xff   :  { %v144_v32 = vpop.eup %143 }
 0x100   :  { %v117_v33 = vmul.f32 %v115_v31, %v101_v30  ;;  %v116_v35 = vadd.f32 1.0, %v144_v32 }
 0x102   :  { %120 = vst.msk [vmem:[%s212_s3] sm:$0xff] %vm73_vm2, %v117_v33  ;;  %v118_v36 = vmul.f32 %v116_v35, %v102_v34 }
 0x104   :  { %121 = vst.msk [vmem:[%s212_s3 + $0x8] sm:$0xff] %vm73_vm2, %v118_v36 }

// kernel: _lambda_.57
= control target key start
LH: loop header
LB: loop body
LE: loop exit
PB: predicated region body
PF: predicated region fallthrough
CT: control target
= control target key end

     0   :  { %v135_v0 = vmov 0.0   ;;  %vm136_vm0 = vmmov 0   ;;  %vm30_vm1 = vcmask 523264   ;;  %vm79_vm2 = vcmask 261120   ;;  %s208_s1 = inlined_call_operand.vmem [shape: f32[64,32], index: 1, kind: input, shape index: {}]   ;;  %s209_s0 = inlined_call_operand.vmem [shape: f32[16,64], index: 0, kind: input, shape index: {}]   ;;  %s210_s3 = inlined_call_operand.vmem [shape: f32[16,32], index: 3, kind: output, shape index: {}]   ;;  %s211_s2 = inlined_call_operand.vmem [shape: f32[1,32], index: 2, kind: input, shape index: {}]  }
   0x1   :  { %121 = vmatprep.subr.bf16.mxu0 %v135_v0  ;;  %v18_v1 = vld [vmem:[%s208_s1] sm:$0xff]  ;;  %v19_v2 = vld [vmem:[%s208_s1 + $0x8] sm:$0xff]  ;;  %v20_v3 = vld [vmem:[%s208_s1 + $0x10] sm:$0xff]  ;;  %129 = vmatprep.mubr.msk.bf16.mxu0 %vm136_vm0, %v135_v0 }
   0x2   :  { %v26_v4 = vpack.c.bf16 %v19_v2, %v18_v1  ;;  %v21_v5 = vld [vmem:[%s208_s1 + $0x18] sm:$0xff]  ;;  %v22_v7 = vld [vmem:[%s208_s1 + $0x20] sm:$0xff]  ;;  %v23_v8 = vld [vmem:[%s208_s1 + $0x28] sm:$0xff] }
   0x3   :  { %v27_v6 = vpack.c.bf16 %v21_v5, %v20_v3  ;;  %v28_v9 = vpack.c.bf16 %v23_v8, %v22_v7  ;;  %v24_v10 = vld [vmem:[%s208_s1 + $0x30] sm:$0xff]  ;;  %v25_v11 = vld [vmem:[%s208_s1 + $0x38] sm:$0xff]  ;;  %v15_v13 = vld [vmem:[%s209_s0] sm:$0xff] }
   0x4   :  { %122 = vmatpush3.bf16.msra.mxu0 %v26_v4  ;;  %v29_v12 = vpack.c.bf16 %v25_v11, %v24_v10  ;;  %v16_v14 = vld [vmem:[%s209_s0 + $0x8] sm:$0xff]  ;;  %v115_v20 = vld [vmem:[%s211_s2] ss:$0 sm:$0xff] }
   0x5   :  { %123 = vmatprep.subr.bf16.mxu0 %v135_v0  ;;  %v17_v15 = vpack.c.bf16 %v16_v14, %v15_v13 }
   0x8   :  { %124 = vmatpush3.bf16.msra.mxu0 %v27_v6 }
   0x9   :  { %125 = vmatprep.subr.bf16.mxu0 %v135_v0 }
   0xc   :  { %126 = vmatpush3.bf16.msra.mxu0 %v28_v9 }
   0xd   :  { %127 = vmatprep.subr.bf16.mxu0 %v135_v0 }
  0x10   :  { %128 = vmatpush3.bf16.msra.mxu0 %v29_v12 }
  0x13   :  { %130 = vmatmul.mubr.msk.bf16.vlgmr.msra.gmra.mrb[0].mxu0 %vm30_vm1, %v17_v15 }
  0xe6   :  { %v68_v16 = vpop.f32.mrb[0].mxu0 }
  0xe7   :  { %80 = vst.msk [vmem:[%s210_s3] sm:$0xff] %vm79_vm2, %v68_v16  ;;  %v131_v17 = vpop.f32.mrb[1].mxu0 }
  0xe8   :  { %v71_v18 = vpop.f32.mrb[2].mxu0 }
  0xe9   :  { %81 = vst.msk [vmem:[%s210_s3 + $0x8] sm:$0xff] %vm79_vm2, %v71_v18  ;;  %v132_v19 = vpop.f32.mrb[3].mxu0 }
  0xee   :  { %v96_v21 = vld [vmem:[%s210_s3] sm:$0xff] }
  0xef   :  { %v105_v22 = vadd.f32 %v115_v20, %v96_v21 }
  0xf0   :  { %v97_v23 = vld [vmem:[%s210_s3 + $0x8] sm:$0xff] }
  0xf1   :  { %108 = vst.msk [vmem:[%s210_s3] sm:$0xff] %vm79_vm2, %v105_v22  ;;  %v106_v24 = vadd.f32 %v115_v20, %v97_v23 }
  0xf3   :  { %109 = vst.msk [vmem:[%s210_s3 + $0x8] sm:$0xff] %vm79_vm2, %v106_v24 }

// kernel: _lambda_.53
= control target key start
LH: loop header
LB: loop body
LE: loop exit
PB: predicated region body
PF: predicated region fallthrough
CT: control target
= control target key end

     0   :  { %s985_s12 = smov 0   ;;  %s987_s13 = smov 0   ;;  %s1097_s0 = inlined_call_operand.vmem [shape: f32[2,8,32], index: 0, kind: input, shape index: {}]   ;;  %s1098_s1 = inlined_call_operand.vmem [shape: f32[2,8,64], index: 1, kind: input, shape index: {}]   ;;  %s1099_s2 = inlined_call_operand.vmem [shape: f32[2,1,8], index: 2, kind: input, shape index: {}]   ;;  %s1100_s3 = inlined_call_operand.vmem [shape: f32[2,8,32], index: 3, kind: output, shape index: {}]  }
   0x1   :  { %s989_s14 = smov 0  }
   0x2 LB: > { %s25_s15 = sadd.s32 1, %s947_s13  ;;  %p798_p0 = scmp.ge.s32.totalorder %s951_s14, 1  ;;  %s951_s14 = sphi %s989_s14, %s13_s14   ;;  %s947_s13 = sphi %s987_s13, %s1102_s13   ;;  %s943_s12 = sphi %s985_s12, %s1101_s12  }
   0x3   : > { %p27_p1 = scmp.ge.s32.totalorder %s25_s15, 2  ;;  %p172_p2 = scmp.lt.s32.totalorder %s951_s14, 3 }
   0x5   : > { %s1104_s15 = smov (%p27_p1, %s25_s15), 0  ;;  %p173_p3 = pnand %p798_p0, %p172_p2 }
   0x6   : > { %p207_p4 = scmp.lt.s32.totalorder (!%p173_p3), %s943_s12, 1  ;;  %v953_v0 = vmov (!%p173_p3), 0.0   ;;  %vm954_vm0 = vmmov (!%p173_p3), 0   ;;  %vm240_vm1 = vcmask (!%p173_p3), 64512   ;;  %s955_s26 = smov (!%p173_p3), 96   ;;  %vm305_vm2 = vcmask (!%p173_p3), 1043456  }
   0x7   : > { %176 = sbr.rel (%p173_p3) target bundleno = 1442 (0x5a2), region = 32  ;;  %829 = vmatprep.subr.bf16.mxu0 (!%p173_p3), %v953_v0  ;;  %831 = vmatprep.mubr.msk.bf16.mxu0 (!%p173_p3), %vm954_vm0, %v953_v0  ;;  %s956_s27 = smov (!%p173_p3), 120   ;;  %vm693_vm3 = vcmask (!%p173_p3), 130048   ;;  %vm695_vm4 = vcmask (!%p173_p3), 195584   ;;  %vm697_vm5 = vcmask (!%p173_p3), 261120  }
   0x8   : > { %835 = vmatprep.subr.bf16.mxu1 (!%p173_p3), %v953_v0  ;;  %837 = vmatprep.mubr.msk.bf16.mxu1 (!%p173_p3), %vm954_vm0, %v953_v0  ;;  %s957_s28 = smov (!%p173_p3), 112   ;;  %s958_s29 = smov (!%p173_p3), 104  }
   0x9   : > { %s959_s30 = smov (!%p173_p3), 88   ;;  %s960_s4 = smov (!%p173_p3), 72  }
   0xa   : > { %s961_s5 = smov (!%p173_p3), 80   ;;  %s962_s6 = smov (!%p173_p3), 8  }
   0xb   : > { %s963_s7 = smov (!%p173_p3), 16   ;;  %s964_s8 = smov (!%p173_p3), 24  }
   0xe   : > { %s1106_s12 = smov (!%p207_p4, %s943_s12), 1 }
   0xf   : > { %s1009_s16 = sshll.u32 %s1106_s12, 3  ;;  %s220_s25 = scalar_lea.vmem %s1099_s2, %s1106_s12 }
  0x10   : > { %s217_s19 = scalar_lea.vmem %s1098_s1, %s1009_s16  ;;  %s213_s22 = scalar_lea.vmem %s1097_s0, %s1009_s16  ;;  %v1030_v6 = vld [vmem:[%s220_s25] ss:$0 sm:$0xff] }
  0x11   : > { %v230_v1 = vld [vmem:[%s217_s19] sm:$0xff]  ;;  %s227_s11 = scalar_lea.vmem %s1100_s3, %s1009_s16 }
  0x12   : > { %v1015_v2 = vpack.c.bf16 %v230_v1, %v230_v1  ;;  %v229_v4 = vld [vmem:[%s213_s22] sm:$0xff] }
  0x13   : > { %v232_v5 = vpack.c.bf16 %v229_v4, %v229_v4 }
  0x14   : > { %v245_v3 = vsel %vm240_vm1, %v1015_v2, 0  ;;  %300 = vrot.lane.b32.xlu1 %v1015_v2, %s955_s26 }
  0x15   : > { %830 = vmatpush3.bf16.xpose.msra.mxu0 %v245_v3 }
  0x16   : > { %847 = vmatprep.subr.bf16.mxu0 %v953_v0 }
  0x18   : > { %352 = vrot.lane.b32.xlu1 %v1015_v2, %s956_s27 }
  0x1c   : > { %832 = vmatmul.mubr.msk.bf16.vlgmr.msra.gmra.mrb[0].mxu0 %vm240_vm1, %v232_v5  ;;  %462 = vrot.lane.b32.xlu1 %v1015_v2, %s957_s28 }
  0x1d   : > { %849 = vmatprep.mubr.msk.bf16.mxu0 %vm954_vm0, %v953_v0 }
  0x20   : > { %460 = vrot.lane.b32.xlu1 %v232_v5, %s957_s28 }
  0x24   : > { %572 = vrot.lane.b32.xlu1 %v1015_v2, %s958_s29 }
  0x28   : > { %570 = vrot.lane.b32.xlu1 %v232_v5, %s958_s29 }
  0x86   : > { %v301_v18 = vpop.permute.xlu1 %300 }
  0x87   : > { %v307_v19 = vsel %vm305_vm2, %v301_v18, 0 }
  0x88   : > { %836 = vmatpush3.bf16.msra.mxu1 %v307_v19 }
  0x89   : > { %841 = vmatprep.subr.bf16.mxu1 %v953_v0 }
  0x8a   : > { %v353_v22 = vpop.permute.xlu1 %352 }
  0x8b   : > { %v358_v24 = vsel %vm240_vm1, %v353_v22, 0 }
  0x8e   : > { %v463_v26 = vpop.permute.xlu1 %462 }
  0x8f   : > { %v468_v29 = vsel %vm240_vm1, %v463_v26, 0 }
  0x92   : > { %v461_v28 = vpop.permute.xlu1 %460 }
  0x96   : > { %v573_v30 = vpop.permute.xlu1 %572 }
  0x97   : > { %v578_v31 = vsel %vm240_vm1, %v573_v30, 0 }
  0x9a   : > { %v571_v32 = vpop.permute.xlu1 %570 }
  0xef   : > { %v281_v7 = vpop.f32.mrb[0].mxu0 }
  0xf0   : > { %v282_v8 = vadd.f32 %v1030_v6, %v281_v7  ;;  %v833_v9 = vpop.f32.mrb[1].mxu0 }
  0xf1   : > { %v284_v10 = vpop.f32.mrb[2].mxu0 }
  0xf2   : > { %v834_v11 = vpop.f32.mrb[3].mxu0  ;;  %v287_v12 = vsel %vm240_vm1, %v282_v8, -inf }
  0xf3   : > { %288 = vmax.xlane.f32.xlu0 %v287_v12 }
 0x180   : > { %v289_v13 = vpop.xlane.xlu0 %288 }
 0x181   : > { %v290_v14 = vsub.f32 %v282_v8, %v289_v13 }
 0x183   : > { %v291_v15 = vmul.f32 1.442695, %v290_v14 }
 0x185   : > { %913 = vpow2.f32 %v291_v15 }
 0x18f   : > { %v914_v16 = vpop.eup %913 }
 0x190   : > { %v293_v17 = vsel %vm240_vm1, %v914_v16, 0.0 }
 0x191   : > { %294 = vadd.xlane.f32.xlu0 %v293_v17 }
 0x1a7   : > { %350 = vrot.lane.b32.xlu0 %v232_v5, %s956_s27 }
 0x21e   : > { %v295_v20 = vpop.xlane.xlu0 %294 }
 0x21f   : > { %915 = vrcp.f32 %v295_v20 }
 0x222   : > { %v351_v27 = vpop.permute.xlu0 %350 }
 0x229   : > { %v916_v21 = vpop.eup %915 }
 0x22a   : > { %v297_v23 = vmul.f32 %v916_v21, %v914_v16 }
 0x22c   : > { %v298_v25 = vpack.c.bf16 %v297_v23, %v297_v23 }
 0x22e   : > { %838 = vmatmul.mubr.msk.bf16.vlgmr.msra.gmra.mrb[0].mxu1 %vm240_vm1, %v298_v25 }
 0x22f   : > { %842 = vmatpush3.bf16.xpose.msra.mxu1 %v358_v24  ;;  %843 = vmatprep.mubr.msk.bf16.mxu1 %vm954_vm0, %v953_v0 }
 0x230   : > { %853 = vmatprep.subr.bf16.mxu1 %v953_v0 }
 0x236   : > { %844 = vmatmul.mubr.msk.bf16.vlgmr.msra.gmra.mrb[4].mxu1 %vm240_vm1, %v351_v27 }
 0x237   : > { %854 = vmatpush3.bf16.xpose.msra.mxu1 %v468_v29  ;;  %855 = vmatprep.mubr.msk.bf16.mxu1 %vm954_vm0, %v953_v0 }
 0x238   : > { %865 = vmatprep.subr.bf16.mxu1 %v953_v0 }
 0x23e   : > { %856 = vmatmul.mubr.msk.bf16.vlgmr.msra.gmra.mrb[8].mxu1 %vm240_vm1, %v461_v28 }
 0x23f   : > { %866 = vmatpush3.bf16.xpose.msra.mxu1 %v578_v31  ;;  %867 = vmatprep.mubr.msk.bf16.mxu1 %vm954_vm0, %v953_v0 }
 0x246   : > { %868 = vmatmul.mubr.msk.bf16.vlgmr.msra.gmra.mrb[12].mxu1 %vm240_vm1, %v571_v32 }
 0x301   : > { %v1056_v33 = vpop.f32.mrb[0].mxu1 }
 0x302   : > { %v839_v34 = vpop.f32.mrb[1].mxu1 }
 0x303   : > { %v346_v35 = vpop.f32.mrb[2].mxu1 }
 0x304   : > { %v840_v36 = vpop.f32.mrb[3].mxu1 }
 0x309   : > { %v394_v37 = vpop.f32.mrb[4].mxu1 }
 0x30a   : > { %v395_v38 = vadd.f32 %v1030_v6, %v394_v37  ;;  %v845_v39 = vpop.f32.mrb[5].mxu1 }
 0x30b   : > { %v397_v40 = vpop.f32.mrb[6].mxu1 }
 0x30c   : > { %v846_v41 = vpop.f32.mrb[7].mxu1  ;;  %v400_v42 = vsel %vm240_vm1, %v395_v38, -inf }
 0x30d   : > { %401 = vmax.xlane.f32.xlu1 %v400_v42 }
 0x311   : > { %v504_v43 = vpop.f32.mrb[8].mxu1 }
 0x312   : > { %v505_v44 = vadd.f32 %v1030_v6, %v504_v43  ;;  %v857_v45 = vpop.f32.mrb[9].mxu1 }
 0x313   : > { %v507_v46 = vpop.f32.mrb[10].mxu1 }
 0x314   : > { %v858_v47 = vpop.f32.mrb[11].mxu1  ;;  %v510_v48 = vsel %vm240_vm1, %v505_v44, -inf }
 0x315   : > { %511 = vmax.xlane.f32.xlu0 %v510_v48 }
 0x319   : > { %v614_v49 = vpop.f32.mrb[12].mxu1 }
 0x31a   : > { %v615_v50 = vadd.f32 %v1030_v6, %v614_v49  ;;  %v869_v51 = vpop.f32.mrb[13].mxu1 }
 0x31b   : > { %v617_v52 = vpop.f32.mrb[14].mxu1 }
 0x31c   : > { %v870_v53 = vpop.f32.mrb[15].mxu1  ;;  %v620_v54 = vsel %vm240_vm1, %v615_v50, -inf }
 0x31d   : > { %621 = vmax.xlane.f32.xlu1 %v620_v54 }
 0x32e   : > { %412 = vrot.lane.b32.xlu1 %v1015_v2, %s959_s30 }
 0x39a   : > { %v402_v55 = vpop.xlane.xlu1 %401 }
 0x39b   : > { %v403_v56 = vsub.f32 %v395_v38, %v402_v55 }
 0x39d   : > { %v404_v57 = vmul.f32 1.442695, %v403_v56 }
 0x39f   : > { %917 = vpow2.f32 %v404_v57 }
 0x3a2   : > { %v512_v58 = vpop.xlane.xlu0 %511 }
 0x3a3   : > { %v513_v59 = vsub.f32 %v505_v44, %v512_v58 }
 0x3a5   : > { %v514_v60 = vmul.f32 1.442695, %v513_v59 }
 0x3a7   : > { %919 = vpow2.f32 %v514_v60 }
 0x3a9   : > { %v918_v61 = vpop.eup %917 }
 0x3aa   : > { %v622_v62 = vpop.xlane.xlu1 %621  ;;  %v406_v63 = vsel %vm240_vm1, %v918_v61, 0.0 }
 0x3ab   : > { %v623_v1 = vsub.f32 %v615_v50, %v622_v62  ;;  %407 = vadd.xlane.f32.xlu0 %v406_v63 }
 0x3ad   : > { %v624_v3 = vmul.f32 1.442695, %v623_v1 }
 0x3ae   : > { %v413_v4 = vpop.permute.xlu1 %412 }
 0x3af   : > { %921 = vpow2.f32 %v624_v3  ;;  %v418_v5 = vsel %vm305_vm2, %v413_v4, 0 }
 0x3b0   : > { %848 = vmatpush3.bf16.msra.mxu0 %v418_v5 }
 0x3b1   : > { %v920_v6 = vpop.eup %919  ;;  %859 = vmatprep.subr.bf16.mxu0 %v953_v0 }
 0x3b2   : > { %v516_v7 = vsel %vm240_vm1, %v920_v6, 0.0 }
 0x3b3   : > { %517 = vadd.xlane.f32.xlu1 %v516_v7 }
 0x3b9   : > { %v922_v8 = vpop.eup %921 }
 0x3ba   : > { %v626_v9 = vsel %vm240_vm1, %v922_v8, 0.0 }
 0x3bb   : > { %627 = vadd.xlane.f32.xlu0 %v626_v9 }
 0x3c4   : > { %632 = vrot.lane.b32.xlu1 %v1015_v2, %s960_s4 }
 0x3d1   : > { %522 = vrot.lane.b32.xlu0 %v1015_v2, %s961_s5 }
 0x438   : > { %v408_v10 = vpop.xlane.xlu0 %407 }
 0x439   : > { %923 = vrcp.f32 %v408_v10 }
 0x440   : > { %v518_v11 = vpop.xlane.xlu1 %517 }
 0x441   : > { %925 = vrcp.f32 %v518_v11 }
 0x443   : > { %v924_v12 = vpop.eup %923 }
 0x444   : > { %v410_v13 = vmul.f32 %v924_v12, %v918_v61  ;;  %v633_v19 = vpop.permute.xlu1 %632 }
 0x445   : > { %v638_v21 = vsel %vm305_vm2, %v633_v19, 0 }
 0x446   : > { %v411_v14 = vpack.c.bf16 %v410_v13, %v410_v13 }
 0x448   : > { %v628_v15 = vpop.xlane.xlu0 %627  ;;  %850 = vmatmul.mubr.msk.bf16.vlgmr.msra.gmra.mrb[4].mxu0 %vm240_vm1, %v411_v14 }
 0x449   : > { %927 = vrcp.f32 %v628_v15  ;;  %861 = vmatprep.mubr.msk.bf16.mxu0 %vm954_vm0, %v953_v0 }
 0x44b   : > { %v926_v16 = vpop.eup %925 }
 0x44c   : > { %v520_v17 = vmul.f32 %v926_v16, %v920_v6  ;;  %v523_v18 = vpop.permute.xlu0 %522 }
 0x44d   : > { %v528_v2 = vsel %vm305_vm2, %v523_v18, 0 }
 0x44e   : > { %860 = vmatpush3.bf16.msra.mxu0 %v528_v2  ;;  %v521_v20 = vpack.c.bf16 %v520_v17, %v520_v17 }
 0x44f   : > { %871 = vmatprep.subr.bf16.mxu0 %v953_v0 }
 0x451   : > { %862 = vmatmul.mubr.msk.bf16.vlgmr.msra.gmra.mrb[8].mxu0 %vm240_vm1, %v521_v20 }
 0x452   : > { %872 = vmatpush3.bf16.msra.mxu0 %v638_v21  ;;  %873 = vmatprep.mubr.msk.bf16.mxu0 %vm954_vm0, %v953_v0 }
 0x453   : > { %v928_v22 = vpop.eup %927 }
 0x454   : > { %v630_v23 = vmul.f32 %v928_v22, %v922_v8 }
 0x456   : > { %v631_v24 = vpack.c.bf16 %v630_v23, %v630_v23 }
 0x459   : > { %874 = vmatmul.mubr.msk.bf16.vlgmr.msra.gmra.mrb[12].mxu0 %vm240_vm1, %v631_v24 }
 0x51b   : > { %v454_v25 = vpop.f32.mrb[4].mxu0 }
 0x51c   : > { %681 = vrot.lane.b32.xlu1 %v454_v25, %s962_s6  ;;  %v851_v26 = vpop.f32.mrb[5].mxu0 }
 0x51d   : > { %v457_v27 = vpop.f32.mrb[6].mxu0 }
 0x51e   : > { %v852_v28 = vpop.f32.mrb[7].mxu0 }
 0x524   : > { %v564_v29 = vpop.f32.mrb[8].mxu0 }
 0x525   : > { %685 = vrot.lane.b32.xlu0 %v564_v29, %s963_s7  ;;  %v863_v30 = vpop.f32.mrb[9].mxu0 }
 0x526   : > { %v567_v31 = vpop.f32.mrb[10].mxu0 }
 0x527   : > { %v864_v32 = vpop.f32.mrb[11].mxu0 }
 0x52c   : > { %v674_v34 = vpop.f32.mrb[12].mxu0 }
 0x52d   : > { %689 = vrot.lane.b32.xlu1 %v674_v34, %s964_s8  ;;  %v875_v0 = vpop.f32.mrb[13].mxu0 }
 0x52e   : > { %v677_v35 = vpop.f32.mrb[14].mxu0 }
 0x52f   : > { %v876_v36 = vpop.f32.mrb[15].mxu0 }
 0x58e   : > { %v682_v37 = vpop.permute.xlu1 %681 }
 0x58f   : > { %v692_v39 = vsel %vm240_vm1, %v1056_v33, %v682_v37 }
 0x597   : > { %v686_v38 = vpop.permute.xlu0 %685 }
 0x598   : > { %v694_v40 = vsel %vm693_vm3, %v692_v39, %v686_v38 }
 0x59f   : > { %v690_v41 = vpop.permute.xlu1 %689 }
 0x5a0   : > { %v696_v42 = vsel %vm695_vm4, %v694_v40, %v690_v41 }
 0x5a1   : > { %698 = vst.msk [vmem:[%s227_s11] sm:$0xff] %vm697_vm5, %v696_v42 }
 0x5a2 PF: > { %s13_s14 = sadd.s32 1, %s951_s14   ;;  %s1101_s12 = smov %s947_s13 }
 0x5a3   : > { %p10_p5 = scmp.ge.s32.totalorder %s13_s14, 4   ;;  %s1102_s13 = smov %s1104_s15 }
 0x5a5   :  { %12 = sbr.rel (!%p10_p5) target bundleno = 2 (0x2), region = 68 }

// kernel: _lambda_.70
= control target key start
LH: loop header
LB: loop body
LE: loop exit
PB: predicated region body
PF: predicated region fallthrough
CT: control target
= control target key end

     0   :  { %s989_s12 = smov 0   ;;  %s991_s13 = smov 0   ;;  %s1101_s0 = inlined_call_operand.vmem [shape: f32[2,8,32], index: 0, kind: input, shape index: {}]   ;;  %s1102_s1 = inlined_call_operand.vmem [shape: f32[2,8,64], index: 1, kind: input, shape index: {}]   ;;  %s1103_s2 = inlined_call_operand.vmem [shape: f32[1,8,8], index: 2, kind: input, shape index: {}]   ;;  %s1104_s3 = inlined_call_operand.vmem [shape: f32[2,8,32], index: 3, kind: output, shape index: {}]  }
   0x1   :  { %s993_s14 = smov 0  }
   0x2 LB: > { %s25_s15 = sadd.s32 1, %s951_s13  ;;  %p803_p0 = scmp.ge.s32.totalorder %s955_s14, 1  ;;  %s955_s14 = sphi %s993_s14, %s13_s14   ;;  %s951_s13 = sphi %s991_s13, %s1106_s13   ;;  %s947_s12 = sphi %s989_s12, %s1105_s12  }
   0x3   : > { %p27_p1 = scmp.ge.s32.totalorder %s25_s15, 2  ;;  %p173_p2 = scmp.lt.s32.totalorder %s955_s14, 3 }
   0x5   : > { %s1108_s15 = smov (%p27_p1, %s25_s15), 0  ;;  %p174_p3 = pnand %p803_p0, %p173_p2 }
   0x6   : > { %p209_p4 = scmp.lt.s32.totalorder (!%p174_p3), %s947_s12, 1  ;;  %v957_v0 = vmov (!%p174_p3), 0.0   ;;  %vm958_vm0 = vmmov (!%p174_p3), 0   ;;  %vm237_vm1 = vcmask (!%p174_p3), 64512   ;;  %v1034_v6 = vld [vmem:[%s1103_s2] sm:$0xff] (!%p174_p3)  ;;  %s959_s25 = smov (!%p174_p3), 96  }
   0x7   : > { %177 = sbr.rel (%p174_p3) target bundleno = 1442 (0x5a2), region = 32  ;;  %833 = vmatprep.subr.bf16.mxu0 (!%p174_p3), %v957_v0  ;;  %835 = vmatprep.mubr.msk.bf16.mxu0 (!%p174_p3), %vm958_vm0, %v957_v0  ;;  %s960_s26 = smov (!%p174_p3), 120   ;;  %vm302_vm2 = vcmask (!%p174_p3), 1043456   ;;  %vm690_vm3 = vcmask (!%p174_p3), 130048   ;;  %vm692_vm4 = vcmask (!%p174_p3), 195584   ;;  %vm694_vm5 = vcmask (!%p174_p3), 261120  }
   0x8   : > { %839 = vmatprep.subr.bf16.mxu1 (!%p174_p3), %v957_v0  ;;  %841 = vmatprep.mubr.msk.bf16.mxu1 (!%p174_p3), %vm958_vm0, %v957_v0  ;;  %s961_s27 = smov (!%p174_p3), 112   ;;  %s962_s28 = smov (!%p174_p3), 104  }
   0x9   : > { %s963_s29 = smov (!%p174_p3), 88   ;;  %s964_s30 = smov (!%p174_p3), 72  }
   0xa   : > { %s965_s4 = smov (!%p174_p3), 80   ;;  %s966_s5 = smov (!%p174_p3), 8  }
   0xb   : > { %s967_s6 = smov (!%p174_p3), 16   ;;  %s968_s7 = smov (!%p174_p3), 24  }
   0xe   : > { %s1110_s12 = smov (!%p209_p4, %s947_s12), 1 }
   0xf   : > { %s1013_s16 = sshll.u32 %s1110_s12, 3 }
  0x10   : > { %s219_s19 = scalar_lea.vmem %s1102_s1, %s1013_s16  ;;  %s215_s22 = scalar_lea.vmem %s1101_s0, %s1013_s16 }
  0x11   : > { %v233_v1 = vld [vmem:[%s219_s19] sm:$0xff]  ;;  %s230_s10 = scalar_lea.vmem %s1104_s3, %s1013_s16 }
  0x12   : > { %v1019_v2 = vpack.c.bf16 %v233_v1, %v233_v1  ;;  %v232_v4 = vld [vmem:[%s215_s22] sm:$0xff] }
  0x13   : > { %v235_v5 = vpack.c.bf16 %v232_v4, %v232_v4 }
  0x14   : > { %v242_v3 = vsel %vm237_vm1, %v1019_v2, 0  ;;  %297 = vrot.lane.b32.xlu1 %v1019_v2, %s959_s25 }
  0x15   : > { %834 = vmatpush3.bf16.xpose.msra.mxu0 %v242_v3 }
  0x16   : > { %851 = vmatprep.subr.bf16.mxu0 %v957_v0 }
  0x18   : > { %349 = vrot.lane.b32.xlu1 %v1019_v2, %s960_s26 }
  0x1c   : > { %836 = vmatmul.mubr.msk.bf16.vlgmr.msra.gmra.mrb[0].mxu0 %vm237_vm1, %v235_v5  ;;  %459 = vrot.lane.b32.xlu1 %v1019_v2, %s961_s27 }
  0x1d   : > { %853 = vmatprep.mubr.msk.bf16.mxu0 %vm958_vm0, %v957_v0 }
  0x20   : > { %457 = vrot.lane.b32.xlu1 %v235_v5, %s961_s27 }
  0x24   : > { %569 = vrot.lane.b32.xlu1 %v1019_v2, %s962_s28 }
  0x28   : > { %567 = vrot.lane.b32.xlu1 %v235_v5, %s962_s28 }
  0x86   : > { %v298_v18 = vpop.permute.xlu1 %297 }
  0x87   : > { %v304_v19 = vsel %vm302_vm2, %v298_v18, 0 }
  0x88   : > { %840 = vmatpush3.bf16.msra.mxu1 %v304_v19 }
  0x89   : > { %845 = vmatprep.subr.bf16.mxu1 %v957_v0 }
  0x8a   : > { %v350_v22 = vpop.permute.xlu1 %349 }
  0x8b   : > { %v355_v24 = vsel %vm237_vm1, %v350_v22, 0 }
  0x8e   : > { %v460_v26 = vpop.permute.xlu1 %459 }
  0x8f   : > { %v465_v29 = vsel %vm237_vm1, %v460_v26, 0 }
  0x92   : > { %v458_v28 = vpop.permute.xlu1 %457 }
  0x96   : > { %v570_v30 = vpop.permute.xlu1 %569 }
  0x97   : > { %v575_v31 = vsel %vm237_vm1, %v570_v30, 0 }
  0x9a   : > { %v568_v32 = vpop.permute.xlu1 %567 }
  0xef   : > { %v278_v7 = vpop.f32.mrb[0].mxu0 }
  0xf0   : > { %v279_v8 = vadd.f32 %v278_v7, %v1034_v6  ;;  %v837_v9 = vpop.f32.mrb[1].mxu0 }
  0xf1   : > { %v281_v10 = vpop.f32.mrb[2].mxu0 }
  0xf2   : > { %v838_v11 = vpop.f32.mrb[3].mxu0  ;;  %v284_v12 = vsel %vm237_vm1, %v279_v8, -inf }
  0xf3   : > { %285 = vmax.xlane.f32.xlu0 %v284_v12 }
 0x180   : > { %v286_v13 = vpop.xlane.xlu0 %285 }
 0x181   : > { %v287_v14 = vsub.f32 %v279_v8, %v286_v13 }
 0x183   : > { %v288_v15 = vmul.f32 1.442695, %v287_v14 }
 0x185   : > { %917 = vpow2.f32 %v288_v15 }
 0x18f   : > { %v918_v16 = vpop.eup %917 }
 0x190   : > { %v290_v17 = vsel %vm237_vm1, %v918_v16, 0.0 }
 0x191   : > { %291 = vadd.xlane.f32.xlu0 %v290_v17 }
 0x1a7   : > { %347 = vrot.lane.b32.xlu0 %v235_v5, %s960_s26 }
 0x21e   : > { %v292_v20 = vpop.xlane.xlu0 %291 }
 0x21f   : > { %919 = vrcp.f32 %v292_v20 }
 0x222   : > { %v348_v27 = vpop.permute.xlu0 %347 }
 0x229   : > { %v920_v21 = vpop.eup %919 }
 0x22a   : > { %v294_v23 = vmul.f32 %v920_v21, %v918_v16 }
 0x22c   : > { %v295_v25 = vpack.c.bf16 %v294_v23, %v294_v23 }
 0x22e   : > { %842 = vmatmul.mubr.msk.bf16.vlgmr.msra.gmra.mrb[0].mxu1 %vm237_vm1, %v295_v25 }
 0x22f   : > { %846 = vmatpush3.bf16.xpose.msra.mxu1 %v355_v24  ;;  %847 = vmatprep.mubr.msk.bf16.mxu1 %vm958_vm0, %v957_v0 }
 0x230   : > { %857 = vmatprep.subr.bf16.mxu1 %v957_v0 }
 0x236   : > { %848 = vmatmul.mubr.msk.bf16.vlgmr.msra.gmra.mrb[4].mxu1 %vm237_vm1, %v348_v27 }
 0x237   : > { %858 = vmatpush3.bf16.xpose.msra.mxu1 %v465_v29  ;;  %859 = vmatprep.mubr.msk.bf16.mxu1 %vm958_vm0, %v957_v0 }
 0x238   : > { %869 = vmatprep.subr.bf16.mxu1 %v957_v0 }
 0x23e   : > { %860 = vmatmul.mubr.msk.bf16.vlgmr.msra.gmra.mrb[8].mxu1 %vm237_vm1, %v458_v28 }
 0x23f   : > { %870 = vmatpush3.bf16.xpose.msra.mxu1 %v575_v31  ;;  %871 = vmatprep.mubr.msk.bf16.mxu1 %vm958_vm0, %v957_v0 }
 0x246   : > { %872 = vmatmul.mubr.msk.bf16.vlgmr.msra.gmra.mrb[12].mxu1 %vm237_vm1, %v568_v32 }
 0x301   : > { %v1060_v33 = vpop.f32.mrb[0].mxu1 }
 0x302   : > { %v843_v34 = vpop.f32.mrb[1].mxu1 }
 0x303   : > { %v343_v35 = vpop.f32.mrb[2].mxu1 }
 0x304   : > { %v844_v36 = vpop.f32.mrb[3].mxu1 }
 0x309   : > { %v391_v37 = vpop.f32.mrb[4].mxu1 }
 0x30a   : > { %v392_v38 = vadd.f32 %v391_v37, %v1034_v6  ;;  %v849_v39 = vpop.f32.mrb[5].mxu1 }
 0x30b   : > { %v394_v40 = vpop.f32.mrb[6].mxu1 }
 0x30c   : > { %v850_v41 = vpop.f32.mrb[7].mxu1  ;;  %v397_v42 = vsel %vm237_vm1, %v392_v38, -inf }
 0x30d   : > { %398 = vmax.xlane.f32.xlu1 %v397_v42 }
 0x311   : > { %v501_v43 = vpop.f32.mrb[8].mxu1 }
 0x312   : > { %v502_v44 = vadd.f32 %v501_v43, %v1034_v6  ;;  %v861_v45 = vpop.f32.mrb[9].mxu1 }
 0x313   : > { %v504_v46 = vpop.f32.mrb[10].mxu1 }
 0x314   : > { %v862_v47 = vpop.f32.mrb[11].mxu1  ;;  %v507_v48 = vsel %vm237_vm1, %v502_v44, -inf }
 0x315   : > { %508 = vmax.xlane.f32.xlu0 %v507_v48 }
 0x319   : > { %v611_v49 = vpop.f32.mrb[12].mxu1 }
 0x31a   : > { %v612_v50 = vadd.f32 %v611_v49, %v1034_v6  ;;  %v873_v51 = vpop.f32.mrb[13].mxu1 }
 0x31b   : > { %v614_v52 = vpop.f32.mrb[14].mxu1 }
 0x31c   : > { %v874_v53 = vpop.f32.mrb[15].mxu1  ;;  %v617_v54 = vsel %vm237_vm1, %v612_v50, -inf }
 0x31d   : > { %618 = vmax.xlane.f32.xlu1 %v617_v54 }
 0x32e   : > { %409 = vrot.lane.b32.xlu1 %v1019_v2, %s963_s29 }
 0x39a   : > { %v399_v55 = vpop.xlane.xlu1 %398 }
 0x39b   : > { %v400_v56 = vsub.f32 %v392_v38, %v399_v55 }
 0x39d   : > { %v401_v57 = vmul.f32 1.442695, %v400_v56 }
 0x39f   : > { %921 = vpow2.f32 %v401_v57 }
 0x3a2   : > { %v509_v58 = vpop.xlane.xlu0 %508 }
 0x3a3   : > { %v510_v59 = vsub.f32 %v502_v44, %v509_v58 }
 0x3a5   : > { %v511_v60 = vmul.f32 1.442695, %v510_v59 }
 0x3a7   : > { %923 = vpow2.f32 %v511_v60 }
 0x3a9   : > { %v922_v61 = vpop.eup %921 }
 0x3aa   : > { %v619_v62 = vpop.xlane.xlu1 %618  ;;  %v403_v63 = vsel %vm237_vm1, %v922_v61, 0.0 }
 0x3ab   : > { %v620_v1 = vsub.f32 %v612_v50, %v619_v62  ;;  %404 = vadd.xlane.f32.xlu0 %v403_v63 }
 0x3ad   : > { %v621_v3 = vmul.f32 1.442695, %v620_v1 }
 0x3ae   : > { %v410_v4 = vpop.permute.xlu1 %409 }
 0x3af   : > { %925 = vpow2.f32 %v621_v3  ;;  %v415_v5 = vsel %vm302_vm2, %v410_v4, 0 }
 0x3b0   : > { %852 = vmatpush3.bf16.msra.mxu0 %v415_v5 }
 0x3b1   : > { %v924_v6 = vpop.eup %923  ;;  %863 = vmatprep.subr.bf16.mxu0 %v957_v0 }
 0x3b2   : > { %v513_v7 = vsel %vm237_vm1, %v924_v6, 0.0 }
 0x3b3   : > { %514 = vadd.xlane.f32.xlu1 %v513_v7 }
 0x3b9   : > { %v926_v8 = vpop.eup %925 }
 0x3ba   : > { %v623_v9 = vsel %vm237_vm1, %v926_v8, 0.0 }
 0x3bb   : > { %624 = vadd.xlane.f32.xlu0 %v623_v9 }
 0x3c4   : > { %629 = vrot.lane.b32.xlu1 %v1019_v2, %s964_s30 }
 0x3d1   : > { %519 = vrot.lane.b32.xlu0 %v1019_v2, %s965_s4 }
 0x438   : > { %v405_v10 = vpop.xlane.xlu0 %404 }
 0x439   : > { %927 = vrcp.f32 %v405_v10 }
 0x440   : > { %v515_v11 = vpop.xlane.xlu1 %514 }
 0x441   : > { %929 = vrcp.f32 %v515_v11 }
 0x443   : > { %v928_v12 = vpop.eup %927 }
 0x444   : > { %v407_v13 = vmul.f32 %v928_v12, %v922_v61  ;;  %v630_v19 = vpop.permute.xlu1 %629 }
 0x445   : > { %v635_v21 = vsel %vm302_vm2, %v630_v19, 0 }
 0x446   : > { %v408_v14 = vpack.c.bf16 %v407_v13, %v407_v13 }
 0x448   : > { %v625_v15 = vpop.xlane.xlu0 %624  ;;  %854 = vmatmul.mubr.msk.bf16.vlgmr.msra.gmra.mrb[4].mxu0 %vm237_vm1, %v408_v14 }
 0x449   : > { %931 = vrcp.f32 %v625_v15  ;;  %865 = vmatprep.mubr.msk.bf16.mxu0 %vm958_vm0, %v957_v0 }
 0x44b   : > { %v930_v16 = vpop.eup %929 }
 0x44c   : > { %v517_v17 = vmul.f32 %v930_v16, %v924_v6  ;;  %v520_v18 = vpop.permute.xlu0 %519 }
 0x44d   : > { %v525_v2 = vsel %vm302_vm2, %v520_v18, 0 }
 0x44e   : > { %864 = vmatpush3.bf16.msra.mxu0 %v525_v2  ;;  %v518_v20 = vpack.c.bf16 %v517_v17, %v517_v17 }
 0x44f   : > { %875 = vmatprep.subr.bf16.mxu0 %v957_v0 }
 0x451   : > { %866 = vmatmul.mubr.msk.bf16.vlgmr.msra.gmra.mrb[8].mxu0 %vm237_vm1, %v518_v20 }
 0x452   : > { %876 = vmatpush3.bf16.msra.mxu0 %v635_v21  ;;  %877 = vmatprep.mubr.msk.bf16.mxu0 %vm958_vm0, %v957_v0 }
 0x453   : > { %v932_v22 = vpop.eup %931 }
 0x454   : > { %v627_v23 = vmul.f32 %v932_v22, %v926_v8 }
 0x456   : > { %v628_v24 = vpack.c.bf16 %v627_v23, %v627_v23 }
 0x459   : > { %878 = vmatmul.mubr.msk.bf16.vlgmr.msra.gmra.mrb[12].mxu0 %vm237_vm1, %v628_v24 }
 0x51b   : > { %v451_v25 = vpop.f32.mrb[4].mxu0 }
 0x51c   : > { %678 = vrot.lane.b32.xlu1 %v451_v25, %s966_s5  ;;  %v855_v26 = vpop.f32.mrb[5].mxu0 }
 0x51d   : > { %v454_v27 = vpop.f32.mrb[6].mxu0 }
 0x51e   : > { %v856_v28 = vpop.f32.mrb[7].mxu0 }
 0x524   : > { %v561_v29 = vpop.f32.mrb[8].mxu0 }
 0x525   : > { %682 = vrot.lane.b32.xlu0 %v561_v29, %s967_s6  ;;  %v867_v30 = vpop.f32.mrb[9].mxu0 }
 0x526   : > { %v564_v31 = vpop.f32.mrb[10].mxu0 }
 0x527   : > { %v868_v32 = vpop.f32.mrb[11].mxu0 }
 0x52c   : > { %v671_v34 = vpop.f32.mrb[12].mxu0 }
 0x52d   : > { %686 = vrot.lane.b32.xlu1 %v671_v34, %s968_s7  ;;  %v879_v0 = vpop.f32.mrb[13].mxu0 }
 0x52e   : > { %v674_v35 = vpop.f32.mrb[14].mxu0 }
 0x52f   : > { %v880_v36 = vpop.f32.mrb[15].mxu0 }
 0x58e   : > { %v679_v37 = vpop.permute.xlu1 %678 }
 0x58f   : > { %v689_v39 = vsel %vm237_vm1, %v1060_v33, %v679_v37 }
 0x597   : > { %v683_v38 = vpop.permute.xlu0 %682 }
 0x598   : > { %v691_v40 = vsel %vm690_vm3, %v689_v39, %v683_v38 }
 0x59f   : > { %v687_v41 = vpop.permute.xlu1 %686 }
 0x5a0   : > { %v693_v42 = vsel %vm692_vm4, %v691_v40, %v687_v41 }
 0x5a1   : > { %695 = vst.msk [vmem:[%s230_s10] sm:$0xff] %vm694_vm5, %v693_v42 }
 0x5a2 PF: > { %s13_s14 = sadd.s32 1, %s955_s14   ;;  %s1105_s12 = smov %s951_s13 }
 0x5a3   : > { %p10_p5 = scmp.ge.s32.totalorder %s13_s14, 4   ;;  %s1106_s13 = smov %s1108_s15 }
 0x5a5   :  { %12 = sbr.rel (!%p10_p5) target bundleno = 2 (0x2), region = 68 }

// kernel: _lambda_.94
= control target key start
LH: loop header
LB: loop body
LE: loop exit
PB: predicated region body
PF: predicated region fallthrough
CT: control target
= control target key end

     0   :  { %v165_v0 = vmov 0.0   ;;  %vm36_vm0 = vcmask 261120   ;;  %vm166_vm1 = vmmov 0   ;;  %vm103_vm2 = vcmask 785408   ;;  %s257_s1 = inlined_call_operand.vmem [shape: f32[96,32], index: 1, kind: input, shape index: {}]   ;;  %s258_s0 = inlined_call_operand.vmem [shape: f32[16,32], index: 0, kind: input, shape index: {}]   ;;  %s259_s3 = inlined_call_operand.vmem [shape: f32[16,96], index: 3, kind: output, shape index: {}]   ;;  %s260_s2 = inlined_call_operand.vmem [shape: f32[1,96], index: 2, kind: input, shape index: {}]  }
   0x1   :  { %147 = vmatprep.subr.bf16.mxu0 %v165_v0  ;;  %v18_v1 = vld [vmem:[%s257_s1] sm:$0xff]  ;;  %v19_v2 = vld [vmem:[%s257_s1 + $0x8] sm:$0xff]  ;;  %159 = vmatprep.mubr.msk.bf16.mxu0 %vm166_vm1, %v165_v0  ;;  %v20_v4 = vld [vmem:[%s257_s1 + $0x10] sm:$0xff] }
   0x2   :  { %v30_v3 = vpack.c.bf16 %v19_v2, %v18_v1  ;;  %v21_v5 = vld [vmem:[%s257_s1 + $0x18] sm:$0xff]  ;;  %v22_v9 = vld [vmem:[%s257_s1 + $0x20] sm:$0xff]  ;;  %v23_v10 = vld [vmem:[%s257_s1 + $0x28] sm:$0xff] }
   0x3   :  { %v31_v7 = vpack.c.bf16 %v21_v5, %v20_v4  ;;  %v32_v11 = vpack.c.bf16 %v23_v10, %v22_v9  ;;  %v24_v13 = vld [vmem:[%s257_s1 + $0x30] sm:$0xff]  ;;  %v25_v14 = vld [vmem:[%s257_s1 + $0x38] sm:$0xff]  ;;  %v26_v17 = vld [vmem:[%s257_s1 + $0x40] sm:$0xff] }
   0x4   :  { %v41_v6 = vsel %vm36_vm0, %v30_v3, 0  ;;  %v33_v15 = vpack.c.bf16 %v25_v14, %v24_v13  ;;  %v27_v18 = vld [vmem:[%s257_s1 + $0x48] sm:$0xff]  ;;  %v28_v21 = vld [vmem:[%s257_s1 + $0x50] sm:$0xff]  ;;  %v29_v22 = vld [vmem:[%s257_s1 + $0x58] sm:$0xff] }
   0x5   :  { %148 = vmatpush3.bf16.xpose.msra.mxu0 %v41_v6  ;;  %v44_v8 = vsel %vm36_vm0, %v31_v7, 0  ;;  %v47_v12 = vsel %vm36_vm0, %v32_v11, 0  ;;  %v34_v19 = vpack.c.bf16 %v27_v18, %v26_v17  ;;  %v35_v23 = vpack.c.bf16 %v29_v22, %v28_v21  ;;  %v15_v25 = vld [vmem:[%s258_s0] sm:$0xff]  ;;  %v16_v26 = vld [vmem:[%s258_s0 + $0x8] sm:$0xff] }
   0x6   :  { %149 = vmatprep.subr.bf16.mxu0 %v165_v0  ;;  %v50_v16 = vsel %vm36_vm0, %v33_v15, 0  ;;  %v17_v27 = vpack.c.bf16 %v16_v26, %v15_v25  ;;  %v139_v32 = vld [vmem:[%s260_s2] ss:$0 sm:$0xff] }
   0x7   :  { %v53_v20 = vsel %vm36_vm0, %v34_v19, 0  ;;  %v56_v24 = vsel %vm36_vm0, %v35_v23, 0 }
   0xd   :  { %150 = vmatpush3.bf16.xpose.msra.mxu0 %v44_v8 }
   0xe   :  { %151 = vmatprep.subr.bf16.mxu0 %v165_v0 }
  0x15   :  { %152 = vmatpush3.bf16.xpose.msra.mxu0 %v47_v12 }
  0x16   :  { %153 = vmatprep.subr.bf16.mxu0 %v165_v0 }
  0x1d   :  { %154 = vmatpush3.bf16.xpose.msra.mxu0 %v50_v16 }
  0x1e   :  { %155 = vmatprep.subr.bf16.mxu0 %v165_v0 }
  0x25   :  { %156 = vmatpush3.bf16.xpose.msra.mxu0 %v53_v20 }
  0x26   :  { %157 = vmatprep.subr.bf16.mxu0 %v165_v0 }
  0x2d   :  { %158 = vmatpush3.bf16.xpose.msra.mxu0 %v56_v24 }
  0x34   :  { %160 = vmatmul.mubr.msk.bf16.vlgmr.msra.gmra.mrb[0].mxu0 %vm36_vm0, %v17_v27 }
 0x107   :  { %v92_v28 = vpop.f32.mrb[0].mxu0 }
 0x108   :  { %104 = vst.msk [vmem:[%s259_s3] sm:$0xff] %vm103_vm2, %v92_v28  ;;  %v161_v29 = vpop.f32.mrb[1].mxu0 }
 0x109   :  { %v95_v30 = vpop.f32.mrb[2].mxu0 }
 0x10a   :  { %105 = vst.msk [vmem:[%s259_s3 + $0x8] sm:$0xff] %vm103_vm2, %v95_v30  ;;  %v162_v31 = vpop.f32.mrb[3].mxu0 }
 0x10f   :  { %v120_v33 = vld [vmem:[%s259_s3] sm:$0xff] }
 0x110   :  { %v129_v34 = vadd.f32 %v139_v32, %v120_v33 }
 0x111   :  { %v121_v35 = vld [vmem:[%s259_s3 + $0x8] sm:$0xff] }
 0x112   :  { %132 = vst.msk [vmem:[%s259_s3] sm:$0xff] %vm103_vm2, %v129_v34  ;;  %v130_v36 = vadd.f32 %v139_v32, %v121_v35 }
 0x114   :  { %133 = vst.msk [vmem:[%s259_s3 + $0x8] sm:$0xff] %vm103_vm2, %v130_v36 }

// kernel: _lambda_.95
= control target key start
LH: loop header
LB: loop body
LE: loop exit
PB: predicated region body
PF: predicated region fallthrough
CT: control target
= control target key end

     0   :  { %v34_v0 = vlaneseq  ;;  %s272_s0 = inlined_call_operand.vmem [shape: f32[16,96], index: 0, kind: input, shape index: {}]   ;;  %s273_s1 = inlined_call_operand.vmem [shape: s32[16,1], index: 1, kind: input, shape index: {}]   ;;  %s274_s2 = inlined_call_operand.hbm [shape: f32[1,1], index: 2, kind: output, shape index: {}]  }
   0x1   :  { %7 = vsyncpa [#allocation6], 0  ;;  %v30_v1 = vld [vmem:[%s272_s0] sm:$0xff]  ;;  %v31_v3 = vld [vmem:[%s272_s0 + $0x8] sm:$0xff]  ;;  %vm42_vm0 = vcmask 785408   ;;  %vm23_vm2 = vcmask 7168  }
   0x2   :  { %v35_v2 = vand.u32 127, %v34_v0  ;;  %v206_v8 = vmov -1e+30   ;;  %v207_v9 = vmov 0   ;;  %v208_v10 = vmov 0.0   ;;  %v32_v11 = vld [vmem:[%s273_s1] sm:$0xff] }
   0x3   :  { %24 = vst.msk [vmem:[#allocation2] sm:$0xff] %vm23_vm2, %v206_v8  ;;  %25 = vst.msk [vmem:[#allocation2 + $0x8] sm:$0xff] %vm23_vm2, %v206_v8  ;;  %168 = vset.pattern.permute.xlu1 %v207_v9  ;;  %169 = vset.pattern.permute.xlu0 %v207_v9  ;;  %v33_v20 = vld [vmem:[%s273_s1 + $0x8] sm:$0xff]  ;;  %vm18_vm5 = vcmask 0   ;;  %s209_s1 = smov [#allocation5]  }
   0x4   :  { %vm39_vm1 = vcmp.lt.s32.totalorder %v35_v2, 96  ;;  %26 = vst.msk [vmem:[#allocation3] sm:$0xff] %vm23_vm2, %v208_v10  ;;  %27 = vst.msk [vmem:[#allocation3 + $0x8] sm:$0xff] %vm23_vm2, %v208_v10  ;;  %s156_s16 = sshll.u32 %s209_s1, 4  ;;  %s157_s16 = int_to_ptr.vmem [resolvable:$true] %s156_s16 }
   0x5   :  { %v40_v4 = vsel %vm39_vm1, %v30_v1, -1e+09  ;;  %v41_v5 = vsel %vm39_vm1, %v31_v3, -1e+09  ;;  %28 = vst.msk [vmem:[#allocation4] sm:$0xff] %vm23_vm2, %v208_v10  ;;  %29 = vst.msk [vmem:[#allocation4 + $0x8] sm:$0xff] %vm23_vm2, %v208_v10  ;;  %p187_p1 = scmp.lt.s32.totalorder %s157_s16, %s157_s16 }
   0x6   :  { %v43_v6 = vsel %vm42_vm0, %v40_v4, -inf  ;;  %v46_v7 = vsel %vm42_vm0, %v41_v5, -inf  ;;  %19 = vst.msk [vmem:[#allocation5] sm:$0x1] %vm18_vm5, %v208_v10  ;;  %s182_s17 = scalar_lea.vmem %s157_s16, 16  ;;  %s186_s18 = scalar_lea.vmem %s157_s16, 32 }
   0x7   :  { %44 = vmax.xlane.f32.xlu0 %v43_v6  ;;  %p183_p0 = scmp.ne.s32.totalorder %s157_s16, %s182_s17  ;;  %p188_p2 = scmp.lt.s32.totalorder %s186_s18, %s182_s17 }
   0x9   :  { %p189_p3 = por %p188_p2, %p187_p1 }
   0xa   :  { %v49_v12 = vld [vmem:[#allocation2] sm:$0xff]  ;;  %v50_v15 = vld [vmem:[#allocation2 + $0x8] sm:$0xff] }
   0xb   :  { %47 = vmax.xlane.f32.xlu0 %v46_v7  ;;  %v53_v43 = vld [vmem:[#allocation3] sm:$0xff]  ;;  %v54_v47 = vld [vmem:[#allocation3 + $0x8] sm:$0xff]  ;;  %p190_p4 = pnand %p189_p3, %p183_p0 }
   0xc   :  { %v92_v37 = vld [vmem:[#allocation4] sm:$0xff]  ;;  %v93_v52 = vld [vmem:[#allocation4 + $0x8] sm:$0xff] }
  0x21   :  { %95 = vperm.xlu0 %169, %v32_v11  }
  0x94   :  { %v45_v13 = vpop.xlane.xlu0 %44 }
  0x95   :  { %v51_v14 = vmax.f32 %v49_v12, %v45_v13  ;;  %v127_v13 = vld [vmem:[#allocation5] sm:$0x1] }
  0x97   :  { %v55_v16 = vsub.f32 %v49_v12, %v51_v14  ;;  %90 = vst.msk [vmem:[#allocation2] sm:$0xff] %vm23_vm2, %v51_v14  ;;  %65 = vperm.xlu1 %168, %v51_v14  }
  0x98   :  { %v48_v17 = vpop.xlane.xlu0 %47 }
  0x99   :  { %v52_v18 = vmax.f32 %v50_v15, %v48_v17  ;;  %v57_v40 = vmul.f32 1.442695, %v55_v16 }
  0x9b   :  { %v56_v19 = vsub.f32 %v50_v15, %v52_v18  ;;  %91 = vst.msk [vmem:[#allocation2 + $0x8] sm:$0xff] %vm23_vm2, %v52_v18  ;;  %70 = vperm.xlu1 %168, %v52_v18  }
  0x9d   :  { %v59_v41 = vmul.f32 1.442695, %v56_v19 }
  0x9e   :  { %v123_v59 = vld [vmem:[#allocation2] sm:$0xff] }
  0x9f   :  { %98 = vperm.xlu1 %168, %v33_v20  }
  0xa0   :  { %v96_v21 = vpop.permute.xlu0 %95 }
  0xa1   :  { %vm100_vm3 = vcmp.eq.s32.totalorder %v35_v2, %v96_v21 }
  0xa2   :  { %v102_v22 = vsel %vm100_vm3, %v40_v4, 0.0  ;;  %v124_v0 = vld [vmem:[#allocation2 + $0x8] sm:$0xff] }
  0xa3   :  { %v104_v23 = vsel %vm42_vm0, %v102_v22, 0.0 }
  0xa4   :  { %105 = vadd.xlane.f32.xlu0 %v104_v23 }
 0x116   :  { %v66_v24 = vpop.permute.xlu1 %65 }
 0x117   :  { %v73_v25 = vsub.f32 %v40_v4, %v66_v24 }
 0x119   :  { %v75_v26 = vmul.f32 1.442695, %v73_v25 }
 0x11a   :  { %v71_v27 = vpop.permute.xlu1 %70 }
 0x11b   :  { %170 = vpow2.f32 %v75_v26  ;;  %v74_v28 = vsub.f32 %v41_v5, %v71_v27 }
 0x11d   :  { %v77_v29 = vmul.f32 1.442695, %v74_v28 }
 0x11e   :  { %v99_v31 = vpop.permute.xlu1 %98 }
 0x11f   :  { %172 = vpow2.f32 %v77_v29  ;;  %vm101_vm4 = vcmp.eq.s32.totalorder %v35_v2, %v99_v31 }
 0x120   :  { %v103_v35 = vsel %vm101_vm4, %v41_v5, 0.0  ;;  %174 = vpow2.f32 %v57_v40 }
 0x121   :  { %v107_v36 = vsel %vm42_vm0, %v103_v35, 0.0  ;;  %176 = vpow2.f32 %v59_v41 }
 0x125   :  { %v171_v30 = vpop.eup %170 }
 0x126   :  { %v79_v32 = vsel %vm42_vm0, %v171_v30, 0.0 }
 0x127   :  { %80 = vadd.xlane.f32.xlu1 %v79_v32 }
 0x129   :  { %v173_v33 = vpop.eup %172 }
 0x12a   :  { %v82_v34 = vsel %vm42_vm0, %v173_v33, 0.0  ;;  %v175_v42 = vpop.eup %174 }
 0x12b   :  { %83 = vadd.xlane.f32.xlu1 %v82_v34  ;;  %v61_v44 = vmul.f32 %v175_v42, %v53_v43  ;;  %v177_v45 = vpop.eup %176 }
 0x12c   :  { %v62_v49 = vmul.f32 %v177_v45, %v54_v47 }
 0x12f   :  { %108 = vadd.xlane.f32.xlu1 %v107_v36 }
 0x131   :  { %v106_v38 = vpop.xlane.xlu0 %105 }
 0x132   :  { %v110_v39 = vadd.f32 %v106_v38, %v92_v37 }
 0x134   :  { %112 = vst.msk [vmem:[#allocation4] sm:$0xff] %vm23_vm2, %v110_v39 }
 0x13b   :  { %v128_v62 = vld [vmem:[#allocation4] sm:$0xff] }
 0x1b4   :  { %v81_v46 = vpop.xlane.xlu1 %80 }
 0x1b5   :  { %v85_v48 = vadd.f32 %v81_v46, %v61_v44 }
 0x1b7   :  { %88 = vst.msk [vmem:[#allocation3] sm:$0xff] %vm23_vm2, %v85_v48 }
 0x1b8   :  { %v84_v50 = vpop.xlane.xlu1 %83 }
 0x1b9   :  { %v86_v51 = vadd.f32 %v84_v50, %v62_v49 }
 0x1bb   :  { %89 = vst.msk [vmem:[#allocation3 + $0x8] sm:$0xff] %vm23_vm2, %v86_v51 }
 0x1bc   :  { %v109_v53 = vpop.xlane.xlu1 %108 }
 0x1bd   :  { %v111_v54 = vadd.f32 %v109_v53, %v93_v52 }
 0x1be   :  { %v117_v55 = vld [vmem:[#allocation3] sm:$0xff] }
 0x1bf   :  { %113 = vst.msk [vmem:[#allocation4 + $0x8] sm:$0xff] %vm23_vm2, %v111_v54  ;;  %178 = vlog2.f32 %v117_v55 }
 0x1c2   :  { %v118_v56 = vld [vmem:[#allocation3 + $0x8] sm:$0xff] }
 0x1c3   :  { %180 = vlog2.f32 %v118_v56 }
 0x1c6   :  { %v129_v3 = vld [vmem:[#allocation4 + $0x8] sm:$0xff] }
 0x1c9   :  { %v179_v57 = vpop.eup %178 }
 0x1ca   :  { %v120_v58 = vmul.f32 0.6931472, %v179_v57 }
 0x1cc   :  { %v125_v60 = vadd.f32 %v123_v59, %v120_v58 }
 0x1cd   :  { %v181_v61 = vpop.eup %180 }
 0x1ce   :  { %v122_v63 = vmul.f32 0.6931472, %v181_v61  ;;  %v130_v2 = vsub.f32 %v125_v60, %v128_v62 }
 0x1d0   :  { %v126_v1 = vadd.f32 %v124_v0, %v122_v63  ;;  %v132_v5 = vsel %vm23_vm2, %v130_v2, 0.0 }
 0x1d2   :  { %v131_v4 = vsub.f32 %v126_v1, %v129_v3 }
 0x1d4   :  { %v133_v6 = vsel %vm23_vm2, %v131_v4, 0.0 }
 0x1d5   :  { %v134_v7 = vadd.f32 %v133_v6, %v132_v5 }
 0x1d7   :  { %v135_v8 = vrot.slane %v134_v7, 4 }
 0x1d9   :  { %v136_v9 = vadd.f32 %v135_v8, %v134_v7 }
 0x1db   :  { %v137_v10 = vrot.slane %v136_v9, 2 }
 0x1dd   :  { %v138_v11 = vadd.f32 %v137_v10, %v136_v9 }
 0x1df   :  { %v139_v12 = vrot.slane %v138_v11, 1 }
 0x1e1   :  { %v140_v14 = vadd.f32 %v139_v12, %v138_v11 }
 0x1e3   :  { %v141_v15 = vadd.f32 %v140_v14, %v127_v13 }
 0x1e5   :  { %143 = vst.msk [vmem:[#allocation5] sm:$0x1] %vm18_vm5, %v141_v15 }
 0x1ec   :  { %v146_v16 = vld [vmem:[#allocation5] sm:$0x1] }
 0x1ed   :  { %v147_v17 = vmul.f32 0.0625, %v146_v16 }
 0x1ef   :  { %149 = vst.msk [vmem:[#allocation5] sm:$0x1] %vm18_vm5, %v147_v17 }
 0x1f0   :  { %193 = shalt.err (!%p190_p4)
}
 0x1f1   :  { %s194_s21 = scalar_lea.hbm %s274_s2, 16 }
 0x1f2   :  { %p195_p5 = scmp.ne.s32.totalorder %s274_s2, %s194_s21  ;;  %p198_p6 = scmp.lt.u32.totalorder %s194_s21, %s274_s2 }
 0x1f4   :  { %p200_p7 = pnand %p198_p6, %p195_p5 }
 0x1f6   :  { %203 = shalt.err (!%p200_p7)
}
 0x1f7   :  { %159 = dma.vmem_to_hbm [thread:$0]  %s157_s16, 16, %s274_s2, [#allocation6]  }
 0x1f8   :  { %204 = dma.done.wait [#allocation6], 16  }
 0x1f9   :  { %205 = vsyncadd [#allocation6], 4294967280 }
 0x1fa   :  { %163 = vsyncpa [#allocation6], 1 }

</bundles_post_ra>
